<compile_context>
chip_gen: v7x
topology: tpu7x:2x2x1
jax: 0.10.0
libtpu: 0.0.40
codegen_flags: <defaults>
</compile_context>

<pallas_src>
import math

import numpy as np
import jax
import jax.numpy as jnp
from jax.experimental import pallas as pl
from jax.experimental.pallas import tpu as pltpu

# ---------------- small synthetic configuration ----------------------------
PATCH = 4
EMBED = 32
HEADS = 2
DEPTH = 2
MLP_HID = 64
IN_CH = 3
UAV_HW = (8, 8)      # template z spatial size  -> 2x2 = 4 tokens
SAT_HW = (16, 16)    # search   x spatial size  -> 4x4 = 16 tokens
NZ = (UAV_HW[0] // PATCH) * (UAV_HW[1] // PATCH)
NX = (SAT_HW[0] // PATCH) * (SAT_HW[1] // PATCH)
NT = NX + NZ                     # both streams concatenated (per batch)
HX = SAT_HW[0] // PATCH          # 4
WX = SAT_HW[1] // PATCH          # 4
HZ = UAV_HW[0] // PATCH          # 2
WZ = UAV_HW[1] // PATCH          # 2
HO = HX - HZ + 1                 # 3
WO = WX - WZ + 1                 # 3
KK = HZ * WZ                     # 4 correlation taps
DH = EMBED // HEADS              # 16
PATCH_DIM = PATCH * PATCH * IN_CH
HEAD_PAD = 128                   # lane-dense padded width of the fused cls/loc head
W_COLS = 3 * EMBED + EMBED + MLP_HID       # 192: [wqkv | wproj | w1]
W_ROWS = EMBED + MLP_HID                   # 96:  top rows = 32-row mats, bottom = w2
VEC_COLS = 3 * EMBED                       # 96:  widest 1-D param (bqkv)


# ---------------- in-kernel helpers -----------------------------------------
def _layernorm(x, g, b, eps=1e-5):
    mu = jnp.mean(x, axis=-1, keepdims=True)
    var = jnp.mean((x - mu) ** 2, axis=-1, keepdims=True)
    return (x - mu) * jax.lax.rsqrt(var + eps) * g + b


def _gelu(x):
    # TODO(synk): tanh approximation; PyTorch nn.GELU defaults to the exact erf form.
    return 0.5 * x * (1.0 + jnp.tanh(0.7978845608028654 * (x + 0.044715 * x * x * x)))


# ---------------- the single fused Pallas kernel ----------------------------
def _fused_forward_kernel(patches_ref, posb_ref, mask_ref, embed_w_ref,
                          w_ref, vec_ref, sel_ref, head_ref, out_ref):
    """patch embed -> DEPTH transformer blocks (siamese, masked) -> GC neck -> heads."""
    D = EMBED
    scale = 1.0 / math.sqrt(DH)

    mask = mask_ref[...]                                           # (BN, BN)

    # ---- patch embedding (embed bias folded into pos host-side) ------------
    tok = (jnp.dot(patches_ref[...], embed_w_ref[...],
                   preferred_element_type=jnp.float32)
           + posb_ref[...])                                        # (BN, D)

    # ---- transformer encoder blocks, statically unrolled -------------------
    for d in range(DEPTH):
        wd = w_ref[d]                                              # (96, 192)
        vec = vec_ref[d]                                           # (8, 96)
        wqkv = wd[:D, 0:3 * D]                                     # (32, 96)
        wproj = wd[:D, 3 * D:4 * D]                                # (32, 32)
        w1 = wd[:D, 4 * D:4 * D + MLP_HID]                         # (32, 64)
        w2 = wd[D:D + MLP_HID, 0:D]                                # (64, 32)

        ln1_g = vec[0:1, :D]
        ln1_b = vec[1:2, :D]
        bqkv = vec[2:3, :3 * D]
        bproj = vec[3:4, :D]
        ln2_g = vec[4:5, :D]
        ln2_b = vec[5:6, :D]
        b1 = vec[6:7, :MLP_HID]
        b2 = vec[7:8, :D]

        h = _layernorm(tok, ln1_g, ln1_b)
        qkv = jnp.dot(h, wqkv, preferred_element_type=jnp.float32) + bqkv   # (BN, 3D)

        # per-head attention on flat (BN, .) tensors; output projection is a
        # per-head accumulate (no concat).  Batch/stream separation is done by
        # the block-diagonal mask.
        attn = None
        for hh in range(HEADS):
            q_h = qkv[:, hh * DH:(hh + 1) * DH]                    # (BN, DH)
            k_h = qkv[:, D + hh * DH:D + (hh + 1) * DH]
            v_h = qkv[:, 2 * D + hh * DH:2 * D + (hh + 1) * DH]

            s = jax.lax.dot_general(                               # q @ k^T, (BN, BN)
                q_h, k_h, (((1,), (1,)), ((), ())),
                preferred_element_type=jnp.float32) * scale + mask
            s = s - jnp.max(s, axis=-1, keepdims=True)
            p = jnp.exp(s)
            p = p * pl.reciprocal(jnp.sum(p, axis=-1, keepdims=True), approx=True)

            o_h = jnp.dot(p, v_h, preferred_element_type=jnp.float32)       # (BN, DH)
            contrib = jnp.dot(o_h, wproj[hh * DH:(hh + 1) * DH, :],
                              preferred_element_type=jnp.float32)           # (BN, D)
            attn = contrib if attn is None else attn + contrib
        tok = tok + attn + bproj

        h2 = _layernorm(tok, ln2_g, ln2_b)
        m = jnp.dot(h2, w1, preferred_element_type=jnp.float32) + b1
        m = _gelu(m)
        tok = tok + jnp.dot(m, w2, preferred_element_type=jnp.float32) + b2

    # ---- GC neck: depth-wise cross-correlation via constant selection matmuls
    # (idle MXU); valid output rows land at b*NT + i*WX + j, everything else 0.
    corr = None
    for k in range(KK):
        xs = jnp.dot(sel_ref[2 * k], tok, preferred_element_type=jnp.float32)
        zb = jnp.dot(sel_ref[2 * k + 1], tok, preferred_element_type=jnp.float32)
        prod = xs * zb
        corr = prod if corr is None else corr + prod
    corr = jnp.maximum(corr, 0.0)                                  # ReLU

    # fused 1x1 heads: col 0 = cls, cols 1..2 = loc, cols 3..127 zero padding.
    hw = head_ref[0:D, :]                                          # (D, 128)
    hb = head_ref[D:D + 1, :]                                      # (1, 128)
    out_ref[...] = (jnp.dot(corr, hw, preferred_element_type=jnp.float32)
                    + hb).astype(out_ref.dtype)


# ---------------- glue (plain JAX): layout plumbing & params ----------------
def extract_patches(img_nchw, patch):
    # NOTE: flattening order is (ph, pw, C)-last; differs from a PyTorch Conv2d
    # patch-embed weight layout (C-first).  Self-consistent with random weights.
    B, C, H, W = img_nchw.shape
    x = jnp.transpose(img_nchw, (0, 2, 3, 1))                      # NHWC
    x = x.reshape(B, H // patch, patch, W // patch, patch, C)
    x = jnp.transpose(x, (0, 1, 3, 2, 4, 5))
    return x.reshape(B, (H // patch) * (W // patch), patch * patch * C)


def init_params(key):
    keys = iter(jax.random.split(key, 64))

    def nrm(shape, std=0.02):
        return (std * jax.random.normal(next(keys), shape)).astype(jnp.float32)

    params = {
        'embed_w': nrm((PATCH_DIM, EMBED)),
        'embed_b': jnp.zeros((EMBED,), jnp.float32),
        'pos_x': nrm((1, NX, EMBED)),
        'pos_z': nrm((1, NZ, EMBED)),
        'blocks': [],
        'cls_w': nrm((EMBED,)),
        'cls_b': jnp.zeros((1,), jnp.float32),
        'loc_w': nrm((2, EMBED)),
        'loc_b': jnp.zeros((2,), jnp.float32),
    }
    for _ in range(DEPTH):
        params['blocks'].append({
            'ln1_g': jnp.ones((EMBED,), jnp.float32),
            'ln1_b': jnp.zeros((EMBED,), jnp.float32),
            'wqkv': nrm((EMBED, 3 * EMBED)),
            'bqkv': jnp.zeros((3 * EMBED,), jnp.float32),
            'wproj': nrm((EMBED, EMBED)),
            'bproj': jnp.zeros((EMBED,), jnp.float32),
            'ln2_g': jnp.ones((EMBED,), jnp.float32),
            'ln2_b': jnp.zeros((EMBED,), jnp.float32),
            'w1': nrm((EMBED, MLP_HID)),
            'b1': jnp.zeros((MLP_HID,), jnp.float32),
            'w2': nrm((MLP_HID, EMBED)),
            'b2': jnp.zeros((EMBED,), jnp.float32),
        })
    return params


def _pack_block_slabs(params):
    """Pack all per-block weights into 2 slabs (fewer prologue DMAs)."""
    w_slabs, v_slabs = [], []

    def pad_row(v):
        return jnp.pad(v, (0, VEC_COLS - v.shape[0]))

    for blk in params['blocks']:
        top = jnp.concatenate([blk['wqkv'], blk['wproj'], blk['w1']], axis=1)  # (32, 192)
        bot = jnp.pad(blk['w2'], ((0, 0), (0, W_COLS - EMBED)))                # (64, 192)
        w_slabs.append(jnp.concatenate([top, bot], axis=0))                    # (96, 192)
        v_slabs.append(jnp.stack([
            pad_row(blk['ln1_g']), pad_row(blk['ln1_b']),
            pad_row(blk['bqkv']), pad_row(blk['bproj']),
            pad_row(blk['ln2_g']), pad_row(blk['ln2_b']),
            pad_row(blk['b1']), pad_row(blk['b2'])]))                          # (8, 96)
    return jnp.stack(w_slabs), jnp.stack(v_slabs)


def _build_attn_mask(B):
    """(B*NT, B*NT) additive mask: 0 iff same batch AND same stream, else -1e9."""
    idx = np.arange(B * NT)
    same_batch = (idx[:, None] // NT) == (idx[None, :] // NT)
    is_x = (idx % NT) < NX
    same_stream = is_x[:, None] == is_x[None, :]
    return jnp.asarray(np.where(same_batch & same_stream, 0.0, -1e9).astype(np.float32))


def _build_sel(B):
    """Constant selection matrices for the GC correlation (built at trace time)."""
    sel = np.zeros((2 * KK, B * NT, B * NT), np.float32)
    taps = [(kh, kw) for kh in range(HZ) for kw in range(WZ)]
    for k, (kh, kw) in enumerate(taps):
        for b in range(B):
            for i in range(HO):
                for j in range(WO):
                    r = b * NT + i * WX + j
                    cx = b * NT + (i + kh) * WX + (j + kw)        # shifted search row
                    cz = b * NT + NX + kh * WZ + kw               # template row
                    sel[2 * k, r, cx] = 1.0
                    sel[2 * k + 1, r, cz] = 1.0
    return jnp.asarray(sel)


def siam_uav_forward(params, z, x):
    """z: (B, 3, 8, 8) NCHW template;  x: (B, 3, 16, 16) NCHW search image."""
    B = x.shape[0]
    BN = B * NT

    # ---- wrapper-side layout plumbing (no heavy compute) --------------------
    patches_x = extract_patches(x, PATCH)                           # (B, NX, P)
    patches_z = extract_patches(z, PATCH)                           # (B, NZ, P)
    patches = jnp.concatenate([patches_x, patches_z], axis=1).reshape(BN, PATCH_DIM)

    pos = jnp.concatenate([params['pos_x'], params['pos_z']], axis=1)    # (1, NT, D)
    pos_bias = pos + params['embed_b'][None, None, :]                    # fold embed bias
    pos_bias = jnp.broadcast_to(pos_bias, (B, NT, EMBED)).reshape(BN, EMBED)

    mask = _build_attn_mask(B)                                           # (BN, BN)
    sel = _build_sel(B)                                                  # (2*KK, BN, BN)
    w_slab, vec_slab = _pack_block_slabs(params)                         # (DEPTH,96,192), (DEPTH,8,96)

    # fused, lane-dense cls/loc head slab: rows 0..D-1 = weights, row D = bias.
    hw = jnp.stack([params['cls_w'], params['loc_w'][0], params['loc_w'][1]], axis=1)
    head_w = jnp.pad(hw, ((0, 0), (0, HEAD_PAD - 3)))                    # (D, 128)
    hb = jnp.concatenate([params['cls_b'], params['loc_b']])
    head_b = jnp.pad(hb, (0, HEAD_PAD - 3)).reshape(1, HEAD_PAD)
    head_slab = jnp.concatenate(
        [head_w, head_b, jnp.zeros((7, HEAD_PAD), jnp.float32)], axis=0)  # (D+8, 128)

    # ---- ONE fused pallas_call (no grid: whole batch in a single step) ------
    vmem_spec = pl.BlockSpec(memory_space=pltpu.MemorySpace.VMEM)
    out = pl.pallas_call(
        _fused_forward_kernel,
        out_shape=jax.ShapeDtypeStruct((BN, HEAD_PAD), jnp.float32),
        in_specs=[vmem_spec] * 8,
        out_specs=vmem_spec,
    )(patches, pos_bias, mask, params['embed_w'],
      w_slab, vec_slab, sel, head_slab)

    # gather the 18 valid output rows and the 3 real channels host-side
    rows = np.array([b * NT + i * WX + j
                     for b in range(B) for i in range(HO) for j in range(WO)])
    heads = out[rows, :3].reshape(B, HO, WO, 3)
    cls = jnp.transpose(heads[..., 0:1], (0, 3, 1, 2))              # (B, 1, HO, WO)
    loc = jnp.transpose(heads[..., 1:3], (0, 3, 1, 2))              # (B, 2, HO, WO)
    return cls, loc


if __name__ == "__main__":
    key = jax.random.PRNGKey(0)
    k_p, k_z, k_x = jax.random.split(key, 3)

    params = init_params(k_p)
    z = jax.random.normal(k_z, (2, IN_CH, UAV_HW[0], UAV_HW[1]), jnp.float32)
    x = jax.random.normal(k_x, (2, IN_CH, SAT_HW[0], SAT_HW[1]), jnp.float32)

    fwd = jax.jit(siam_uav_forward)
    cls, loc = fwd(params, z, x)
    jax.block_until_ready((cls, loc))

    assert cls.shape == (2, 1, HO, WO), cls.shape
    assert loc.shape == (2, 2, HO, WO), loc.shape
    assert bool(jnp.all(jnp.isfinite(cls))) and bool(jnp.all(jnp.isfinite(loc)))
    print("KERNEL_OK")
</pallas_src>

<mosaic_0001>
module attributes {stable_mosaic.version = 11 : i64} {
  func.func @_fused_forward_kernel(%arg0: memref<40x48xf32, #tpu.memory_space<vmem>>, %arg1: memref<40x32xf32, #tpu.memory_space<vmem>>, %arg2: memref<40x40xf32, #tpu.memory_space<vmem>>, %arg3: memref<48x32xf32, #tpu.memory_space<vmem>>, %arg4: memref<2x96x192xf32, #tpu.memory_space<vmem>>, %arg5: memref<2x8x96xf32, #tpu.memory_space<vmem>>, %arg6: memref<8x40x40xf32, #tpu.memory_space<vmem>>, %arg7: memref<40x128xf32, #tpu.memory_space<vmem>>, %arg8: memref<40x128xf32, #tpu.memory_space<vmem>>) attributes {dimension_semantics = [], scalar_prefetch = 0 : i64, scratch_operands = 0 : i64, tpu.core_type = #tpu.core_type<tc>} {
    %c0 = arith.constant 0 : index
    %c0_0 = arith.constant 0 : index
    %0 = vector.load %arg2[%c0, %c0_0] : memref<40x40xf32, #tpu.memory_space<vmem>>, vector<40x40xf32>
    %c0_1 = arith.constant 0 : index
    %c0_2 = arith.constant 0 : index
    %1 = vector.load %arg0[%c0_1, %c0_2] : memref<40x48xf32, #tpu.memory_space<vmem>>, vector<40x48xf32>
    %c0_3 = arith.constant 0 : index
    %c0_4 = arith.constant 0 : index
    %2 = vector.load %arg3[%c0_3, %c0_4] : memref<48x32xf32, #tpu.memory_space<vmem>>, vector<48x32xf32>
    %cst = arith.constant dense<0.000000e+00> : vector<40x32xf32>
    %3 = tpu.matmul %1, %2, %cst {dimension_numbers = #tpu.dot_dimension_numbers<[1], [0], [0], [1], [0, 0, 1, 1], [], []>} : vector<40x48xf32>, vector<48x32xf32>, vector<40x32xf32> -> vector<40x32xf32>
    %c0_5 = arith.constant 0 : index
    %c0_6 = arith.constant 0 : index
    %4 = vector.load %arg1[%c0_5, %c0_6] : memref<40x32xf32, #tpu.memory_space<vmem>>, vector<40x32xf32>
    %5 = arith.addf %3, %4 : vector<40x32xf32>
    %c0_7 = arith.constant 0 : index
    %c0_8 = arith.constant 0 : index
    %c0_9 = arith.constant 0 : index
    %6 = vector.load %arg4[%c0_7, %c0_8, %c0_9] : memref<2x96x192xf32, #tpu.memory_space<vmem>>, vector<1x96x192xf32>
    %7 = vector.shape_cast %6 : vector<1x96x192xf32> to vector<96x192xf32>
    %c0_10 = arith.constant 0 : index
    %c0_11 = arith.constant 0 : index
    %c0_12 = arith.constant 0 : index
    %8 = vector.load %arg5[%c0_10, %c0_11, %c0_12] : memref<2x8x96xf32, #tpu.memory_space<vmem>>, vector<1x8x96xf32>
    %9 = vector.shape_cast %8 : vector<1x8x96xf32> to vector<8x96xf32>
    %10 = vector.extract_strided_slice %7 {offsets = [0, 0], sizes = [32, 96], strides = [1, 1]} : vector<96x192xf32> to vector<32x96xf32>
    %11 = vector.extract_strided_slice %7 {offsets = [0, 96], sizes = [32, 32], strides = [1, 1]} : vector<96x192xf32> to vector<32x32xf32>
    %12 = vector.extract_strided_slice %7 {offsets = [0, 128], sizes = [32, 64], strides = [1, 1]} : vector<96x192xf32> to vector<32x64xf32>
    %13 = vector.extract_strided_slice %7 {offsets = [32, 0], sizes = [64, 32], strides = [1, 1]} : vector<96x192xf32> to vector<64x32xf32>
    %14 = vector.extract_strided_slice %9 {offsets = [0, 0], sizes = [1, 32], strides = [1, 1]} : vector<8x96xf32> to vector<1x32xf32>
    %15 = vector.extract_strided_slice %9 {offsets = [1, 0], sizes = [1, 32], strides = [1, 1]} : vector<8x96xf32> to vector<1x32xf32>
    %16 = vector.extract_strided_slice %9 {offsets = [2, 0], sizes = [1, 96], strides = [1, 1]} : vector<8x96xf32> to vector<1x96xf32>
    %17 = vector.extract_strided_slice %9 {offsets = [3, 0], sizes = [1, 32], strides = [1, 1]} : vector<8x96xf32> to vector<1x32xf32>
    %18 = vector.extract_strided_slice %9 {offsets = [4, 0], sizes = [1, 32], strides = [1, 1]} : vector<8x96xf32> to vector<1x32xf32>
    %19 = vector.extract_strided_slice %9 {offsets = [5, 0], sizes = [1, 32], strides = [1, 1]} : vector<8x96xf32> to vector<1x32xf32>
    %20 = vector.extract_strided_slice %9 {offsets = [6, 0], sizes = [1, 64], strides = [1, 1]} : vector<8x96xf32> to vector<1x64xf32>
    %21 = vector.extract_strided_slice %9 {offsets = [7, 0], sizes = [1, 32], strides = [1, 1]} : vector<8x96xf32> to vector<1x32xf32>
    %cst_13 = arith.constant dense<0.000000e+00> : vector<40xf32>
    %22 = vector.multi_reduction <add>, %5, %cst_13 [1] : vector<40x32xf32> to vector<40xf32>
    %23 = vector.shape_cast %22 : vector<40xf32> to vector<40x1xf32>
    %cst_14 = arith.constant 3.200000e+01 : f32
    %24 = vector.broadcast %cst_14 : f32 to vector<40x1xf32>
    %25 = arith.divf %23, %24 : vector<40x1xf32>
    %26 = vector.broadcast %25 : vector<40x1xf32> to vector<40x32xf32>
    %27 = arith.subf %5, %26 : vector<40x32xf32>
    %28 = arith.mulf %27, %27 : vector<40x32xf32>
    %cst_15 = arith.constant dense<0.000000e+00> : vector<40xf32>
    %29 = vector.multi_reduction <add>, %28, %cst_15 [1] : vector<40x32xf32> to vector<40xf32>
    %30 = vector.shape_cast %29 : vector<40xf32> to vector<40x1xf32>
    %cst_16 = arith.constant 3.200000e+01 : f32
    %31 = vector.broadcast %cst_16 : f32 to vector<40x1xf32>
    %32 = arith.divf %30, %31 : vector<40x1xf32>
    %33 = vector.broadcast %25 : vector<40x1xf32> to vector<40x32xf32>
    %34 = arith.subf %5, %33 : vector<40x32xf32>
    %cst_17 = arith.constant 9.99999974E-6 : f32
    %35 = vector.broadcast %cst_17 : f32 to vector<40x1xf32>
    %36 = arith.addf %32, %35 : vector<40x1xf32>
    %37 = math.rsqrt %36 : vector<40x1xf32>
    %38 = vector.broadcast %37 : vector<40x1xf32> to vector<40x32xf32>
    %39 = arith.mulf %34, %38 : vector<40x32xf32>
    %40 = vector.broadcast %14 : vector<1x32xf32> to vector<40x32xf32>
    %41 = arith.mulf %39, %40 : vector<40x32xf32>
    %42 = vector.broadcast %15 : vector<1x32xf32> to vector<40x32xf32>
    %43 = arith.addf %41, %42 : vector<40x32xf32>
    %cst_18 = arith.constant dense<0.000000e+00> : vector<40x96xf32>
    %44 = tpu.matmul %43, %10, %cst_18 {dimension_numbers = #tpu.dot_dimension_numbers<[1], [0], [0], [1], [0, 0, 1, 1], [], []>} : vector<40x32xf32>, vector<32x96xf32>, vector<40x96xf32> -> vector<40x96xf32>
    %45 = vector.broadcast %16 : vector<1x96xf32> to vector<40x96xf32>
    %46 = arith.addf %44, %45 : vector<40x96xf32>
    %47 = vector.extract_strided_slice %46 {offsets = [0, 0], sizes = [40, 16], strides = [1, 1]} : vector<40x96xf32> to vector<40x16xf32>
    %48 = vector.extract_strided_slice %46 {offsets = [0, 32], sizes = [40, 16], strides = [1, 1]} : vector<40x96xf32> to vector<40x16xf32>
    %49 = vector.extract_strided_slice %46 {offsets = [0, 64], sizes = [40, 16], strides = [1, 1]} : vector<40x96xf32> to vector<40x16xf32>
    %cst_19 = arith.constant dense<0.000000e+00> : vector<40x40xf32>
    %50 = tpu.matmul %47, %48, %cst_19 {dimension_numbers = #tpu.dot_dimension_numbers<[1], [1], [0], [0], [0, 0, 1, 0], [], []>} : vector<40x16xf32>, vector<40x16xf32>, vector<40x40xf32> -> vector<40x40xf32>
    %cst_20 = arith.constant 2.500000e-01 : f32
    %51 = vector.broadcast %cst_20 : f32 to vector<40x40xf32>
    %52 = arith.mulf %50, %51 : vector<40x40xf32>
    %53 = arith.addf %52, %0 : vector<40x40xf32>
    %cst_21 = arith.constant dense<0xFF800000> : vector<40xf32>
    %54 = vector.multi_reduction <maximumf>, %53, %cst_21 [1] : vector<40x40xf32> to vector<40xf32>
    %55 = vector.shape_cast %54 : vector<40xf32> to vector<40x1xf32>
    %56 = vector.broadcast %55 : vector<40x1xf32> to vector<40x40xf32>
    %57 = arith.subf %53, %56 : vector<40x40xf32>
    %58 = math.exp %57 : vector<40x40xf32>
    %cst_22 = arith.constant dense<0.000000e+00> : vector<40xf32>
    %59 = vector.multi_reduction <add>, %58, %cst_22 [1] : vector<40x40xf32> to vector<40xf32>
    %60 = vector.shape_cast %59 : vector<40xf32> to vector<40x1xf32>
    %61 = tpu.reciprocal %60 {approx = true} : vector<40x1xf32> -> vector<40x1xf32>
    %62 = vector.broadcast %61 : vector<40x1xf32> to vector<40x40xf32>
    %63 = arith.mulf %58, %62 : vector<40x40xf32>
    %cst_23 = arith.constant dense<0.000000e+00> : vector<40x16xf32>
    %64 = tpu.matmul %63, %49, %cst_23 {dimension_numbers = #tpu.dot_dimension_numbers<[1], [0], [0], [1], [0, 0, 1, 1], [], []>} : vector<40x40xf32>, vector<40x16xf32>, vector<40x16xf32> -> vector<40x16xf32>
    %65 = vector.extract_strided_slice %11 {offsets = [0, 0], sizes = [16, 32], strides = [1, 1]} : vector<32x32xf32> to vector<16x32xf32>
    %cst_24 = arith.constant dense<0.000000e+00> : vector<40x32xf32>
    %66 = tpu.matmul %64, %65, %cst_24 {dimension_numbers = #tpu.dot_dimension_numbers<[1], [0], [0], [1], [0, 0, 1, 1], [], []>} : vector<40x16xf32>, vector<16x32xf32>, vector<40x32xf32> -> vector<40x32xf32>
    %67 = vector.extract_strided_slice %46 {offsets = [0, 16], sizes = [40, 16], strides = [1, 1]} : vector<40x96xf32> to vector<40x16xf32>
    %68 = vector.extract_strided_slice %46 {offsets = [0, 48], sizes = [40, 16], strides = [1, 1]} : vector<40x96xf32> to vector<40x16xf32>
    %69 = vector.extract_strided_slice %46 {offsets = [0, 80], sizes = [40, 16], strides = [1, 1]} : vector<40x96xf32> to vector<40x16xf32>
    %cst_25 = arith.constant dense<0.000000e+00> : vector<40x40xf32>
    %70 = tpu.matmul %67, %68, %cst_25 {dimension_numbers = #tpu.dot_dimension_numbers<[1], [1], [0], [0], [0, 0, 1, 0], [], []>} : vector<40x16xf32>, vector<40x16xf32>, vector<40x40xf32> -> vector<40x40xf32>
    %cst_26 = arith.constant 2.500000e-01 : f32
    %71 = vector.broadcast %cst_26 : f32 to vector<40x40xf32>
    %72 = arith.mulf %70, %71 : vector<40x40xf32>
    %73 = arith.addf %72, %0 : vector<40x40xf32>
    %cst_27 = arith.constant dense<0xFF800000> : vector<40xf32>
    %74 = vector.multi_reduction <maximumf>, %73, %cst_27 [1] : vector<40x40xf32> to vector<40xf32>
    %75 = vector.shape_cast %74 : vector<40xf32> to vector<40x1xf32>
    %76 = vector.broadcast %75 : vector<40x1xf32> to vector<40x40xf32>
    %77 = arith.subf %73, %76 : vector<40x40xf32>
    %78 = math.exp %77 : vector<40x40xf32>
    %cst_28 = arith.constant dense<0.000000e+00> : vector<40xf32>
    %79 = vector.multi_reduction <add>, %78, %cst_28 [1] : vector<40x40xf32> to vector<40xf32>
    %80 = vector.shape_cast %79 : vector<40xf32> to vector<40x1xf32>
    %81 = tpu.reciprocal %80 {approx = true} : vector<40x1xf32> -> vector<40x1xf32>
    %82 = vector.broadcast %81 : vector<40x1xf32> to vector<40x40xf32>
    %83 = arith.mulf %78, %82 : vector<40x40xf32>
    %cst_29 = arith.constant dense<0.000000e+00> : vector<40x16xf32>
    %84 = tpu.matmul %83, %69, %cst_29 {dimension_numbers = #tpu.dot_dimension_numbers<[1], [0], [0], [1], [0, 0, 1, 1], [], []>} : vector<40x40xf32>, vector<40x16xf32>, vector<40x16xf32> -> vector<40x16xf32>
    %85 = vector.extract_strided_slice %11 {offsets = [16, 0], sizes = [16, 32], strides = [1, 1]} : vector<32x32xf32> to vector<16x32xf32>
    %cst_30 = arith.constant dense<0.000000e+00> : vector<40x32xf32>
    %86 = tpu.matmul %84, %85, %cst_30 {dimension_numbers = #tpu.dot_dimension_numbers<[1], [0], [0], [1], [0, 0, 1, 1], [], []>} : vector<40x16xf32>, vector<16x32xf32>, vector<40x32xf32> -> vector<40x32xf32>
    %87 = arith.addf %66, %86 : vector<40x32xf32>
    %88 = arith.addf %5, %87 : vector<40x32xf32>
    %89 = vector.broadcast %17 : vector<1x32xf32> to vector<40x32xf32>
    %90 = arith.addf %88, %89 : vector<40x32xf32>
    %cst_31 = arith.constant dense<0.000000e+00> : vector<40xf32>
    %91 = vector.multi_reduction <add>, %90, %cst_31 [1] : vector<40x32xf32> to vector<40xf32>
    %92 = vector.shape_cast %91 : vector<40xf32> to vector<40x1xf32>
    %cst_32 = arith.constant 3.200000e+01 : f32
    %93 = vector.broadcast %cst_32 : f32 to vector<40x1xf32>
    %94 = arith.divf %92, %93 : vector<40x1xf32>
    %95 = vector.broadcast %94 : vector<40x1xf32> to vector<40x32xf32>
    %96 = arith.subf %90, %95 : vector<40x32xf32>
    %97 = arith.mulf %96, %96 : vector<40x32xf32>
    %cst_33 = arith.constant dense<0.000000e+00> : vector<40xf32>
    %98 = vector.multi_reduction <add>, %97, %cst_33 [1] : vector<40x32xf32> to vector<40xf32>
    %99 = vector.shape_cast %98 : vector<40xf32> to vector<40x1xf32>
    %cst_34 = arith.constant 3.200000e+01 : f32
    %100 = vector.broadcast %cst_34 : f32 to vector<40x1xf32>
    %101 = arith.divf %99, %100 : vector<40x1xf32>
    %102 = vector.broadcast %94 : vector<40x1xf32> to vector<40x32xf32>
    %103 = arith.subf %90, %102 : vector<40x32xf32>
    %cst_35 = arith.constant 9.99999974E-6 : f32
    %104 = vector.broadcast %cst_35 : f32 to vector<40x1xf32>
    %105 = arith.addf %101, %104 : vector<40x1xf32>
    %106 = math.rsqrt %105 : vector<40x1xf32>
    %107 = vector.broadcast %106 : vector<40x1xf32> to vector<40x32xf32>
    %108 = arith.mulf %103, %107 : vector<40x32xf32>
    %109 = vector.broadcast %18 : vector<1x32xf32> to vector<40x32xf32>
    %110 = arith.mulf %108, %109 : vector<40x32xf32>
    %111 = vector.broadcast %19 : vector<1x32xf32> to vector<40x32xf32>
    %112 = arith.addf %110, %111 : vector<40x32xf32>
    %cst_36 = arith.constant dense<0.000000e+00> : vector<40x64xf32>
    %113 = tpu.matmul %112, %12, %cst_36 {dimension_numbers = #tpu.dot_dimension_numbers<[1], [0], [0], [1], [0, 0, 1, 1], [], []>} : vector<40x32xf32>, vector<32x64xf32>, vector<40x64xf32> -> vector<40x64xf32>
    %114 = vector.broadcast %20 : vector<1x64xf32> to vector<40x64xf32>
    %115 = arith.addf %113, %114 : vector<40x64xf32>
    %cst_37 = arith.constant 5.000000e-01 : f32
    %116 = vector.broadcast %cst_37 : f32 to vector<40x64xf32>
    %117 = arith.mulf %116, %115 : vector<40x64xf32>
    %cst_38 = arith.constant 4.471500e-02 : f32
    %118 = vector.broadcast %cst_38 : f32 to vector<40x64xf32>
    %119 = arith.mulf %118, %115 : vector<40x64xf32>
    %120 = arith.mulf %119, %115 : vector<40x64xf32>
    %121 = arith.mulf %120, %115 : vector<40x64xf32>
    %122 = arith.addf %115, %121 : vector<40x64xf32>
    %cst_39 = arith.constant 0.797884583 : f32
    %123 = vector.broadcast %cst_39 : f32 to vector<40x64xf32>
    %124 = arith.mulf %123, %122 : vector<40x64xf32>
    %125 = math.tanh %124 : vector<40x64xf32>
    %cst_40 = arith.constant 1.000000e+00 : f32
    %126 = vector.broadcast %cst_40 : f32 to vector<40x64xf32>
    %127 = arith.addf %126, %125 : vector<40x64xf32>
    %128 = arith.mulf %117, %127 : vector<40x64xf32>
    %cst_41 = arith.constant dense<0.000000e+00> : vector<40x32xf32>
    %129 = tpu.matmul %128, %13, %cst_41 {dimension_numbers = #tpu.dot_dimension_numbers<[1], [0], [0], [1], [0, 0, 1, 1], [], []>} : vector<40x64xf32>, vector<64x32xf32>, vector<40x32xf32> -> vector<40x32xf32>
    %130 = arith.addf %90, %129 : vector<40x32xf32>
    %131 = vector.broadcast %21 : vector<1x32xf32> to vector<40x32xf32>
    %132 = arith.addf %130, %131 : vector<40x32xf32>
    %c1 = arith.constant 1 : index
    %c0_42 = arith.constant 0 : index
    %c0_43 = arith.constant 0 : index
    %133 = vector.load %arg4[%c1, %c0_42, %c0_43] : memref<2x96x192xf32, #tpu.memory_space<vmem>>, vector<1x96x192xf32>
    %134 = vector.shape_cast %133 : vector<1x96x192xf32> to vector<96x192xf32>
    %c1_44 = arith.constant 1 : index
    %c0_45 = arith.constant 0 : index
    %c0_46 = arith.constant 0 : index
    %135 = vector.load %arg5[%c1_44, %c0_45, %c0_46] : memref<2x8x96xf32, #tpu.memory_space<vmem>>, vector<1x8x96xf32>
    %136 = vector.shape_cast %135 : vector<1x8x96xf32> to vector<8x96xf32>
    %137 = vector.extract_strided_slice %134 {offsets = [0, 0], sizes = [32, 96], strides = [1, 1]} : vector<96x192xf32> to vector<32x96xf32>
    %138 = vector.extract_strided_slice %134 {offsets = [0, 96], sizes = [32, 32], strides = [1, 1]} : vector<96x192xf32> to vector<32x32xf32>
    %139 = vector.extract_strided_slice %134 {offsets = [0, 128], sizes = [32, 64], strides = [1, 1]} : vector<96x192xf32> to vector<32x64xf32>
    %140 = vector.extract_strided_slice %134 {offsets = [32, 0], sizes = [64, 32], strides = [1, 1]} : vector<96x192xf32> to vector<64x32xf32>
    %141 = vector.extract_strided_slice %136 {offsets = [0, 0], sizes = [1, 32], strides = [1, 1]} : vector<8x96xf32> to vector<1x32xf32>
    %142 = vector.extract_strided_slice %136 {offsets = [1, 0], sizes = [1, 32], strides = [1, 1]} : vector<8x96xf32> to vector<1x32xf32>
    %143 = vector.extract_strided_slice %136 {offsets = [2, 0], sizes = [1, 96], strides = [1, 1]} : vector<8x96xf32> to vector<1x96xf32>
    %144 = vector.extract_strided_slice %136 {offsets = [3, 0], sizes = [1, 32], strides = [1, 1]} : vector<8x96xf32> to vector<1x32xf32>
    %145 = vector.extract_strided_slice %136 {offsets = [4, 0], sizes = [1, 32], strides = [1, 1]} : vector<8x96xf32> to vector<1x32xf32>
    %146 = vector.extract_strided_slice %136 {offsets = [5, 0], sizes = [1, 32], strides = [1, 1]} : vector<8x96xf32> to vector<1x32xf32>
    %147 = vector.extract_strided_slice %136 {offsets = [6, 0], sizes = [1, 64], strides = [1, 1]} : vector<8x96xf32> to vector<1x64xf32>
    %148 = vector.extract_strided_slice %136 {offsets = [7, 0], sizes = [1, 32], strides = [1, 1]} : vector<8x96xf32> to vector<1x32xf32>
    %cst_47 = arith.constant dense<0.000000e+00> : vector<40xf32>
    %149 = vector.multi_reduction <add>, %132, %cst_47 [1] : vector<40x32xf32> to vector<40xf32>
    %150 = vector.shape_cast %149 : vector<40xf32> to vector<40x1xf32>
    %cst_48 = arith.constant 3.200000e+01 : f32
    %151 = vector.broadcast %cst_48 : f32 to vector<40x1xf32>
    %152 = arith.divf %150, %151 : vector<40x1xf32>
    %153 = vector.broadcast %152 : vector<40x1xf32> to vector<40x32xf32>
    %154 = arith.subf %132, %153 : vector<40x32xf32>
    %155 = arith.mulf %154, %154 : vector<40x32xf32>
    %cst_49 = arith.constant dense<0.000000e+00> : vector<40xf32>
    %156 = vector.multi_reduction <add>, %155, %cst_49 [1] : vector<40x32xf32> to vector<40xf32>
    %157 = vector.shape_cast %156 : vector<40xf32> to vector<40x1xf32>
    %cst_50 = arith.constant 3.200000e+01 : f32
    %158 = vector.broadcast %cst_50 : f32 to vector<40x1xf32>
    %159 = arith.divf %157, %158 : vector<40x1xf32>
    %160 = vector.broadcast %152 : vector<40x1xf32> to vector<40x32xf32>
    %161 = arith.subf %132, %160 : vector<40x32xf32>
    %cst_51 = arith.constant 9.99999974E-6 : f32
    %162 = vector.broadcast %cst_51 : f32 to vector<40x1xf32>
    %163 = arith.addf %159, %162 : vector<40x1xf32>
    %164 = math.rsqrt %163 : vector<40x1xf32>
    %165 = vector.broadcast %164 : vector<40x1xf32> to vector<40x32xf32>
    %166 = arith.mulf %161, %165 : vector<40x32xf32>
    %167 = vector.broadcast %141 : vector<1x32xf32> to vector<40x32xf32>
    %168 = arith.mulf %166, %167 : vector<40x32xf32>
    %169 = vector.broadcast %142 : vector<1x32xf32> to vector<40x32xf32>
    %170 = arith.addf %168, %169 : vector<40x32xf32>
    %cst_52 = arith.constant dense<0.000000e+00> : vector<40x96xf32>
    %171 = tpu.matmul %170, %137, %cst_52 {dimension_numbers = #tpu.dot_dimension_numbers<[1], [0], [0], [1], [0, 0, 1, 1], [], []>} : vector<40x32xf32>, vector<32x96xf32>, vector<40x96xf32> -> vector<40x96xf32>
    %172 = vector.broadcast %143 : vector<1x96xf32> to vector<40x96xf32>
    %173 = arith.addf %171, %172 : vector<40x96xf32>
    %174 = vector.extract_strided_slice %173 {offsets = [0, 0], sizes = [40, 16], strides = [1, 1]} : vector<40x96xf32> to vector<40x16xf32>
    %175 = vector.extract_strided_slice %173 {offsets = [0, 32], sizes = [40, 16], strides = [1, 1]} : vector<40x96xf32> to vector<40x16xf32>
    %176 = vector.extract_strided_slice %173 {offsets = [0, 64], sizes = [40, 16], strides = [1, 1]} : vector<40x96xf32> to vector<40x16xf32>
    %cst_53 = arith.constant dense<0.000000e+00> : vector<40x40xf32>
    %177 = tpu.matmul %174, %175, %cst_53 {dimension_numbers = #tpu.dot_dimension_numbers<[1], [1], [0], [0], [0, 0, 1, 0], [], []>} : vector<40x16xf32>, vector<40x16xf32>, vector<40x40xf32> -> vector<40x40xf32>
    %cst_54 = arith.constant 2.500000e-01 : f32
    %178 = vector.broadcast %cst_54 : f32 to vector<40x40xf32>
    %179 = arith.mulf %177, %178 : vector<40x40xf32>
    %180 = arith.addf %179, %0 : vector<40x40xf32>
    %cst_55 = arith.constant dense<0xFF800000> : vector<40xf32>
    %181 = vector.multi_reduction <maximumf>, %180, %cst_55 [1] : vector<40x40xf32> to vector<40xf32>
    %182 = vector.shape_cast %181 : vector<40xf32> to vector<40x1xf32>
    %183 = vector.broadcast %182 : vector<40x1xf32> to vector<40x40xf32>
    %184 = arith.subf %180, %183 : vector<40x40xf32>
    %185 = math.exp %184 : vector<40x40xf32>
    %cst_56 = arith.constant dense<0.000000e+00> : vector<40xf32>
    %186 = vector.multi_reduction <add>, %185, %cst_56 [1] : vector<40x40xf32> to vector<40xf32>
    %187 = vector.shape_cast %186 : vector<40xf32> to vector<40x1xf32>
    %188 = tpu.reciprocal %187 {approx = true} : vector<40x1xf32> -> vector<40x1xf32>
    %189 = vector.broadcast %188 : vector<40x1xf32> to vector<40x40xf32>
    %190 = arith.mulf %185, %189 : vector<40x40xf32>
    %cst_57 = arith.constant dense<0.000000e+00> : vector<40x16xf32>
    %191 = tpu.matmul %190, %176, %cst_57 {dimension_numbers = #tpu.dot_dimension_numbers<[1], [0], [0], [1], [0, 0, 1, 1], [], []>} : vector<40x40xf32>, vector<40x16xf32>, vector<40x16xf32> -> vector<40x16xf32>
    %192 = vector.extract_strided_slice %138 {offsets = [0, 0], sizes = [16, 32], strides = [1, 1]} : vector<32x32xf32> to vector<16x32xf32>
    %cst_58 = arith.constant dense<0.000000e+00> : vector<40x32xf32>
    %193 = tpu.matmul %191, %192, %cst_58 {dimension_numbers = #tpu.dot_dimension_numbers<[1], [0], [0], [1], [0, 0, 1, 1], [], []>} : vector<40x16xf32>, vector<16x32xf32>, vector<40x32xf32> -> vector<40x32xf32>
    %194 = vector.extract_strided_slice %173 {offsets = [0, 16], sizes = [40, 16], strides = [1, 1]} : vector<40x96xf32> to vector<40x16xf32>
    %195 = vector.extract_strided_slice %173 {offsets = [0, 48], sizes = [40, 16], strides = [1, 1]} : vector<40x96xf32> to vector<40x16xf32>
    %196 = vector.extract_strided_slice %173 {offsets = [0, 80], sizes = [40, 16], strides = [1, 1]} : vector<40x96xf32> to vector<40x16xf32>
    %cst_59 = arith.constant dense<0.000000e+00> : vector<40x40xf32>
    %197 = tpu.matmul %194, %195, %cst_59 {dimension_numbers = #tpu.dot_dimension_numbers<[1], [1], [0], [0], [0, 0, 1, 0], [], []>} : vector<40x16xf32>, vector<40x16xf32>, vector<40x40xf32> -> vector<40x40xf32>
    %cst_60 = arith.constant 2.500000e-01 : f32
    %198 = vector.broadcast %cst_60 : f32 to vector<40x40xf32>
    %199 = arith.mulf %197, %198 : vector<40x40xf32>
    %200 = arith.addf %199, %0 : vector<40x40xf32>
    %cst_61 = arith.constant dense<0xFF800000> : vector<40xf32>
    %201 = vector.multi_reduction <maximumf>, %200, %cst_61 [1] : vector<40x40xf32> to vector<40xf32>
    %202 = vector.shape_cast %201 : vector<40xf32> to vector<40x1xf32>
    %203 = vector.broadcast %202 : vector<40x1xf32> to vector<40x40xf32>
    %204 = arith.subf %200, %203 : vector<40x40xf32>
    %205 = math.exp %204 : vector<40x40xf32>
    %cst_62 = arith.constant dense<0.000000e+00> : vector<40xf32>
    %206 = vector.multi_reduction <add>, %205, %cst_62 [1] : vector<40x40xf32> to vector<40xf32>
    %207 = vector.shape_cast %206 : vector<40xf32> to vector<40x1xf32>
    %208 = tpu.reciprocal %207 {approx = true} : vector<40x1xf32> -> vector<40x1xf32>
    %209 = vector.broadcast %208 : vector<40x1xf32> to vector<40x40xf32>
    %210 = arith.mulf %205, %209 : vector<40x40xf32>
    %cst_63 = arith.constant dense<0.000000e+00> : vector<40x16xf32>
    %211 = tpu.matmul %210, %196, %cst_63 {dimension_numbers = #tpu.dot_dimension_numbers<[1], [0], [0], [1], [0, 0, 1, 1], [], []>} : vector<40x40xf32>, vector<40x16xf32>, vector<40x16xf32> -> vector<40x16xf32>
    %212 = vector.extract_strided_slice %138 {offsets = [16, 0], sizes = [16, 32], strides = [1, 1]} : vector<32x32xf32> to vector<16x32xf32>
    %cst_64 = arith.constant dense<0.000000e+00> : vector<40x32xf32>
    %213 = tpu.matmul %211, %212, %cst_64 {dimension_numbers = #tpu.dot_dimension_numbers<[1], [0], [0], [1], [0, 0, 1, 1], [], []>} : vector<40x16xf32>, vector<16x32xf32>, vector<40x32xf32> -> vector<40x32xf32>
    %214 = arith.addf %193, %213 : vector<40x32xf32>
    %215 = arith.addf %132, %214 : vector<40x32xf32>
    %216 = vector.broadcast %144 : vector<1x32xf32> to vector<40x32xf32>
    %217 = arith.addf %215, %216 : vector<40x32xf32>
    %cst_65 = arith.constant dense<0.000000e+00> : vector<40xf32>
    %218 = vector.multi_reduction <add>, %217, %cst_65 [1] : vector<40x32xf32> to vector<40xf32>
    %219 = vector.shape_cast %218 : vector<40xf32> to vector<40x1xf32>
    %cst_66 = arith.constant 3.200000e+01 : f32
    %220 = vector.broadcast %cst_66 : f32 to vector<40x1xf32>
    %221 = arith.divf %219, %220 : vector<40x1xf32>
    %222 = vector.broadcast %221 : vector<40x1xf32> to vector<40x32xf32>
    %223 = arith.subf %217, %222 : vector<40x32xf32>
    %224 = arith.mulf %223, %223 : vector<40x32xf32>
    %cst_67 = arith.constant dense<0.000000e+00> : vector<40xf32>
    %225 = vector.multi_reduction <add>, %224, %cst_67 [1] : vector<40x32xf32> to vector<40xf32>
    %226 = vector.shape_cast %225 : vector<40xf32> to vector<40x1xf32>
    %cst_68 = arith.constant 3.200000e+01 : f32
    %227 = vector.broadcast %cst_68 : f32 to vector<40x1xf32>
    %228 = arith.divf %226, %227 : vector<40x1xf32>
    %229 = vector.broadcast %221 : vector<40x1xf32> to vector<40x32xf32>
    %230 = arith.subf %217, %229 : vector<40x32xf32>
    %cst_69 = arith.constant 9.99999974E-6 : f32
    %231 = vector.broadcast %cst_69 : f32 to vector<40x1xf32>
    %232 = arith.addf %228, %231 : vector<40x1xf32>
    %233 = math.rsqrt %232 : vector<40x1xf32>
    %234 = vector.broadcast %233 : vector<40x1xf32> to vector<40x32xf32>
    %235 = arith.mulf %230, %234 : vector<40x32xf32>
    %236 = vector.broadcast %145 : vector<1x32xf32> to vector<40x32xf32>
    %237 = arith.mulf %235, %236 : vector<40x32xf32>
    %238 = vector.broadcast %146 : vector<1x32xf32> to vector<40x32xf32>
    %239 = arith.addf %237, %238 : vector<40x32xf32>
    %cst_70 = arith.constant dense<0.000000e+00> : vector<40x64xf32>
    %240 = tpu.matmul %239, %139, %cst_70 {dimension_numbers = #tpu.dot_dimension_numbers<[1], [0], [0], [1], [0, 0, 1, 1], [], []>} : vector<40x32xf32>, vector<32x64xf32>, vector<40x64xf32> -> vector<40x64xf32>
    %241 = vector.broadcast %147 : vector<1x64xf32> to vector<40x64xf32>
    %242 = arith.addf %240, %241 : vector<40x64xf32>
    %cst_71 = arith.constant 5.000000e-01 : f32
    %243 = vector.broadcast %cst_71 : f32 to vector<40x64xf32>
    %244 = arith.mulf %243, %242 : vector<40x64xf32>
    %cst_72 = arith.constant 4.471500e-02 : f32
    %245 = vector.broadcast %cst_72 : f32 to vector<40x64xf32>
    %246 = arith.mulf %245, %242 : vector<40x64xf32>
    %247 = arith.mulf %246, %242 : vector<40x64xf32>
    %248 = arith.mulf %247, %242 : vector<40x64xf32>
    %249 = arith.addf %242, %248 : vector<40x64xf32>
    %cst_73 = arith.constant 0.797884583 : f32
    %250 = vector.broadcast %cst_73 : f32 to vector<40x64xf32>
    %251 = arith.mulf %250, %249 : vector<40x64xf32>
    %252 = math.tanh %251 : vector<40x64xf32>
    %cst_74 = arith.constant 1.000000e+00 : f32
    %253 = vector.broadcast %cst_74 : f32 to vector<40x64xf32>
    %254 = arith.addf %253, %252 : vector<40x64xf32>
    %255 = arith.mulf %244, %254 : vector<40x64xf32>
    %cst_75 = arith.constant dense<0.000000e+00> : vector<40x32xf32>
    %256 = tpu.matmul %255, %140, %cst_75 {dimension_numbers = #tpu.dot_dimension_numbers<[1], [0], [0], [1], [0, 0, 1, 1], [], []>} : vector<40x64xf32>, vector<64x32xf32>, vector<40x32xf32> -> vector<40x32xf32>
    %257 = arith.addf %217, %256 : vector<40x32xf32>
    %258 = vector.broadcast %148 : vector<1x32xf32> to vector<40x32xf32>
    %259 = arith.addf %257, %258 : vector<40x32xf32>
    %c0_76 = arith.constant 0 : index
    %c0_77 = arith.constant 0 : index
    %c0_78 = arith.constant 0 : index
    %260 = vector.load %arg6[%c0_76, %c0_77, %c0_78] : memref<8x40x40xf32, #tpu.memory_space<vmem>>, vector<1x40x40xf32>
    %261 = vector.shape_cast %260 : vector<1x40x40xf32> to vector<40x40xf32>
    %cst_79 = arith.constant dense<0.000000e+00> : vector<40x32xf32>
    %262 = tpu.matmul %261, %259, %cst_79 {dimension_numbers = #tpu.dot_dimension_numbers<[1], [0], [0], [1], [0, 0, 1, 1], [], []>} : vector<40x40xf32>, vector<40x32xf32>, vector<40x32xf32> -> vector<40x32xf32>
    %c1_80 = arith.constant 1 : index
    %c0_81 = arith.constant 0 : index
    %c0_82 = arith.constant 0 : index
    %263 = vector.load %arg6[%c1_80, %c0_81, %c0_82] : memref<8x40x40xf32, #tpu.memory_space<vmem>>, vector<1x40x40xf32>
    %264 = vector.shape_cast %263 : vector<1x40x40xf32> to vector<40x40xf32>
    %cst_83 = arith.constant dense<0.000000e+00> : vector<40x32xf32>
    %265 = tpu.matmul %264, %259, %cst_83 {dimension_numbers = #tpu.dot_dimension_numbers<[1], [0], [0], [1], [0, 0, 1, 1], [], []>} : vector<40x40xf32>, vector<40x32xf32>, vector<40x32xf32> -> vector<40x32xf32>
    %266 = arith.mulf %262, %265 : vector<40x32xf32>
    %c2 = arith.constant 2 : index
    %c0_84 = arith.constant 0 : index
    %c0_85 = arith.constant 0 : index
    %267 = vector.load %arg6[%c2, %c0_84, %c0_85] : memref<8x40x40xf32, #tpu.memory_space<vmem>>, vector<1x40x40xf32>
    %268 = vector.shape_cast %267 : vector<1x40x40xf32> to vector<40x40xf32>
    %cst_86 = arith.constant dense<0.000000e+00> : vector<40x32xf32>
    %269 = tpu.matmul %268, %259, %cst_86 {dimension_numbers = #tpu.dot_dimension_numbers<[1], [0], [0], [1], [0, 0, 1, 1], [], []>} : vector<40x40xf32>, vector<40x32xf32>, vector<40x32xf32> -> vector<40x32xf32>
    %c3 = arith.constant 3 : index
    %c0_87 = arith.constant 0 : index
    %c0_88 = arith.constant 0 : index
    %270 = vector.load %arg6[%c3, %c0_87, %c0_88] : memref<8x40x40xf32, #tpu.memory_space<vmem>>, vector<1x40x40xf32>
    %271 = vector.shape_cast %270 : vector<1x40x40xf32> to vector<40x40xf32>
    %cst_89 = arith.constant dense<0.000000e+00> : vector<40x32xf32>
    %272 = tpu.matmul %271, %259, %cst_89 {dimension_numbers = #tpu.dot_dimension_numbers<[1], [0], [0], [1], [0, 0, 1, 1], [], []>} : vector<40x40xf32>, vector<40x32xf32>, vector<40x32xf32> -> vector<40x32xf32>
    %273 = arith.mulf %269, %272 : vector<40x32xf32>
    %274 = arith.addf %266, %273 : vector<40x32xf32>
    %c4 = arith.constant 4 : index
    %c0_90 = arith.constant 0 : index
    %c0_91 = arith.constant 0 : index
    %275 = vector.load %arg6[%c4, %c0_90, %c0_91] : memref<8x40x40xf32, #tpu.memory_space<vmem>>, vector<1x40x40xf32>
    %276 = vector.shape_cast %275 : vector<1x40x40xf32> to vector<40x40xf32>
    %cst_92 = arith.constant dense<0.000000e+00> : vector<40x32xf32>
    %277 = tpu.matmul %276, %259, %cst_92 {dimension_numbers = #tpu.dot_dimension_numbers<[1], [0], [0], [1], [0, 0, 1, 1], [], []>} : vector<40x40xf32>, vector<40x32xf32>, vector<40x32xf32> -> vector<40x32xf32>
    %c5 = arith.constant 5 : index
    %c0_93 = arith.constant 0 : index
    %c0_94 = arith.constant 0 : index
    %278 = vector.load %arg6[%c5, %c0_93, %c0_94] : memref<8x40x40xf32, #tpu.memory_space<vmem>>, vector<1x40x40xf32>
    %279 = vector.shape_cast %278 : vector<1x40x40xf32> to vector<40x40xf32>
    %cst_95 = arith.constant dense<0.000000e+00> : vector<40x32xf32>
    %280 = tpu.matmul %279, %259, %cst_95 {dimension_numbers = #tpu.dot_dimension_numbers<[1], [0], [0], [1], [0, 0, 1, 1], [], []>} : vector<40x40xf32>, vector<40x32xf32>, vector<40x32xf32> -> vector<40x32xf32>
    %281 = arith.mulf %277, %280 : vector<40x32xf32>
    %282 = arith.addf %274, %281 : vector<40x32xf32>
    %c6 = arith.constant 6 : index
    %c0_96 = arith.constant 0 : index
    %c0_97 = arith.constant 0 : index
    %283 = vector.load %arg6[%c6, %c0_96, %c0_97] : memref<8x40x40xf32, #tpu.memory_space<vmem>>, vector<1x40x40xf32>
    %284 = vector.shape_cast %283 : vector<1x40x40xf32> to vector<40x40xf32>
    %cst_98 = arith.constant dense<0.000000e+00> : vector<40x32xf32>
    %285 = tpu.matmul %284, %259, %cst_98 {dimension_numbers = #tpu.dot_dimension_numbers<[1], [0], [0], [1], [0, 0, 1, 1], [], []>} : vector<40x40xf32>, vector<40x32xf32>, vector<40x32xf32> -> vector<40x32xf32>
    %c7 = arith.constant 7 : index
    %c0_99 = arith.constant 0 : index
    %c0_100 = arith.constant 0 : index
    %286 = vector.load %arg6[%c7, %c0_99, %c0_100] : memref<8x40x40xf32, #tpu.memory_space<vmem>>, vector<1x40x40xf32>
    %287 = vector.shape_cast %286 : vector<1x40x40xf32> to vector<40x40xf32>
    %cst_101 = arith.constant dense<0.000000e+00> : vector<40x32xf32>
    %288 = tpu.matmul %287, %259, %cst_101 {dimension_numbers = #tpu.dot_dimension_numbers<[1], [0], [0], [1], [0, 0, 1, 1], [], []>} : vector<40x40xf32>, vector<40x32xf32>, vector<40x32xf32> -> vector<40x32xf32>
    %289 = arith.mulf %285, %288 : vector<40x32xf32>
    %290 = arith.addf %282, %289 : vector<40x32xf32>
    %cst_102 = arith.constant 0.000000e+00 : f32
    %291 = vector.broadcast %cst_102 : f32 to vector<40x32xf32>
    %292 = arith.maximumf %290, %291 : vector<40x32xf32>
    %c0_103 = arith.constant 0 : index
    %c0_104 = arith.constant 0 : index
    %293 = vector.load %arg7[%c0_103, %c0_104] : memref<40x128xf32, #tpu.memory_space<vmem>>, vector<32x128xf32>
    %c32 = arith.constant 32 : index
    %c0_105 = arith.constant 0 : index
    %294 = vector.load %arg7[%c32, %c0_105] : memref<40x128xf32, #tpu.memory_space<vmem>>, vector<1x128xf32>
    %cst_106 = arith.constant dense<0.000000e+00> : vector<40x128xf32>
    %295 = tpu.matmul %292, %293, %cst_106 {dimension_numbers = #tpu.dot_dimension_numbers<[1], [0], [0], [1], [0, 0, 1, 1], [], []>} : vector<40x32xf32>, vector<32x128xf32>, vector<40x128xf32> -> vector<40x128xf32>
    %296 = vector.broadcast %294 : vector<1x128xf32> to vector<40x128xf32>
    %297 = arith.addf %295, %296 : vector<40x128xf32>
    %c0_107 = arith.constant 0 : index
    %c0_108 = arith.constant 0 : index
    %298 = vector.load %arg8[%c0_107, %c0_108] : memref<40x128xf32, #tpu.memory_space<vmem>>, vector<40x128xf32>
    tpu.vector_store %arg8[%c0_107, %c0_108], %297 {strides = array<i32>} : memref<40x128xf32, #tpu.memory_space<vmem>>, vector<40x128xf32>,
    return
  }
}

</mosaic_0001>

<bundles_post_ra>
// kernel: siam_uav_forward.1
= control target key start
LH: loop header
LB: loop body
LE: loop exit
PB: predicated region body
PF: predicated region fallthrough
CT: control target
= control target key end

     0   :  { %v5671_v0 = vmov 0.0|0.0   ;;  %vm5672_vm0 = vmmov 0   ;;  %v5673_v4 = vmov 0.0   ;;  %vm50_vm1 = vcmask 392192   ;;  %s5674_s21 = smov 96   ;;  %s5675_s22 = smov 80   ;;  %s7112_s3 = inlined_call_operand.vmem [shape: f32[48,32], index: 3, kind: input, shape index: {}]   ;;  %s7113_s0 = inlined_call_operand.vmem [shape: f32[40,48], index: 0, kind: input, shape index: {}]   ;;  %s7114_s1 = inlined_call_operand.vmem [shape: f32[40,32], index: 1, kind: input, shape index: {}]   ;;  %s7115_s4 = inlined_call_operand.vmem [shape: f32[2,96,192], index: 4, kind: input, shape index: {}]   ;;  %s7116_s5 = inlined_call_operand.vmem [shape: f32[2,8,96], index: 5, kind: input, shape index: {}]   ;;  %s7117_s2 = inlined_call_operand.vmem [shape: f32[40,40], index: 2, kind: input, shape index: {}]   ;;  %s7118_s6 = inlined_call_operand.vmem [shape: f32[8,40,40], index: 6, kind: input, shape index: {}]   ;;  %s7119_s7 = inlined_call_operand.vmem [shape: f32[40,128], index: 7, kind: input, shape index: {}]   ;;  %s7120_s8 = inlined_call_operand.vmem [shape: f32[40,128], index: 8, kind: output, shape index: {}]  }
   0x1   :  { %5236 = vmatprep.subr.bf16.mxu0 %v5671_v0  ;;  %v39_v1 = vld [vmem:[%s7112_s3] sm:$0xff]  ;;  %v40_v2 = vld [vmem:[%s7112_s3 + $0x8] sm:$0xff]  ;;  %v41_v3 = vld [vmem:[%s7112_s3 + $0x10] sm:$0xff]  ;;  %4568 = vmatprep.mubr.msk.f32.mxu0 %vm5672_vm0, %v5673_v4  ;;  %vm173_vm2 = vcmask 261120   ;;  %s5676_s23 = smov 112   ;;  %vm382_vm3 = vcmask 130048  }
   0x2   :  { %v5237_v5 = vpack.c.bf16 %v40_v2, %v39_v1  ;;  %v42_v6 = vld [vmem:[%s7112_s3 + $0x18] sm:$0xff]  ;;  %5245 = vmatprep.subr.bf16.mxu1 %v5671_v0  ;;  %4591 = vmatprep.mubr.msk.f32.mxu1 %vm5672_vm0, %v5673_v4  ;;  %v43_v8 = vld [vmem:[%s7112_s3 + $0x20] sm:$0xff]  ;;  %v44_v9 = vld [vmem:[%s7112_s3 + $0x28] sm:$0xff]  ;;  %vm503_vm5 = vcmask 326656   ;;  %s5677_s11 = smov 64   ;;  %s5678_s12 = smov 48  }
   0x3   :  { %v5240_v7 = vpack.c.bf16 %v42_v6, %v41_v3  ;;  %v5243_v10 = vpack.c.bf16 %v44_v9, %v43_v8  ;;  %v34_v11 = vld [vmem:[%s7113_s0] sm:$0xff]  ;;  %v35_v12 = vld [vmem:[%s7113_s0 + $0x8] sm:$0xff]  ;;  %v36_v13 = vld [vmem:[%s7113_s0 + $0x10] sm:$0xff]  ;;  %vm1471_vm6 = vcmask 523264  }
   0x4   :  { %5238 = vmatpush3.bf16.msra.mxu0 %v5237_v5  ;;  %v37_v14 = vld [vmem:[%s7113_s0 + $0x18] sm:$0xff]  ;;  %v38_v15 = vld [vmem:[%s7113_s0 + $0x20] sm:$0xff]  ;;  %v46_v20 = vld [vmem:[%s7114_s1 + $0x8] sm:$0xff] }
   0x5   :  { %5239 = vmatprep.subr.bf16.mxu0 %v5671_v0  ;;  %v45_v16 = vld [vmem:[%s7114_s1] sm:$0xff]  ;;  %v47_v25 = vld [vmem:[%s7114_s1 + $0x10] sm:$0xff]  ;;  %v48_v30 = vld [vmem:[%s7114_s1 + $0x18] sm:$0xff] }
   0x6   :  { %v49_v35 = vld [vmem:[%s7114_s1 + $0x20] sm:$0xff]  ;;  %v5850_v5 = vld [vmem:[%s7115_s4 + $0x10] sm:$0xff]  ;;  %vm5935_vm4 = vmpackc.low %vm382_vm3, %vm382_vm3  ;;  %s5679_s1 = smov 32  }
   0x7   :  { %v5845_v3 = vld [vmem:[%s7115_s4] sm:$0xff]  ;;  %v5863_v8 = vld [vmem:[%s7115_s4 + $0x30] sm:$0xff] }
   0x8   :  { %5241 = vmatpush3.bf16.msra.mxu0 %v5240_v7  ;;  %v5246_v6 = vpack.c.bf16 %v5850_v5, %v5845_v3  ;;  %v5858_v7 = vld [vmem:[%s7115_s4 + $0x20] sm:$0xff]  ;;  %v5469_v9 = vpack.i.bf16 %v5850_v5, %v5845_v3 }
   0x9   :  { %5242 = vmatprep.subr.bf16.mxu0 %v5671_v0 }
   0xa   :  { %5247 = vmatpush3.bf16.msra.mxu1 %v5246_v6 }
   0xb   :  { %5248 = vmatprep.subr.bf16.mxu1 %v5671_v0 }
   0xc   :  { %5244 = vmatpush3.bf16.msra.mxu0 %v5243_v10  ;;  %v5249_v10 = vpack.c.bf16 %v5863_v8, %v5858_v7 }
   0xd   :  { %5259 = vmatprep.subr.bf16.mxu0 %v5671_v0 }
   0xe   :  { %5250 = vmatpush3.bf16.msra.mxu1 %v5249_v10 }
   0xf   :  { %4569 = vmatmul.mubr.msk.f32.vlgmr.msra.gmra.mrb[0].mxu0 %vm50_vm1, %v34_v11  ;;  %5251 = vmatprep.subr.bf16.mxu1 %v5671_v0 }
  0x10   :  { %4571 = vmatprep.mubr.msk.f32.mxu0 %vm5672_vm0, %v5673_v4 }
  0x13   :  { %4572 = vmatmul.mubr.msk.f32.gmra.mrb[2].mxu0 %vm50_vm1, %v35_v12 }
  0x14   :  { %4574 = vmatprep.mubr.msk.f32.mxu0 %vm5672_vm0, %v5673_v4 }
  0x17   :  { %4575 = vmatmul.mubr.msk.f32.gmra.mrb[4].mxu0 %vm50_vm1, %v36_v13  ;;  %v240_v13 = vlaneseq }
  0x18   :  { %4577 = vmatprep.mubr.msk.f32.mxu0 %vm5672_vm0, %v5673_v4 }
  0x1b   :  { %4578 = vmatmul.mubr.msk.f32.gmra.mrb[6].mxu0 %vm50_vm1, %v37_v14 }
  0x1c   :  { %4580 = vmatprep.mubr.msk.f32.mxu0 %vm5672_vm0, %v5673_v4 }
  0x1f   :  { %4581 = vmatmul.mubr.msk.f32.gmra.mrb[8].mxu0 %vm50_vm1, %v38_v15 }
  0x20   :  { %4641 = vmatprep.mubr.msk.f32.mxu0 %vm5672_vm0, %v5673_v4 }
  0xe2   :  { %v132_v17 = vpop.f32.mrb[0].mxu0 }
  0xe3   :  { %v5780_v18 = vadd.f32 %v132_v17, %v45_v16  ;;  %v4570_v19 = vpop.f32.mrb[1].mxu0  ;;  %v5870_v17 = vshrl.u32 %v240_v13, 7 }
  0xe5   :  { %v174_v21 = vsel %vm173_vm2, %v5780_v18, 0.0 }
  0xe6   :  { %175 = vadd.xlane.f32.xlu0 %v174_v21  ;;  %v137_v22 = vpop.f32.mrb[2].mxu0 }
  0xe7   :  { %v5787_v23 = vadd.f32 %v137_v22, %v46_v20  ;;  %v4573_v24 = vpop.f32.mrb[3].mxu0  ;;  %v242_v22 = vsub.s32 0, %v5870_v17 }
  0xe9   :  { %v177_v26 = vsel %vm173_vm2, %v5787_v23, 0.0 }
  0xea   :  { %178 = vadd.xlane.f32.xlu0 %v177_v26  ;;  %v142_v27 = vpop.f32.mrb[4].mxu0 }
  0xeb   :  { %v5794_v28 = vadd.f32 %v142_v27, %v47_v25  ;;  %v4576_v29 = vpop.f32.mrb[5].mxu0  ;;  %v5876_v25 = vld [vmem:[%s7116_s5] sm:$0xff]  ;;  %v251_v27 = vsub.s32 1, %v5870_v17 }
  0xed   :  { %v180_v31 = vsel %vm173_vm2, %v5794_v28, 0.0 }
  0xee   :  { %181 = vadd.xlane.f32.xlu1 %v180_v31  ;;  %v147_v32 = vpop.f32.mrb[6].mxu0 }
  0xef   :  { %v5801_v33 = vadd.f32 %v147_v32, %v48_v30  ;;  %v4579_v34 = vpop.f32.mrb[7].mxu0  ;;  %v243_v30 = vrot.slane %v5876_v25, %v242_v22 }
  0xf1   :  { %v183_v36 = vsel %vm173_vm2, %v5801_v33, 0.0 }
  0xf2   :  { %184 = vadd.xlane.f32.xlu1 %v183_v36  ;;  %v152_v37 = vpop.f32.mrb[8].mxu0  ;;  %v252_v36 = vrot.slane %v5876_v25, %v251_v27 }
  0xf3   :  { %v5808_v38 = vadd.f32 %v152_v37, %v49_v35  ;;  %v4582_v39 = vpop.f32.mrb[9].mxu0 }
  0xf5   :  { %v186_v40 = vsel %vm173_vm2, %v5808_v38, 0.0 }
  0xf6   :  { %187 = vadd.xlane.f32.xlu0 %v186_v40 }
 0x173   :  { %v176_v41 = vpop.xlane.xlu0 %175 }
 0x174   :  { %v190_v42 = vmul.f32 0.03125, %v176_v41 }
 0x176   :  { %v5813_v43 = vsub.f32 %v5780_v18, %v190_v42 }
 0x177   :  { %v179_v44 = vpop.xlane.xlu0 %178 }
 0x178   :  { %v191_v45 = vmul.f32 0.03125, %v179_v44  ;;  %v200_v46 = vmul.f32 %v5813_v43, %v5813_v43 }
 0x17a   :  { %v5818_v47 = vsub.f32 %v5787_v23, %v191_v45  ;;  %v205_v48 = vsel %vm173_vm2, %v200_v46, 0.0 }
 0x17b   :  { %v182_v49 = vpop.xlane.xlu1 %181  ;;  %206 = vadd.xlane.f32.xlu1 %v205_v48 }
 0x17c   :  { %v192_v50 = vmul.f32 0.03125, %v182_v49  ;;  %v201_v51 = vmul.f32 %v5818_v47, %v5818_v47 }
 0x17e   :  { %v5824_v52 = vsub.f32 %v5794_v28, %v192_v50  ;;  %v208_v53 = vsel %vm173_vm2, %v201_v51, 0.0 }
 0x17f   :  { %v185_v54 = vpop.xlane.xlu1 %184  ;;  %209 = vadd.xlane.f32.xlu0 %v208_v53 }
 0x180   :  { %v193_v55 = vmul.f32 0.03125, %v185_v54  ;;  %v202_v56 = vmul.f32 %v5824_v52, %v5824_v52 }
 0x182   :  { %v5830_v57 = vsub.f32 %v5801_v33, %v193_v55  ;;  %v211_v58 = vsel %vm173_vm2, %v202_v56, 0.0 }
 0x183   :  { %212 = vadd.xlane.f32.xlu1 %v211_v58  ;;  %v188_v59 = vpop.xlane.xlu0 %187 }
 0x184   :  { %v194_v60 = vmul.f32 0.03125, %v188_v59  ;;  %v203_v61 = vmul.f32 %v5830_v57, %v5830_v57 }
 0x186   :  { %v5836_v62 = vsub.f32 %v5808_v38, %v194_v60  ;;  %v214_v63 = vsel %vm173_vm2, %v203_v61, 0.0 }
 0x187   :  { %215 = vadd.xlane.f32.xlu0 %v214_v63 }
 0x188   :  { %v204_v1 = vmul.f32 %v5836_v62, %v5836_v62 }
 0x18a   :  { %v217_v2 = vsel %vm173_vm2, %v204_v1, 0.0 }
 0x18b   :  { %218 = vadd.xlane.f32.xlu1 %v217_v2 }
 0x208   :  { %v207_v11 = vpop.xlane.xlu1 %206 }
 0x209   :  { %v220_v12 = vmul.f32 0.03125, %v207_v11 }
 0x20b   :  { %v225_v14 = vadd.f32 1e-05, %v220_v12 }
 0x20c   :  { %v210_v15 = vpop.xlane.xlu0 %209 }
 0x20d   :  { %5524 = vrsqrt.f32 %v225_v14  ;;  %v221_v16 = vmul.f32 0.03125, %v210_v15 }
 0x20f   :  { %v226_v19 = vadd.f32 1e-05, %v221_v16 }
 0x210   :  { %v213_v20 = vpop.xlane.xlu1 %212 }
 0x211   :  { %5526 = vrsqrt.f32 %v226_v19  ;;  %v222_v21 = vmul.f32 0.03125, %v213_v20 }
 0x213   :  { %v227_v24 = vadd.f32 1e-05, %v222_v21 }
 0x214   :  { %v216_v26 = vpop.xlane.xlu0 %215 }
 0x215   :  { %5528 = vrsqrt.f32 %v227_v24  ;;  %v223_v29 = vmul.f32 0.03125, %v216_v26 }
 0x217   :  { %v5525_v31 = vpop.eup %5524  ;;  %v228_v32 = vadd.f32 1e-05, %v223_v29 }
 0x218   :  { %v219_v34 = vpop.xlane.xlu1 %218  ;;  %v235_v35 = vmul.f32 %v5525_v31, %v5813_v43 }
 0x219   :  { %5530 = vrsqrt.f32 %v228_v32  ;;  %v224_v37 = vmul.f32 0.03125, %v219_v34 }
 0x21a   :  { %v244_v39 = vmul.f32 %v243_v30, %v235_v35 }
 0x21b   :  { %v5527_v40 = vpop.eup %5526  ;;  %v229_v41 = vadd.f32 1e-05, %v224_v37 }
 0x21c   :  { %v253_v42 = vadd.f32 %v252_v36, %v244_v39  ;;  %v236_v44 = vmul.f32 %v5527_v40, %v5818_v47 }
 0x21d   :  { %5532 = vrsqrt.f32 %v229_v41 }
 0x21e   :  { %4592 = vmatmul.mubr.msk.f32.vlgmr.msra.gmra.mrb[0].mxu1 %vm173_vm2, %v253_v42  ;;  %v245_v45 = vmul.f32 %v243_v30, %v236_v44 }
 0x21f   :  { %v5529_v46 = vpop.eup %5528  ;;  %4594 = vmatprep.mubr.msk.f32.mxu1 %vm5672_vm0, %v5673_v4 }
 0x220   :  { %v254_v43 = vadd.f32 %v252_v36, %v245_v45  ;;  %v237_v48 = vmul.f32 %v5529_v46, %v5824_v52 }
 0x222   :  { %4595 = vmatmul.mubr.msk.f32.gmra.mrb[2].mxu1 %vm173_vm2, %v254_v43  ;;  %v246_v49 = vmul.f32 %v243_v30, %v237_v48 }
 0x223   :  { %v5531_v50 = vpop.eup %5530  ;;  %4597 = vmatprep.mubr.msk.f32.mxu1 %vm5672_vm0, %v5673_v4 }
 0x224   :  { %v255_v51 = vadd.f32 %v252_v36, %v246_v49  ;;  %v238_v47 = vmul.f32 %v5531_v50, %v5830_v57  ;;  %v260_v57 = vsub.s32 2, %v5870_v17 }
 0x226   :  { %4598 = vmatmul.mubr.msk.f32.gmra.mrb[4].mxu1 %vm173_vm2, %v255_v51  ;;  %v247_v53 = vmul.f32 %v243_v30, %v238_v47  ;;  %v261_v60 = vrot.slane %v5876_v25, %v260_v57 }
 0x227   :  { %v5533_v54 = vpop.eup %5532  ;;  %4600 = vmatprep.mubr.msk.f32.mxu1 %vm5672_vm0, %v5673_v4 }
 0x228   :  { %v256_v55 = vadd.f32 %v252_v36, %v247_v53  ;;  %v239_v52 = vmul.f32 %v5533_v54, %v5836_v62 }
 0x22a   :  { %4601 = vmatmul.mubr.msk.f32.gmra.mrb[6].mxu1 %vm173_vm2, %v256_v55  ;;  %v248_v56 = vmul.f32 %v243_v30, %v239_v52  ;;  %v29_v55 = vld [vmem:[%s7117_s2] sm:$0xff] }
 0x22b   :  { %4603 = vmatprep.mubr.msk.f32.mxu1 %vm5672_vm0, %v5673_v4 }
 0x22c   :  { %v257_v58 = vadd.f32 %v252_v36, %v248_v56 }
 0x22e   :  { %4604 = vmatmul.mubr.msk.f32.gmra.mrb[8].mxu1 %vm173_vm2, %v257_v58 }
 0x22f   :  { %4616 = vmatprep.mubr.msk.f32.mxu1 %vm5672_vm0, %v5673_v4 }
 0x2f1   :  { %v343_v59 = vpop.f32.mrb[0].mxu1 }
 0x2f2   :  { %v4593_v61 = vpop.f32.mrb[1].mxu1  ;;  %v344_v63 = vadd.f32 %v343_v59, %v261_v60 }
 0x2f5   :  { %v348_v62 = vpop.f32.mrb[2].mxu1 }
 0x2f6   :  { %v349_v1 = vadd.f32 %v348_v62, %v261_v60  ;;  %v4596_v2 = vpop.f32.mrb[3].mxu1 }
 0x2f8   :  { %v5909_v6 = vpack.i.bf16 %v349_v1, %v344_v63 }
 0x2f9   :  { %v353_v10 = vpop.f32.mrb[4].mxu1 }
 0x2fa   :  { %5425 = vrot.lane.b32.xlu0 %v5909_v6, %s5674_s21  ;;  %v4599_v11 = vpop.f32.mrb[5].mxu1  ;;  %v354_v13 = vadd.f32 %v353_v10, %v261_v60  ;;  %v31_v10 = vld [vmem:[%s7117_s2 + $0x10] sm:$0xff] }
 0x2fd   :  { %v358_v12 = vpop.f32.mrb[6].mxu1 }
 0x2fe   :  { %v359_v14 = vadd.f32 %v358_v12, %v261_v60  ;;  %v4602_v15 = vpop.f32.mrb[7].mxu1 }
 0x300   :  { %v5913_v16 = vpack.i.bf16 %v359_v14, %v354_v13 }
 0x301   :  { %v363_v19 = vpop.f32.mrb[8].mxu1 }
 0x302   :  { %5440 = vrot.lane.b32.xlu0 %v5913_v16, %s5675_s22  ;;  %5430 = vrot.lane.b32.xlu1 %v5913_v16, %s5674_s21  ;;  %v4605_v20 = vpop.f32.mrb[9].mxu1  ;;  %v5919_v21 = vadd.f32 %v363_v19, %v261_v60  ;;  %v30_v60 = vld [vmem:[%s7117_s2 + $0x8] sm:$0xff]  ;;  %v32_v19 = vld [vmem:[%s7117_s2 + $0x18] sm:$0xff] }
 0x306   :  { %679 = vrot.lane.b32.xlu0 %v344_v63, %s5676_s23  ;;  %380 = vrot.lane.b32.xlu1 %v5919_v21, %s5674_s21 }
 0x30a   :  { %683 = vrot.lane.b32.xlu0 %v354_v13, %s5676_s23  ;;  %5435 = vrot.lane.b32.xlu1 %v5909_v6, %s5675_s22 }
 0x30e   :  { %687 = vrot.lane.b32.xlu0 %v5919_v21, %s5676_s23  ;;  %697 = vrot.lane.b32.xlu1 %v5919_v21, %s5675_s22 }
 0x312   :  { %681 = vrot.lane.b32.xlu1 %v349_v1, %s5676_s23 }
 0x316   :  { %685 = vrot.lane.b32.xlu1 %v359_v14, %s5676_s23 }
 0x36c   :  { %v5426_v24 = vpop.permute.xlu0 %5425 }
 0x36d   :  { %v5428_v26 = vunpack.i.h.bf16 %v5426_v24  ;;  %v5427_v29 = vunpack.i.l.bf16 %v5426_v24 }
 0x36f   :  { %v5252_v31 = vpack.c.bf16 %v5428_v26, %v5427_v29 }
 0x371   :  { %5254 = vmatpush3.bf16.xpose.msk.msra.mxu1 %vm5935_vm4, %v5252_v31 }
 0x372   :  { %5255 = vmatprep.subr.bf16.mxu1 %v5671_v0 }
 0x374   :  { %v5431_v32 = vpop.permute.xlu1 %5430  ;;  %v5441_v44 = vpop.permute.xlu0 %5440 }
 0x375   :  { %v5433_v34 = vunpack.i.h.bf16 %v5431_v32  ;;  %v5432_v35 = vunpack.i.l.bf16 %v5431_v32  ;;  %v5443_v45 = vunpack.i.h.bf16 %v5441_v44  ;;  %v5442_v46 = vunpack.i.l.bf16 %v5441_v44  ;;  %v33_v32 = vld [vmem:[%s7117_s2 + $0x20] sm:$0xff] }
 0x377   :  { %v5256_v36 = vpack.c.bf16 %v5433_v34, %v5432_v35  ;;  %v5270_v43 = vpack.c.bf16 %v5443_v45, %v5442_v46 }
 0x378   :  { %v381_v37 = vpop.permute.xlu1 %380  ;;  %v680_v49 = vpop.permute.xlu0 %679 }
 0x379   :  { %5258 = vmatpush3.bf16.xpose.msk.msra.mxu1 %vm5935_vm4, %v5256_v36 }
 0x37a   :  { %4614 = vmatprep.subr.mxu1 %v5673_v4 }
 0x37c   :  { %v5436_v39 = vpop.permute.xlu1 %5435  ;;  %v684_v51 = vpop.permute.xlu0 %683 }
 0x37d   :  { %v5438_v40 = vunpack.i.h.bf16 %v5436_v39  ;;  %v5437_v41 = vunpack.i.l.bf16 %v5436_v39 }
 0x37f   :  { %v5266_v42 = vpack.c.bf16 %v5438_v40, %v5437_v41 }
 0x380   :  { %v698_v48 = vpop.permute.xlu1 %697  ;;  %v688_v53 = vpop.permute.xlu0 %687 }
 0x381   :  { %4615 = vmatpush3.xpose.msk.msra.mxu1 %vm382_vm3, %v381_v37 }
 0x382   :  { %5265 = vmatprep.subr.bf16.mxu1 %v5671_v0 }
 0x384   :  { %4617 = vmatmul.mubr.msk.f32.vlgmr.msra.gmra.mrb[10].mxu1 %vm382_vm3, %v344_v63  ;;  %v682_v50 = vpop.permute.xlu1 %681 }
 0x385   :  { %5268 = vmatpush3.bf16.xpose.msk.msra.mxu1 %vm5935_vm4, %v5266_v42  ;;  %4619 = vmatprep.mubr.msk.f32.mxu1 %vm5672_vm0, %v5673_v4 }
 0x386   :  { %5269 = vmatprep.subr.bf16.mxu1 %v5671_v0 }
 0x388   :  { %4620 = vmatmul.mubr.msk.f32.gmra.mrb[12].mxu1 %vm382_vm3, %v349_v1  ;;  %v686_v47 = vpop.permute.xlu1 %685 }
 0x389   :  { %4622 = vmatprep.mubr.msk.f32.mxu1 %vm5672_vm0, %v5673_v4 }
 0x38c   :  { %4623 = vmatmul.mubr.msk.f32.gmra.mrb[14].mxu1 %vm382_vm3, %v354_v13 }
 0x38d   :  { %5272 = vmatpush3.bf16.xpose.msk.msra.mxu1 %vm5935_vm4, %v5270_v43  ;;  %4625 = vmatprep.mubr.msk.f32.mxu1 %vm5672_vm0, %v5673_v4 }
 0x38e   :  { %4664 = vmatprep.subr.mxu1 %v5673_v4 }
 0x390   :  { %4626 = vmatmul.mubr.msk.f32.gmra.mrb[16].mxu1 %vm382_vm3, %v359_v14 }
 0x391   :  { %4628 = vmatprep.mubr.msk.f32.mxu1 %vm5672_vm0, %v5673_v4 }
 0x394   :  { %4629 = vmatmul.mubr.msk.f32.gmra.mrb[18].mxu1 %vm382_vm3, %v5919_v21 }
 0x395   :  { %4665 = vmatpush3.xpose.msk.msra.mxu1 %vm382_vm3, %v698_v48  ;;  %4666 = vmatprep.mubr.msk.f32.mxu1 %vm5672_vm0, %v5673_v4 }
 0x396   :  { %5279 = vmatprep.subr.bf16.mxu1 %v5671_v0 }
 0x398   :  { %4667 = vmatmul.mubr.msk.f32.vlgmr.msra.gmra.mrb[20].mxu1 %vm382_vm3, %v680_v49 }
 0x399   :  { %4669 = vmatprep.mubr.msk.f32.mxu1 %vm5672_vm0, %v5673_v4 }
 0x39c   :  { %4670 = vmatmul.mubr.msk.f32.gmra.mrb[22].mxu1 %vm382_vm3, %v682_v50 }
 0x39d   :  { %4672 = vmatprep.mubr.msk.f32.mxu1 %vm5672_vm0, %v5673_v4 }
 0x3a0   :  { %4673 = vmatmul.mubr.msk.f32.gmra.mrb[24].mxu1 %vm382_vm3, %v684_v51 }
 0x3a1   :  { %4675 = vmatprep.mubr.msk.f32.mxu1 %vm5672_vm0, %v5673_v4 }
 0x3a4   :  { %4676 = vmatmul.mubr.msk.f32.gmra.mrb[26].mxu1 %vm382_vm3, %v686_v47 }
 0x3a5   :  { %4678 = vmatprep.mubr.msk.f32.mxu1 %vm5672_vm0, %v5673_v4 }
 0x3a8   :  { %4679 = vmatmul.mubr.msk.f32.gmra.mrb[28].mxu1 %vm382_vm3, %v688_v53 }
 0x3a9   :  { %4710 = vmatprep.mubr.msk.f32.mxu1 %vm5672_vm0, %v5673_v4 }
 0x457   :  { %v469_v54 = vpop.f32.mrb[10].mxu1 }
 0x458   :  { %v493_v52 = vmul.f32 0.25, %v469_v54  ;;  %v4618_v56 = vpop.f32.mrb[11].mxu1 }
 0x45a   :  { %v5989_v58 = vadd.f32 %v493_v52, %v29_v55 }
 0x45b   :  { %v474_v59 = vpop.f32.mrb[12].mxu1 }
 0x45c   :  { %v494_v61 = vmul.f32 0.25, %v474_v59  ;;  %v4621_v62 = vpop.f32.mrb[13].mxu1  ;;  %v504_v63 = vsel %vm503_vm5, %v5989_v58, -inf }
 0x45d   :  { %505 = vmax.xlane.f32.xlu1 %v504_v63 }
 0x45e   :  { %v5996_v1 = vadd.f32 %v494_v61, %v30_v60 }
 0x45f   :  { %v479_v2 = vpop.f32.mrb[14].mxu1 }
 0x460   :  { %v495_v11 = vmul.f32 0.25, %v479_v2  ;;  %v4624_v12 = vpop.f32.mrb[15].mxu1  ;;  %v507_v13 = vsel %vm503_vm5, %v5996_v1, -inf }
 0x461   :  { %508 = vmax.xlane.f32.xlu0 %v507_v13 }
 0x462   :  { %v500_v14 = vadd.f32 %v495_v11, %v31_v10 }
 0x463   :  { %v484_v15 = vpop.f32.mrb[16].mxu1 }
 0x464   :  { %v496_v20 = vmul.f32 0.25, %v484_v15  ;;  %v4627_v24 = vpop.f32.mrb[17].mxu1  ;;  %v510_v26 = vsel %vm503_vm5, %v500_v14, -inf }
 0x465   :  { %511 = vmax.xlane.f32.xlu0 %v510_v26 }
 0x466   :  { %v501_v29 = vadd.f32 %v496_v20, %v32_v19 }
 0x467   :  { %v489_v31 = vpop.f32.mrb[18].mxu1 }
 0x468   :  { %v497_v34 = vmul.f32 0.25, %v489_v31  ;;  %v4630_v35 = vpop.f32.mrb[19].mxu1  ;;  %v513_v36 = vsel %vm503_vm5, %v501_v29, -inf }
 0x469   :  { %514 = vmax.xlane.f32.xlu0 %v513_v36 }
 0x46a   :  { %v502_v37 = vadd.f32 %v497_v34, %v33_v32 }
 0x46b   :  { %v785_v39 = vpop.f32.mrb[20].mxu1 }
 0x46c   :  { %v809_v40 = vmul.f32 0.25, %v785_v39  ;;  %v4668_v41 = vpop.f32.mrb[21].mxu1  ;;  %v516_v42 = vsel %vm503_vm5, %v502_v37, -inf }
 0x46d   :  { %517 = vmax.xlane.f32.xlu1 %v516_v42 }
 0x46e   :  { %v814_v44 = vadd.f32 %v809_v40, %v29_v55 }
 0x46f   :  { %v790_v45 = vpop.f32.mrb[22].mxu1 }
 0x470   :  { %v810_v46 = vmul.f32 0.25, %v790_v45  ;;  %v4671_v43 = vpop.f32.mrb[23].mxu1  ;;  %v819_v48 = vsel %vm503_vm5, %v814_v44, -inf }
 0x471   :  { %820 = vmax.xlane.f32.xlu0 %v819_v48 }
 0x472   :  { %v815_v49 = vadd.f32 %v810_v46, %v30_v60 }
 0x473   :  { %v795_v50 = vpop.f32.mrb[24].mxu1 }
 0x474   :  { %v811_v51 = vmul.f32 0.25, %v795_v50  ;;  %v4674_v47 = vpop.f32.mrb[25].mxu1  ;;  %v822_v53 = vsel %vm503_vm5, %v815_v49, -inf }
 0x475   :  { %823 = vmax.xlane.f32.xlu1 %v822_v53 }
 0x476   :  { %v816_v54 = vadd.f32 %v811_v51, %v31_v10 }
 0x477   :  { %v800_v52 = vpop.f32.mrb[26].mxu1 }
 0x478   :  { %v812_v56 = vmul.f32 0.25, %v800_v52  ;;  %v4677_v59 = vpop.f32.mrb[27].mxu1  ;;  %v825_v61 = vsel %vm503_vm5, %v816_v54, -inf }
 0x479   :  { %826 = vmax.xlane.f32.xlu0 %v825_v61 }
 0x47a   :  { %v6015_v55 = vadd.f32 %v812_v56, %v32_v19 }
 0x47b   :  { %v805_v62 = vpop.f32.mrb[28].mxu1 }
 0x47c   :  { %v4680_v63 = vpop.f32.mrb[29].mxu1  ;;  %v828_v60 = vsel %vm503_vm5, %v6015_v55, -inf  ;;  %v813_v2 = vmul.f32 0.25, %v805_v62 }
 0x47d   :  { %829 = vmax.xlane.f32.xlu1 %v828_v60 }
 0x47e   :  { %v6023_v10 = vadd.f32 %v813_v2, %v33_v32 }
 0x480   :  { %v831_v11 = vsel %vm503_vm5, %v6023_v10, -inf }
 0x48e   :  { %5450 = vrot.lane.b32.xlu1 %v5913_v16, %s5677_s11 }
 0x48f   :  { %5445 = vrot.lane.b32.xlu0 %v5909_v6, %s5677_s11 }
 0x4ae   :  { %832 = vmax.xlane.f32.xlu0 %v831_v11 }
 0x4c4   :  { %567 = vrot.lane.b32.xlu0 %v5919_v21, %s5677_s11 }
 0x4ea   :  { %v506_v12 = vpop.xlane.xlu1 %505 }
 0x4eb   :  { %v519_v13 = vsub.f32 %v5989_v58, %v506_v12 }
 0x4ed   :  { %v524_v15 = vmul.f32 1.442695, %v519_v13 }
 0x4ee   :  { %v509_v19 = vpop.xlane.xlu0 %508 }
 0x4ef   :  { %5534 = vpow2.f32 %v524_v15  ;;  %v520_v20 = vsub.f32 %v5996_v1, %v509_v19 }
 0x4f1   :  { %v526_v24 = vmul.f32 1.442695, %v520_v20 }
 0x4f2   :  { %v512_v26 = vpop.xlane.xlu0 %511 }
 0x4f3   :  { %5536 = vpow2.f32 %v526_v24  ;;  %v521_v31 = vsub.f32 %v500_v14, %v512_v26 }
 0x4f5   :  { %v528_v32 = vmul.f32 1.442695, %v521_v31 }
 0x4f6   :  { %v515_v34 = vpop.xlane.xlu0 %514 }
 0x4f7   :  { %5538 = vpow2.f32 %v528_v32  ;;  %v522_v35 = vsub.f32 %v501_v29, %v515_v34 }
 0x4f9   :  { %v6031_v36 = vpop.eup %5534  ;;  %v530_v39 = vmul.f32 1.442695, %v522_v35 }
 0x4fa   :  { %v518_v40 = vpop.xlane.xlu1 %517  ;;  %v534_v58 = vsel %vm503_vm5, %v6031_v36, 0.0 }
 0x4fb   :  { %5540 = vpow2.f32 %v530_v39  ;;  %v523_v41 = vsub.f32 %v502_v37, %v518_v40  ;;  %535 = vadd.xlane.f32.xlu1 %v534_v58 }
 0x4fd   :  { %v6035_v42 = vpop.eup %5536  ;;  %v532_v1 = vmul.f32 1.442695, %v523_v41 }
 0x4fe   :  { %v821_v45 = vpop.xlane.xlu0 %820  ;;  %v537_v14 = vsel %vm503_vm5, %v6035_v42, 0.0 }
 0x4ff   :  { %5542 = vpow2.f32 %v532_v1  ;;  %v834_v46 = vsub.f32 %v814_v44, %v821_v45  ;;  %538 = vadd.xlane.f32.xlu0 %v537_v14 }
 0x501   :  { %v6039_v29 = vpop.eup %5538  ;;  %v839_v43 = vmul.f32 1.442695, %v834_v46 }
 0x502   :  { %v824_v48 = vpop.xlane.xlu1 %823  ;;  %v540_v50 = vsel %vm503_vm5, %v6039_v29, 0.0 }
 0x503   :  { %5544 = vpow2.f32 %v839_v43  ;;  %v835_v37 = vsub.f32 %v815_v49, %v824_v48  ;;  %541 = vadd.xlane.f32.xlu1 %v540_v50 }
 0x505   :  { %v6043_v51 = vpop.eup %5540  ;;  %v841_v47 = vmul.f32 1.442695, %v835_v37 }
 0x506   :  { %v827_v53 = vpop.xlane.xlu0 %826  ;;  %v543_v52 = vsel %vm503_vm5, %v6043_v51, 0.0 }
 0x507   :  { %5546 = vpow2.f32 %v841_v47  ;;  %v836_v44 = vsub.f32 %v816_v54, %v827_v53  ;;  %544 = vadd.xlane.f32.xlu0 %v543_v52 }
 0x509   :  { %v6047_v56 = vpop.eup %5542  ;;  %v843_v59 = vmul.f32 1.442695, %v836_v44 }
 0x50a   :  { %v5446_v61 = vpop.permute.xlu0 %5445  ;;  %v830_v62 = vpop.xlane.xlu1 %829  ;;  %v546_v63 = vsel %vm503_vm5, %v6047_v56, 0.0 }
 0x50b   :  { %5548 = vpow2.f32 %v843_v59  ;;  %v5448_v49 = vunpack.i.h.bf16 %v5446_v61  ;;  %v5447_v60 = vunpack.i.l.bf16 %v5446_v61  ;;  %v837_v2 = vsub.f32 %v6015_v55, %v830_v62  ;;  %547 = vadd.xlane.f32.xlu1 %v546_v63 }
 0x50d   :  { %v6052_v11 = vpop.eup %5544  ;;  %v5260_v12 = vpack.c.bf16 %v5448_v49, %v5447_v60  ;;  %v845_v13 = vmul.f32 1.442695, %v837_v2 }
 0x50e   :  { %v5451_v54 = vpop.permute.xlu1 %5450  ;;  %v849_v15 = vsel %vm503_vm5, %v6052_v11, 0.0 }
 0x50f   :  { %5550 = vpow2.f32 %v845_v13  ;;  %v5453_v19 = vunpack.i.h.bf16 %v5451_v54  ;;  %v5452_v20 = vunpack.i.l.bf16 %v5451_v54  ;;  %5261 = vmatpush3.bf16.msra.mxu0 %v5260_v12  ;;  %850 = vadd.xlane.f32.xlu1 %v849_v15 }
 0x510   :  { %5262 = vmatprep.subr.bf16.mxu0 %v5671_v0 }
 0x511   :  { %v6057_v24 = vpop.eup %5546  ;;  %v5263_v26 = vpack.c.bf16 %v5453_v19, %v5452_v20 }
 0x512   :  { %v852_v55 = vsel %vm503_vm5, %v6057_v24, 0.0 }
 0x513   :  { %5264 = vmatpush3.bf16.msra.mxu0 %v5263_v26  ;;  %853 = vadd.xlane.f32.xlu0 %v852_v55 }
 0x514   :  { %4639 = vmatprep.subr.mxu0 %v5673_v4 }
 0x515   :  { %v6062_v31 = vpop.eup %5548 }
 0x516   :  { %v855_v32 = vsel %vm503_vm5, %v6062_v31, 0.0 }
 0x517   :  { %856 = vadd.xlane.f32.xlu1 %v855_v32 }
 0x519   :  { %v6066_v34 = vpop.eup %5550 }
 0x51a   :  { %v858_v35 = vsel %vm503_vm5, %v6066_v34, 0.0 }
 0x51b   :  { %859 = vadd.xlane.f32.xlu1 %v858_v35 }
 0x529   :  { %5460 = vrot.lane.b32.xlu0 %v5913_v16, %s5678_s12 }
 0x52c   :  { %5455 = vrot.lane.b32.xlu1 %v5909_v6, %s5678_s12  ;;  %v5464_v6 = vpack.i.bf16 %v5863_v8, %v5858_v7 }
 0x52d   :  { %882 = vrot.lane.b32.xlu0 %v5919_v21, %s5678_s12 }
 0x531   :  { %5465 = vrot.lane.b32.xlu0 %v5464_v6, %s5679_s1 }
 0x535   :  { %5470 = vrot.lane.b32.xlu0 %v5469_v9, %s5679_s1 }
 0x53b   :  { %v833_v39 = vpop.xlane.xlu0 %832 }
 0x53c   :  { %v838_v40 = vsub.f32 %v6023_v10, %v833_v39 }
 0x53e   :  { %v847_v58 = vmul.f32 1.442695, %v838_v40 }
 0x53f   :  { %v568_v41 = vpop.permute.xlu0 %567 }
 0x540   :  { %4640 = vmatpush3.msra.mxu0 %v568_v41  ;;  %5552 = vpow2.f32 %v847_v58 }
 0x541   :  { %5273 = vmatprep.subr.bf16.mxu0 %v5671_v0 }
 0x54a   :  { %v6078_v1 = vpop.eup %5552 }
 0x54b   :  { %v861_v16 = vsel %vm503_vm5, %v6078_v1, 0.0 }
 0x550   :  { %862 = vadd.xlane.f32.xlu1 %v861_v16 }
 0x588   :  { %v536_v21 = vpop.xlane.xlu1 %535 }
 0x589   :  { %5554 = vrcp.f32 %v536_v21 }
 0x58c   :  { %v539_v10 = vpop.xlane.xlu0 %538 }
 0x58d   :  { %5556 = vrcp.f32 %v539_v10 }
 0x590   :  { %v542_v45 = vpop.xlane.xlu1 %541 }
 0x591   :  { %5558 = vrcp.f32 %v542_v45 }
 0x593   :  { %v5555_v14 = vpop.eup %5554 }
 0x594   :  { %v554_v46 = vmul.f32 %v5555_v14, %v6031_v36  ;;  %v545_v43 = vpop.xlane.xlu0 %544 }
 0x595   :  { %5560 = vrcp.f32 %v545_v43 }
 0x596   :  { %4642 = vmatmul.mubr.msk.f32.vlgmr.msra.gmra.mrb[10].mxu0 %vm503_vm5, %v554_v46 }
 0x597   :  { %v5557_v7 = vpop.eup %5556  ;;  %4644 = vmatprep.mubr.msk.f32.mxu0 %vm5672_vm0, %v5673_v4 }
 0x598   :  { %v548_v8 = vpop.xlane.xlu1 %547  ;;  %v555_v3 = vmul.f32 %v5557_v7, %v6035_v42 }
 0x599   :  { %5562 = vrcp.f32 %v548_v8 }
 0x59a   :  { %4645 = vmatmul.mubr.msk.f32.gmra.mrb[12].mxu0 %vm503_vm5, %v555_v3 }
 0x59b   :  { %v5559_v5 = vpop.eup %5558  ;;  %4647 = vmatprep.mubr.msk.f32.mxu0 %vm5672_vm0, %v5673_v4 }
 0x59c   :  { %v556_v9 = vmul.f32 %v5559_v5, %v6039_v29  ;;  %v851_v48 = vpop.xlane.xlu1 %850 }
 0x59d   :  { %5564 = vrcp.f32 %v851_v48 }
 0x59e   :  { %4648 = vmatmul.mubr.msk.f32.gmra.mrb[14].mxu0 %vm503_vm5, %v556_v9 }
 0x59f   :  { %v5561_v36 = vpop.eup %5560  ;;  %4650 = vmatprep.mubr.msk.f32.mxu0 %vm5672_vm0, %v5673_v4 }
 0x5a0   :  { %v557_v50 = vmul.f32 %v5561_v36, %v6043_v51  ;;  %v854_v53 = vpop.xlane.xlu0 %853 }
 0x5a1   :  { %5566 = vrcp.f32 %v854_v53 }
 0x5a2   :  { %4651 = vmatmul.mubr.msk.f32.gmra.mrb[16].mxu0 %vm503_vm5, %v557_v50 }
 0x5a3   :  { %v5563_v42 = vpop.eup %5562  ;;  %4653 = vmatprep.mubr.msk.f32.mxu0 %vm5672_vm0, %v5673_v4 }
 0x5a4   :  { %v857_v37 = vpop.xlane.xlu1 %856  ;;  %v558_v47 = vmul.f32 %v5563_v42, %v6047_v56  ;;  %v5461_v52 = vpop.permute.xlu0 %5460 }
 0x5a5   :  { %v5463_v61 = vunpack.i.h.bf16 %v5461_v52  ;;  %v5462_v62 = vunpack.i.l.bf16 %v5461_v52  ;;  %5568 = vrcp.f32 %v857_v37 }
 0x5a6   :  { %4654 = vmatmul.mubr.msk.f32.gmra.mrb[18].mxu0 %vm503_vm5, %v558_v47 }
 0x5a7   :  { %4691 = vmatprep.mubr.msk.f32.mxu0 %vm5672_vm0, %v5673_v4  ;;  %v5277_v56 = vpack.c.bf16 %v5463_v61, %v5462_v62  ;;  %v5565_v49 = vpop.eup %5564 }
 0x5a8   :  { %v860_v29 = vpop.xlane.xlu1 %859  ;;  %v869_v60 = vmul.f32 %v5565_v49, %v6052_v11  ;;  %v883_v2 = vpop.permute.xlu0 %882 }
 0x5a9   :  { %5570 = vrcp.f32 %v860_v29 }
 0x5ab   :  { %v5567_v12 = vpop.eup %5566 }
 0x5ac   :  { %v5456_v44 = vpop.permute.xlu1 %5455  ;;  %v870_v13 = vmul.f32 %v5567_v12, %v6057_v24  ;;  %v5466_v24 = vpop.permute.xlu0 %5465 }
 0x5ad   :  { %v5458_v51 = vunpack.i.h.bf16 %v5456_v44  ;;  %v5457_v59 = vunpack.i.l.bf16 %v5456_v44  ;;  %v5468_v26 = vunpack.i.h.bf16 %v5466_v24  ;;  %v5467_v55 = vunpack.i.l.bf16 %v5466_v24 }
 0x5af   :  { %v5274_v63 = vpack.c.bf16 %v5458_v51, %v5457_v59  ;;  %v5569_v54 = vpop.eup %5568  ;;  %v5280_v32 = vpack.c.bf16 %v5468_v26, %v5467_v55 }
 0x5b0   :  { %v871_v11 = vmul.f32 %v5569_v54, %v6062_v31  ;;  %v5471_v31 = vpop.permute.xlu0 %5470 }
 0x5b1   :  { %5275 = vmatpush3.bf16.msra.mxu0 %v5274_v63  ;;  %v5473_v35 = vunpack.i.h.bf16 %v5471_v31  ;;  %v5472_v39 = vunpack.i.l.bf16 %v5471_v31  ;;  %5281 = vmatpush3.bf16.msra.mxu1 %v5280_v32 }
 0x5b2   :  { %5276 = vmatprep.subr.bf16.mxu0 %v5671_v0  ;;  %5285 = vmatprep.subr.bf16.mxu1 %v5671_v0 }
 0x5b3   :  { %v5571_v15 = vpop.eup %5570  ;;  %v5283_v40 = vpack.c.bf16 %v5473_v35, %v5472_v39 }
 0x5b4   :  { %v872_v19 = vmul.f32 %v5571_v15, %v6066_v34 }
 0x5b5   :  { %5278 = vmatpush3.bf16.msra.mxu0 %v5277_v56  ;;  %v1227_v56 = vsub.s32 3, %v5870_v17 }
 0x5b6   :  { %4689 = vmatprep.subr.mxu0 %v5673_v4 }
 0x5b9   :  { %4690 = vmatpush3.msra.mxu0 %v883_v2  ;;  %v1228_v2 = vrot.slane %v5876_v25, %v1227_v56 }
 0x5ba   :  { %4692 = vmatmul.mubr.msk.f32.vlgmr.msra.gmra.mrb[20].mxu0 %vm503_vm5, %v869_v60  ;;  %5282 = vmatprep.subr.bf16.mxu0 %v5671_v0 }
 0x5bb   :  { %4694 = vmatprep.mubr.msk.f32.mxu0 %vm5672_vm0, %v5673_v4  ;;  %5284 = vmatpush3.bf16.msra.mxu0 %v5283_v40 }
 0x5bc   :  { %5291 = vmatprep.subr.bf16.mxu0 %v5671_v0 }
 0x5be   :  { %4695 = vmatmul.mubr.msk.f32.gmra.mrb[22].mxu0 %vm503_vm5, %v870_v13 }
 0x5bf   :  { %4697 = vmatprep.mubr.msk.f32.mxu0 %vm5672_vm0, %v5673_v4 }
 0x5c2   :  { %4698 = vmatmul.mubr.msk.f32.gmra.mrb[24].mxu0 %vm503_vm5, %v871_v11 }
 0x5c3   :  { %4700 = vmatprep.mubr.msk.f32.mxu0 %vm5672_vm0, %v5673_v4 }
 0x5c6   :  { %4701 = vmatmul.mubr.msk.f32.gmra.mrb[26].mxu0 %vm503_vm5, %v872_v19 }
 0x5c7   :  { %4703 = vmatprep.mubr.msk.f32.mxu0 %vm5672_vm0, %v5673_v4 }
 0x5dd   :  { %v863_v20 = vpop.xlane.xlu1 %862 }
 0x5de   :  { %5572 = vrcp.f32 %v863_v20 }
 0x5e8   :  { %v5573_v34 = vpop.eup %5572 }
 0x5e9   :  { %v873_v58 = vmul.f32 %v5573_v34, %v6078_v1 }
 0x5eb   :  { %4704 = vmatmul.mubr.msk.f32.gmra.mrb[28].mxu0 %vm503_vm5, %v873_v58 }
 0x5ec   :  { %4729 = vmatprep.mubr.msk.f32.mxu0 %vm5672_vm0, %v5673_v4 }
 0x669   :  { %v655_v41 = vpop.f32.mrb[10].mxu0 }
 0x66a   :  { %v4643_v16 = vpop.f32.mrb[11].mxu0  ;;  %4730 = vmatmul.mubr.msk.f32.vlgmr.msra.gmra.mrb[30].mxu0 %vm382_vm3, %v655_v41 }
 0x66b   :  { %4732 = vmatprep.mubr.msk.f32.mxu0 %vm5672_vm0, %v5673_v4 }
 0x66d   :  { %v660_v6 = vpop.f32.mrb[12].mxu0 }
 0x66e   :  { %v4646_v21 = vpop.f32.mrb[13].mxu0  ;;  %4733 = vmatmul.mubr.msk.f32.gmra.mrb[32].mxu0 %vm382_vm3, %v660_v6 }
 0x66f   :  { %4735 = vmatprep.mubr.msk.f32.mxu0 %vm5672_vm0, %v5673_v4 }
 0x671   :  { %v665_v1 = vpop.f32.mrb[14].mxu0 }
 0x672   :  { %v4649_v10 = vpop.f32.mrb[15].mxu0  ;;  %4736 = vmatmul.mubr.msk.f32.gmra.mrb[34].mxu0 %vm382_vm3, %v665_v1 }
 0x673   :  { %4738 = vmatprep.mubr.msk.f32.mxu0 %vm5672_vm0, %v5673_v4 }
 0x675   :  { %v670_v45 = vpop.f32.mrb[16].mxu0 }
 0x676   :  { %v4652_v14 = vpop.f32.mrb[17].mxu0  ;;  %4739 = vmatmul.mubr.msk.f32.gmra.mrb[36].mxu0 %vm382_vm3, %v670_v45 }
 0x677   :  { %4741 = vmatprep.mubr.msk.f32.mxu0 %vm5672_vm0, %v5673_v4 }
 0x679   :  { %v675_v46 = vpop.f32.mrb[18].mxu0 }
 0x67a   :  { %v4655_v43 = vpop.f32.mrb[19].mxu0  ;;  %4742 = vmatmul.mubr.msk.f32.gmra.mrb[38].mxu0 %vm382_vm3, %v675_v46 }
 0x67b   :  { %4783 = vmatprep.mubr.msk.f32.mxu0 %vm5672_vm0, %v5673_v4 }
 0x68d   :  { %v970_v7 = vpop.f32.mrb[20].mxu0 }
 0x68e   :  { %v4693_v8 = vpop.f32.mrb[21].mxu0  ;;  %4711 = vmatmul.mubr.msk.f32.vlgmr.msra.gmra.mrb[30].mxu1 %vm382_vm3, %v970_v7 }
 0x68f   :  { %4713 = vmatprep.mubr.msk.f32.mxu1 %vm5672_vm0, %v5673_v4 }
 0x691   :  { %v975_v3 = vpop.f32.mrb[22].mxu0 }
 0x692   :  { %v4696_v5 = vpop.f32.mrb[23].mxu0  ;;  %4714 = vmatmul.mubr.msk.f32.gmra.mrb[32].mxu1 %vm382_vm3, %v975_v3 }
 0x693   :  { %4716 = vmatprep.mubr.msk.f32.mxu1 %vm5672_vm0, %v5673_v4 }
 0x695   :  { %v980_v9 = vpop.f32.mrb[24].mxu0 }
 0x696   :  { %v4699_v36 = vpop.f32.mrb[25].mxu0  ;;  %4717 = vmatmul.mubr.msk.f32.gmra.mrb[34].mxu1 %vm382_vm3, %v980_v9 }
 0x697   :  { %4719 = vmatprep.mubr.msk.f32.mxu1 %vm5672_vm0, %v5673_v4 }
 0x699   :  { %v985_v48 = vpop.f32.mrb[26].mxu0 }
 0x69a   :  { %v4702_v50 = vpop.f32.mrb[27].mxu0  ;;  %4720 = vmatmul.mubr.msk.f32.gmra.mrb[36].mxu1 %vm382_vm3, %v985_v48 }
 0x69b   :  { %4722 = vmatprep.mubr.msk.f32.mxu1 %vm5672_vm0, %v5673_v4 }
 0x6be   :  { %v990_v42 = vpop.f32.mrb[28].mxu0 }
 0x6bf   :  { %v4705_v37 = vpop.f32.mrb[29].mxu0  ;;  %4723 = vmatmul.mubr.msk.f32.gmra.mrb[38].mxu1 %vm382_vm3, %v990_v42 }
 0x6c0   :  { %4752 = vmatprep.mubr.msk.f32.mxu1 %vm5672_vm0, %v5673_v4 }
 0x73d   :  { %v1196_v47 = vpop.f32.mrb[30].mxu0 }
 0x73e   :  { %v4731_v53 = vpop.f32.mrb[31].mxu0 }
 0x741   :  { %v1201_v29 = vpop.f32.mrb[32].mxu0 }
 0x742   :  { %v4734_v52 = vpop.f32.mrb[33].mxu0 }
 0x745   :  { %v1206_v44 = vpop.f32.mrb[34].mxu0 }
 0x746   :  { %v4737_v51 = vpop.f32.mrb[35].mxu0 }
 0x747   :  { %v157_v51 = vld [vmem:[%s7115_s4 + $0x8] sm:$0xff] }
 0x749   :  { %v1211_v59 = vpop.f32.mrb[36].mxu0 }
 0x74a   :  { %v4740_v61 = vpop.f32.mrb[37].mxu0 }
 0x74d   :  { %v1216_v62 = vpop.f32.mrb[38].mxu0 }
 0x74e   :  { %v4743_v63 = vpop.f32.mrb[39].mxu0 }
 0x74f   :  { %v163_v63 = vld [vmem:[%s7115_s4 + $0x38] sm:$0xff] }
 0x761   :  { %v1083_v49 = vpop.f32.mrb[30].mxu1 }
 0x762   :  { %v1197_v60 = vadd.f32 %v1196_v47, %v1083_v49  ;;  %v4712_v12 = vpop.f32.mrb[31].mxu1 }
 0x764   :  { %v1220_v13 = vadd.f32 %v1197_v60, %v5780_v18 }
 0x765   :  { %v1088_v54 = vpop.f32.mrb[32].mxu1 }
 0x766   :  { %v6169_v11 = vadd.f32 %v1228_v2, %v1220_v13  ;;  %v1202_v15 = vadd.f32 %v1201_v29, %v1088_v54  ;;  %v4715_v19 = vpop.f32.mrb[33].mxu1 }
 0x768   :  { %v1221_v20 = vadd.f32 %v1202_v15, %v5787_v23  ;;  %v1234_v24 = vsel %vm173_vm2, %v6169_v11, 0.0 }
 0x769   :  { %v1093_v26 = vpop.f32.mrb[34].mxu1  ;;  %1235 = vadd.xlane.f32.xlu0 %v1234_v24 }
 0x76a   :  { %v6174_v55 = vadd.f32 %v1228_v2, %v1221_v20  ;;  %v1207_v32 = vadd.f32 %v1206_v44, %v1093_v26  ;;  %v4718_v31 = vpop.f32.mrb[35].mxu1 }
 0x76c   :  { %v1222_v25 = vadd.f32 %v1207_v32, %v5794_v28  ;;  %v1237_v18 = vsel %vm173_vm2, %v6174_v55, 0.0 }
 0x76d   :  { %v1098_v35 = vpop.f32.mrb[36].mxu1  ;;  %1238 = vadd.xlane.f32.xlu1 %v1237_v18  ;;  %v1301_v18 = vsub.s32 4, %v5870_v17 }
 0x76e   :  { %v6179_v39 = vadd.f32 %v1228_v2, %v1222_v25  ;;  %v1212_v40 = vadd.f32 %v1211_v59, %v1098_v35  ;;  %v4721_v23 = vpop.f32.mrb[37].mxu1  ;;  %v159_v59 = vld [vmem:[%s7115_s4 + $0x18] sm:$0xff] }
 0x76f   :  { %v5286_v61 = vpack.c.bf16 %v159_v59, %v157_v51  ;;  %v164_v51 = vld [vmem:[%s7115_s4 + $0x40] sm:$0xff]  ;;  %v165_v59 = vld [vmem:[%s7115_s4 + $0x50] sm:$0xff] }
 0x770   :  { %v1223_v34 = vadd.f32 %v1212_v40, %v5801_v33  ;;  %v1240_v58 = vsel %vm173_vm2, %v6179_v39, 0.0  ;;  %v1310_v40 = vsub.s32 5, %v5870_v17 }
 0x771   :  { %1241 = vadd.xlane.f32.xlu1 %v1240_v58  ;;  %5287 = vmatpush3.bf16.msra.mxu1 %v5286_v61  ;;  %v6222_v58 = vld [vmem:[%s7116_s5] sm:$0xff]  ;;  %v5292_v61 = vpack.c.bf16 %v165_v59, %v164_v51 }
 0x772   :  { %v6184_v41 = vadd.f32 %v1228_v2, %v1223_v34  ;;  %5288 = vmatprep.subr.bf16.mxu1 %v5671_v0 }
 0x773   :  { %5293 = vmatpush3.bf16.msra.mxu0 %v5292_v61 }
 0x774   :  { %v1243_v28 = vsel %vm173_vm2, %v6184_v41, 0.0  ;;  %5294 = vmatprep.subr.bf16.mxu0 %v5671_v0 }
 0x775   :  { %1244 = vadd.xlane.f32.xlu0 %v1243_v28  ;;  %v1302_v28 = vrot.slane %v6222_v58, %v1301_v18 }
 0x792   :  { %v1103_v16 = vpop.f32.mrb[38].mxu1 }
 0x793   :  { %v1217_v6 = vadd.f32 %v1216_v62, %v1103_v16  ;;  %v4724_v21 = vpop.f32.mrb[39].mxu1  ;;  %v161_v62 = vld [vmem:[%s7115_s4 + $0x28] sm:$0xff] }
 0x794   :  { %v5289_v49 = vpack.c.bf16 %v163_v63, %v161_v62  ;;  %v1311_v21 = vrot.slane %v6222_v58, %v1310_v40  ;;  %v166_v62 = vld [vmem:[%s7115_s4 + $0x60] sm:$0xff]  ;;  %v167_v63 = vld [vmem:[%s7115_s4 + $0x70] sm:$0xff] }
 0x795   :  { %v1224_v1 = vadd.f32 %v1217_v6, %v5808_v38 }
 0x796   :  { %5290 = vmatpush3.bf16.msra.mxu1 %v5289_v49  ;;  %v5295_v49 = vpack.c.bf16 %v167_v63, %v166_v62 }
 0x797   :  { %v6189_v10 = vadd.f32 %v1228_v2, %v1224_v1  ;;  %5303 = vmatprep.subr.bf16.mxu1 %v5671_v0 }
 0x798   :  { %5296 = vmatpush3.bf16.msra.mxu0 %v5295_v49 }
 0x799   :  { %v1246_v33 = vsel %vm173_vm2, %v6189_v10, 0.0  ;;  %5297 = vmatprep.subr.bf16.mxu0 %v5671_v0 }
 0x79a   :  { %1247 = vadd.xlane.f32.xlu1 %v1246_v33 }
 0x7f6   :  { %v1236_v45 = vpop.xlane.xlu0 %1235 }
 0x7f7   :  { %v1249_v14 = vmul.f32 0.03125, %v1236_v45 }
 0x7f9   :  { %v1254_v46 = vsub.f32 %v6169_v11, %v1249_v14 }
 0x7fa   :  { %v1239_v43 = vpop.xlane.xlu1 %1238 }
 0x7fb   :  { %v1250_v7 = vmul.f32 0.03125, %v1239_v43  ;;  %v1259_v8 = vmul.f32 %v1254_v46, %v1254_v46 }
 0x7fd   :  { %v1255_v3 = vsub.f32 %v6174_v55, %v1250_v7  ;;  %v1264_v5 = vsel %vm173_vm2, %v1259_v8, 0.0 }
 0x7fe   :  { %v1242_v9 = vpop.xlane.xlu1 %1241  ;;  %1265 = vadd.xlane.f32.xlu0 %v1264_v5 }
 0x7ff   :  { %v1251_v38 = vmul.f32 0.03125, %v1242_v9  ;;  %v1260_v36 = vmul.f32 %v1255_v3, %v1255_v3 }
 0x801   :  { %v1256_v48 = vsub.f32 %v6179_v39, %v1251_v38  ;;  %v1267_v50 = vsel %vm173_vm2, %v1260_v36, 0.0 }
 0x802   :  { %v1245_v42 = vpop.xlane.xlu0 %1244  ;;  %1268 = vadd.xlane.f32.xlu1 %v1267_v50 }
 0x803   :  { %v1252_v37 = vmul.f32 0.03125, %v1245_v42  ;;  %v1261_v47 = vmul.f32 %v1256_v48, %v1256_v48 }
 0x805   :  { %v1257_v53 = vsub.f32 %v6184_v41, %v1252_v37  ;;  %v1270_v29 = vsel %vm173_vm2, %v1261_v47, 0.0 }
 0x806   :  { %1271 = vadd.xlane.f32.xlu0 %v1270_v29 }
 0x807   :  { %v1262_v52 = vmul.f32 %v1257_v53, %v1257_v53 }
 0x809   :  { %v1273_v44 = vsel %vm173_vm2, %v1262_v52, 0.0 }
 0x80a   :  { %1274 = vadd.xlane.f32.xlu1 %v1273_v44 }
 0x827   :  { %v1248_v60 = vpop.xlane.xlu1 %1247 }
 0x828   :  { %v1253_v2 = vmul.f32 0.03125, %v1248_v60  ;;  %v168_v60 = vld [vmem:[%s7115_s4 + $0x80] sm:$0xff] }
 0x82a   :  { %v1258_v12 = vsub.f32 %v6189_v10, %v1253_v2  ;;  %v169_v2 = vld [vmem:[%s7115_s4 + $0x90] sm:$0xff] }
 0x82c   :  { %v1263_v13 = vmul.f32 %v1258_v12, %v1258_v12 }
 0x82e   :  { %v1276_v54 = vsel %vm173_vm2, %v1263_v13, 0.0  ;;  %v170_v13 = vld [vmem:[%s7115_s4 + $0xa0] sm:$0xff] }
 0x82f   :  { %1277 = vadd.xlane.f32.xlu0 %v1276_v54  ;;  %v171_v54 = vld [vmem:[%s7115_s4 + $0xb0] sm:$0xff] }
 0x88b   :  { %v1266_v15 = vpop.xlane.xlu0 %1265 }
 0x88c   :  { %v1279_v19 = vmul.f32 0.03125, %v1266_v15  ;;  %v5301_v15 = vpack.c.bf16 %v171_v54, %v170_v13 }
 0x88e   :  { %v1284_v20 = vadd.f32 1e-05, %v1279_v19  ;;  %v1319_v19 = vsub.s32 6, %v5870_v17 }
 0x88f   :  { %v1269_v24 = vpop.xlane.xlu1 %1268 }
 0x890   :  { %5574 = vrsqrt.f32 %v1284_v20  ;;  %v1280_v26 = vmul.f32 0.03125, %v1269_v24  ;;  %v6277_v20 = vrot.slane %v6222_v58, %v1319_v19 }
 0x892   :  { %v1285_v32 = vadd.f32 1e-05, %v1280_v26 }
 0x893   :  { %v1272_v31 = vpop.xlane.xlu0 %1271 }
 0x894   :  { %5576 = vrsqrt.f32 %v1285_v32  ;;  %v1281_v25 = vmul.f32 0.03125, %v1272_v31 }
 0x896   :  { %v1286_v35 = vadd.f32 1e-05, %v1281_v25 }
 0x897   :  { %v1275_v23 = vpop.xlane.xlu1 %1274 }
 0x898   :  { %5578 = vrsqrt.f32 %v1286_v35  ;;  %v1282_v34 = vmul.f32 0.03125, %v1275_v23 }
 0x89a   :  { %v5575_v16 = vpop.eup %5574  ;;  %v1287_v6 = vadd.f32 1e-05, %v1282_v34 }
 0x89b   :  { %v1294_v1 = vmul.f32 %v5575_v16, %v1254_v46 }
 0x89c   :  { %5580 = vrsqrt.f32 %v1287_v6 }
 0x89d   :  { %v1303_v33 = vmul.f32 %v1302_v28, %v1294_v1 }
 0x89e   :  { %v5577_v45 = vpop.eup %5576 }
 0x89f   :  { %v1312_v14 = vadd.f32 %v1311_v21, %v1303_v33  ;;  %v1295_v43 = vmul.f32 %v5577_v45, %v1255_v3 }
 0x8a1   :  { %4753 = vmatmul.mubr.msk.f32.vlgmr.msra.gmra.mrb[40].mxu1 %vm173_vm2, %v1312_v14  ;;  %v1304_v7 = vmul.f32 %v1302_v28, %v1295_v43 }
 0x8a2   :  { %v5579_v8 = vpop.eup %5578  ;;  %4755 = vmatprep.mubr.msk.f32.mxu1 %vm5672_vm0, %v5673_v4 }
 0x8a3   :  { %v1313_v5 = vadd.f32 %v1311_v21, %v1304_v7  ;;  %v1296_v9 = vmul.f32 %v5579_v8, %v1256_v48 }
 0x8a5   :  { %4756 = vmatmul.mubr.msk.f32.gmra.mrb[42].mxu1 %vm173_vm2, %v1313_v5  ;;  %v1305_v38 = vmul.f32 %v1302_v28, %v1296_v9 }
 0x8a6   :  { %v5581_v36 = vpop.eup %5580  ;;  %4758 = vmatprep.mubr.msk.f32.mxu1 %vm5672_vm0, %v5673_v4 }
 0x8a7   :  { %v1314_v46 = vadd.f32 %v1311_v21, %v1305_v38  ;;  %v1297_v50 = vmul.f32 %v5581_v36, %v1257_v53 }
 0x8a9   :  { %4759 = vmatmul.mubr.msk.f32.gmra.mrb[44].mxu1 %vm173_vm2, %v1314_v46  ;;  %v1306_v3 = vmul.f32 %v1302_v28, %v1297_v50 }
 0x8aa   :  { %4761 = vmatprep.mubr.msk.f32.mxu1 %vm5672_vm0, %v5673_v4 }
 0x8ab   :  { %v1315_v42 = vadd.f32 %v1311_v21, %v1306_v3 }
 0x8ad   :  { %4762 = vmatmul.mubr.msk.f32.gmra.mrb[46].mxu1 %vm173_vm2, %v1315_v42 }
 0x8ae   :  { %4764 = vmatprep.mubr.msk.f32.mxu1 %vm5672_vm0, %v5673_v4 }
 0x8bc   :  { %v1278_v48 = vpop.xlane.xlu0 %1277 }
 0x8bd   :  { %v1283_v37 = vmul.f32 0.03125, %v1278_v48 }
 0x8bf   :  { %v1288_v47 = vadd.f32 1e-05, %v1283_v37 }
 0x8c1   :  { %5582 = vrsqrt.f32 %v1288_v47 }
 0x8cb   :  { %v5583_v29 = vpop.eup %5582 }
 0x8cc   :  { %v1298_v52 = vmul.f32 %v5583_v29, %v1258_v12  ;;  %v5298_v12 = vpack.c.bf16 %v169_v2, %v168_v60 }
 0x8ce   :  { %v1307_v44 = vmul.f32 %v1302_v28, %v1298_v52  ;;  %5299 = vmatpush3.bf16.msra.mxu0 %v5298_v12 }
 0x8cf   :  { %5300 = vmatprep.subr.bf16.mxu0 %v5671_v0 }
 0x8d0   :  { %v1316_v53 = vadd.f32 %v1311_v21, %v1307_v44 }
 0x8d2   :  { %4765 = vmatmul.mubr.msk.f32.gmra.mrb[48].mxu1 %vm173_vm2, %v1316_v53  ;;  %5302 = vmatpush3.bf16.msra.mxu0 %v5301_v15 }
 0x8d3   :  { %4806 = vmatprep.mubr.msk.f32.mxu1 %vm5672_vm0, %v5673_v4  ;;  %5309 = vmatprep.subr.bf16.mxu0 %v5671_v0 }
 0x974   :  { %v1402_v24 = vpop.f32.mrb[40].mxu1 }
 0x975   :  { %v1403_v26 = vadd.f32 %v1402_v24, %v6277_v20  ;;  %v4754_v32 = vpop.f32.mrb[41].mxu1 }
 0x977   :  { %v1431_v31 = vmul.f32 0.044715, %v1403_v26  ;;  %v1426_v53 = vmul.f32 0.5, %v1403_v26 }
 0x978   :  { %v1407_v25 = vpop.f32.mrb[42].mxu1 }
 0x979   :  { %v1436_v35 = vmul.f32 %v1431_v31, %v1403_v26  ;;  %v1408_v23 = vadd.f32 %v1407_v25, %v6277_v20  ;;  %v4757_v34 = vpop.f32.mrb[43].mxu1 }
 0x97b   :  { %v1441_v28 = vmul.f32 %v1436_v35, %v1403_v26  ;;  %v1432_v16 = vmul.f32 0.044715, %v1408_v23  ;;  %v1427_v62 = vmul.f32 0.5, %v1408_v23 }
 0x97c   :  { %v1412_v6 = vpop.f32.mrb[44].mxu1 }
 0x97d   :  { %v1446_v21 = vadd.f32 %v1441_v28, %v1403_v26  ;;  %v1437_v1 = vmul.f32 %v1432_v16, %v1408_v23  ;;  %v1413_v33 = vadd.f32 %v1412_v6, %v6277_v20  ;;  %v4760_v45 = vpop.f32.mrb[45].mxu1 }
 0x97e   :  { %v1584_v45 = vsub.s32 7, %v5870_v17 }
 0x97f   :  { %v1451_v14 = vmul.f32 0.7978846, %v1446_v21  ;;  %v1442_v43 = vmul.f32 %v1437_v1, %v1408_v23  ;;  %v1433_v7 = vmul.f32 0.044715, %v1413_v33  ;;  %v1428_v2 = vmul.f32 0.5, %v1413_v33 }
 0x980   :  { %v1417_v8 = vpop.f32.mrb[46].mxu1 }
 0x981   :  { %5584 = vtanh.f32 %v1451_v14  ;;  %v1447_v5 = vadd.f32 %v1442_v43, %v1408_v23  ;;  %v1438_v9 = vmul.f32 %v1433_v7, %v1413_v33  ;;  %v1418_v38 = vadd.f32 %v1417_v8, %v6277_v20  ;;  %v4763_v36 = vpop.f32.mrb[47].mxu1 }
 0x983   :  { %v1443_v46 = vmul.f32 %v1438_v9, %v1413_v33  ;;  %v1434_v50 = vmul.f32 0.044715, %v1418_v38  ;;  %v1452_v3 = vmul.f32 0.7978846, %v1447_v5  ;;  %v1429_v15 = vmul.f32 0.5, %v1418_v38 }
 0x985   :  { %v1448_v42 = vadd.f32 %v1443_v46, %v1413_v33  ;;  %v1439_v48 = vmul.f32 %v1434_v50, %v1418_v38  ;;  %5586 = vtanh.f32 %v1452_v3 }
 0x987   :  { %v1444_v37 = vmul.f32 %v1439_v48, %v1418_v38  ;;  %v1453_v47 = vmul.f32 0.7978846, %v1448_v42 }
 0x989   :  { %v1449_v29 = vadd.f32 %v1444_v37, %v1418_v38  ;;  %5588 = vtanh.f32 %v1453_v47 }
 0x98b   :  { %v5585_v52 = vpop.eup %5584  ;;  %v1454_v44 = vmul.f32 0.7978846, %v1449_v29 }
 0x98c   :  { %v1461_v51 = vadd.f32 1.0, %v5585_v52 }
 0x98d   :  { %5590 = vtanh.f32 %v1454_v44 }
 0x98e   :  { %v1466_v59 = vmul.f32 %v1461_v51, %v1426_v53 }
 0x98f   :  { %v5587_v61 = vpop.eup %5586 }
 0x990   :  { %4784 = vmatmul.mubr.msk.f32.vlgmr.msra.gmra.mrb[40].mxu0 %vm1471_vm6, %v1466_v59  ;;  %v1462_v63 = vadd.f32 1.0, %v5587_v61 }
 0x991   :  { %4786 = vmatprep.mubr.msk.f32.mxu0 %vm5672_vm0, %v5673_v4 }
 0x992   :  { %v1467_v49 = vmul.f32 %v1462_v63, %v1427_v62 }
 0x993   :  { %v5589_v60 = vpop.eup %5588 }
 0x994   :  { %4787 = vmatmul.mubr.msk.f32.gmra.mrb[42].mxu0 %vm1471_vm6, %v1467_v49  ;;  %v1463_v12 = vadd.f32 1.0, %v5589_v60 }
 0x995   :  { %4789 = vmatprep.mubr.msk.f32.mxu0 %vm5672_vm0, %v5673_v4 }
 0x996   :  { %v1468_v13 = vmul.f32 %v1463_v12, %v1428_v2 }
 0x997   :  { %v5591_v54 = vpop.eup %5590 }
 0x998   :  { %4790 = vmatmul.mubr.msk.f32.gmra.mrb[44].mxu0 %vm1471_vm6, %v1468_v13  ;;  %v1464_v24 = vadd.f32 1.0, %v5591_v54 }
 0x999   :  { %4792 = vmatprep.mubr.msk.f32.mxu0 %vm5672_vm0, %v5673_v4 }
 0x99a   :  { %v1469_v26 = vmul.f32 %v1464_v24, %v1429_v15 }
 0x99c   :  { %4793 = vmatmul.mubr.msk.f32.gmra.mrb[46].mxu0 %vm1471_vm6, %v1469_v26 }
 0x99d   :  { %4795 = vmatprep.mubr.msk.f32.mxu0 %vm5672_vm0, %v5673_v4 }
 0x9a5   :  { %v1422_v32 = vpop.f32.mrb[48].mxu1 }
 0x9a6   :  { %v1423_v31 = vadd.f32 %v1422_v32, %v6277_v20  ;;  %v4766_v25 = vpop.f32.mrb[49].mxu1  ;;  %v1585_v20 = vrot.slane %v6222_v58, %v1584_v45 }
 0x9a8   :  { %v1435_v35 = vmul.f32 0.044715, %v1423_v31  ;;  %v1430_v21 = vmul.f32 0.5, %v1423_v31 }
 0x9aa   :  { %v1440_v23 = vmul.f32 %v1435_v35, %v1423_v31 }
 0x9ac   :  { %v1445_v34 = vmul.f32 %v1440_v23, %v1423_v31 }
 0x9ae   :  { %v1450_v28 = vadd.f32 %v1445_v34, %v1423_v31 }
 0x9b0   :  { %v1455_v16 = vmul.f32 0.7978846, %v1450_v28  ;;  %v6339_v28 = vld [vmem:[%s7115_s4 + $0xc0] sm:$0xff] }
 0x9b2   :  { %5592 = vtanh.f32 %v1455_v16  ;;  %v6344_v16 = vld [vmem:[%s7115_s4 + $0xd0] sm:$0xff] }
 0x9bc   :  { %v5593_v6 = vpop.eup %5592 }
 0x9bd   :  { %v1465_v1 = vadd.f32 1.0, %v5593_v6  ;;  %v5304_v6 = vpack.c.bf16 %v6344_v16, %v6339_v28 }
 0x9bf   :  { %v1470_v33 = vmul.f32 %v1465_v1, %v1430_v21  ;;  %5305 = vmatpush3.bf16.msra.mxu1 %v5304_v6  ;;  %v6352_v21 = vld [vmem:[%s7115_s4 + $0xe0] sm:$0xff]  ;;  %v6357_v1 = vld [vmem:[%s7115_s4 + $0xf0] sm:$0xff] }
 0x9c0   :  { %5306 = vmatprep.subr.bf16.mxu1 %v5671_v0 }
 0x9c1   :  { %4796 = vmatmul.mubr.msk.f32.gmra.mrb[48].mxu0 %vm1471_vm6, %v1470_v33  ;;  %v5307_v33 = vpack.c.bf16 %v6357_v1, %v6352_v21 }
 0x9c2   :  { %4831 = vmatprep.mubr.msk.f32.mxu0 %vm5672_vm0, %v5673_v4 }
 0x9c3   :  { %5308 = vmatpush3.bf16.msra.mxu1 %v5307_v33 }
 0x9c4   :  { %5317 = vmatprep.subr.bf16.mxu1 %v5671_v0 }
 0xa63   :  { %v1553_v14 = vpop.f32.mrb[40].mxu0 }
 0xa64   :  { %v1577_v43 = vadd.f32 %v1553_v14, %v6169_v11  ;;  %v4785_v7 = vpop.f32.mrb[41].mxu0 }
 0xa66   :  { %v6304_v8 = vadd.f32 %v1585_v20, %v1577_v43 }
 0xa67   :  { %v1558_v5 = vpop.f32.mrb[42].mxu0 }
 0xa68   :  { %v1578_v9 = vadd.f32 %v1558_v5, %v6174_v55  ;;  %v4788_v38 = vpop.f32.mrb[43].mxu0  ;;  %v1610_v36 = vsel %vm173_vm2, %v6304_v8, 0.0 }
 0xa69   :  { %1611 = vadd.xlane.f32.xlu1 %v1610_v36 }
 0xa6a   :  { %v6309_v46 = vadd.f32 %v1585_v20, %v1578_v9 }
 0xa6b   :  { %v1563_v50 = vpop.f32.mrb[44].mxu0 }
 0xa6c   :  { %v1579_v3 = vadd.f32 %v1563_v50, %v6179_v39  ;;  %v4791_v58 = vpop.f32.mrb[45].mxu0  ;;  %v1613_v11 = vsel %vm173_vm2, %v6309_v46, 0.0 }
 0xa6d   :  { %1614 = vadd.xlane.f32.xlu0 %v1613_v11 }
 0xa6e   :  { %v6314_v42 = vadd.f32 %v1585_v20, %v1579_v3 }
 0xa6f   :  { %v1568_v48 = vpop.f32.mrb[46].mxu0 }
 0xa70   :  { %v1580_v55 = vadd.f32 %v1568_v48, %v6184_v41  ;;  %v4794_v37 = vpop.f32.mrb[47].mxu0  ;;  %v1616_v47 = vsel %vm173_vm2, %v6314_v42, 0.0 }
 0xa71   :  { %1617 = vadd.xlane.f32.xlu1 %v1616_v47 }
 0xa72   :  { %v6319_v29 = vadd.f32 %v1585_v20, %v1580_v55  ;;  %v6367_v55 = vld [vmem:[%s7116_s5 + $0x8] sm:$0xff] }
 0xa73   :  { %v1696_v33 = vrot.slane %v6367_v55, %v260_v57 }
 0xa74   :  { %v1619_v39 = vsel %vm173_vm2, %v6319_v29, 0.0 }
 0xa75   :  { %1620 = vadd.xlane.f32.xlu0 %v1619_v39 }
 0xa94   :  { %v1573_v52 = vpop.f32.mrb[48].mxu0 }
 0xa95   :  { %v1581_v44 = vadd.f32 %v1573_v52, %v6189_v10  ;;  %v4797_v53 = vpop.f32.mrb[49].mxu0  ;;  %v1678_v52 = vrot.slane %v6367_v55, %v242_v22 }
 0xa97   :  { %v6324_v51 = vadd.f32 %v1585_v20, %v1581_v44 }
 0xa99   :  { %v1622_v41 = vsel %vm173_vm2, %v6324_v51, 0.0 }
 0xa9a   :  { %1623 = vadd.xlane.f32.xlu1 %v1622_v41  ;;  %v1687_v41 = vrot.slane %v6367_v55, %v251_v27 }
 0xaf6   :  { %v1612_v59 = vpop.xlane.xlu1 %1611 }
 0xaf7   :  { %v1625_v61 = vmul.f32 0.03125, %v1612_v59 }
 0xaf9   :  { %v1630_v62 = vsub.f32 %v6304_v8, %v1625_v61 }
 0xafa   :  { %v1615_v63 = vpop.xlane.xlu0 %1614 }
 0xafb   :  { %v1626_v49 = vmul.f32 0.03125, %v1615_v63  ;;  %v1635_v60 = vmul.f32 %v1630_v62, %v1630_v62 }
 0xafd   :  { %v1631_v2 = vsub.f32 %v6309_v46, %v1626_v49  ;;  %v1640_v12 = vsel %vm173_vm2, %v1635_v60, 0.0 }
 0xafe   :  { %v1618_v13 = vpop.xlane.xlu1 %1617  ;;  %1641 = vadd.xlane.f32.xlu0 %v1640_v12 }
 0xaff   :  { %v1627_v10 = vmul.f32 0.03125, %v1618_v13  ;;  %v1636_v54 = vmul.f32 %v1631_v2, %v1631_v2 }
 0xb01   :  { %v1632_v15 = vsub.f32 %v6314_v42, %v1627_v10  ;;  %v1643_v24 = vsel %vm173_vm2, %v1636_v54, 0.0 }
 0xb02   :  { %v1621_v26 = vpop.xlane.xlu0 %1620  ;;  %1644 = vadd.xlane.f32.xlu1 %v1643_v24 }
 0xb03   :  { %v1628_v32 = vmul.f32 0.03125, %v1621_v26  ;;  %v1637_v31 = vmul.f32 %v1632_v15, %v1632_v15 }
 0xb05   :  { %v1633_v25 = vsub.f32 %v6319_v29, %v1628_v32  ;;  %v1646_v35 = vsel %vm173_vm2, %v1637_v31, 0.0 }
 0xb06   :  { %1647 = vadd.xlane.f32.xlu0 %v1646_v35 }
 0xb07   :  { %v1638_v23 = vmul.f32 %v1633_v25, %v1633_v25 }
 0xb09   :  { %v1649_v34 = vsel %vm173_vm2, %v1638_v23, 0.0 }
 0xb0a   :  { %1650 = vadd.xlane.f32.xlu1 %v1649_v34 }
 0xb27   :  { %v1624_v20 = vpop.xlane.xlu1 %1623 }
 0xb28   :  { %v1629_v14 = vmul.f32 0.03125, %v1624_v20 }
 0xb2a   :  { %v1634_v43 = vsub.f32 %v6324_v51, %v1629_v14 }
 0xb2c   :  { %v1639_v7 = vmul.f32 %v1634_v43, %v1634_v43 }
 0xb2e   :  { %v1652_v5 = vsel %vm173_vm2, %v1639_v7, 0.0 }
 0xb2f   :  { %1653 = vadd.xlane.f32.xlu0 %v1652_v5 }
 0xb8b   :  { %v1642_v9 = vpop.xlane.xlu0 %1641 }
 0xb8c   :  { %v1655_v38 = vmul.f32 0.03125, %v1642_v9 }
 0xb8e   :  { %v1660_v36 = vadd.f32 1e-05, %v1655_v38 }
 0xb8f   :  { %v1645_v50 = vpop.xlane.xlu1 %1644 }
 0xb90   :  { %5594 = vrsqrt.f32 %v1660_v36  ;;  %v1656_v3 = vmul.f32 0.03125, %v1645_v50 }
 0xb92   :  { %v1661_v58 = vadd.f32 1e-05, %v1656_v3 }
 0xb93   :  { %v1648_v11 = vpop.xlane.xlu0 %1647 }
 0xb94   :  { %5596 = vrsqrt.f32 %v1661_v58  ;;  %v1657_v48 = vmul.f32 0.03125, %v1648_v11 }
 0xb96   :  { %v1662_v37 = vadd.f32 1e-05, %v1657_v48 }
 0xb97   :  { %v1651_v47 = vpop.xlane.xlu1 %1650 }
 0xb98   :  { %5598 = vrsqrt.f32 %v1662_v37  ;;  %v1658_v39 = vmul.f32 0.03125, %v1651_v47 }
 0xb9a   :  { %v5595_v44 = vpop.eup %5594  ;;  %v1663_v53 = vadd.f32 1e-05, %v1658_v39 }
 0xb9b   :  { %v1670_v59 = vmul.f32 %v5595_v44, %v1630_v62 }
 0xb9c   :  { %5600 = vrsqrt.f32 %v1663_v53 }
 0xb9d   :  { %v1679_v61 = vmul.f32 %v1678_v52, %v1670_v59 }
 0xb9e   :  { %v5597_v63 = vpop.eup %5596 }
 0xb9f   :  { %v1688_v49 = vadd.f32 %v1687_v41, %v1679_v61  ;;  %v1671_v60 = vmul.f32 %v5597_v63, %v1631_v2 }
 0xba1   :  { %4807 = vmatmul.mubr.msk.f32.vlgmr.msra.gmra.mrb[50].mxu1 %vm173_vm2, %v1688_v49  ;;  %v1680_v12 = vmul.f32 %v1678_v52, %v1671_v60 }
 0xba2   :  { %v5599_v13 = vpop.eup %5598  ;;  %4809 = vmatprep.mubr.msk.f32.mxu1 %vm5672_vm0, %v5673_v4 }
 0xba3   :  { %v1689_v22 = vadd.f32 %v1687_v41, %v1680_v12  ;;  %v1672_v10 = vmul.f32 %v5599_v13, %v1632_v15 }
 0xba5   :  { %4810 = vmatmul.mubr.msk.f32.gmra.mrb[52].mxu1 %vm173_vm2, %v1689_v22  ;;  %v1681_v54 = vmul.f32 %v1678_v52, %v1672_v10 }
 0xba6   :  { %v5601_v24 = vpop.eup %5600  ;;  %4812 = vmatprep.mubr.msk.f32.mxu1 %vm5672_vm0, %v5673_v4 }
 0xba7   :  { %v1690_v27 = vadd.f32 %v1687_v41, %v1681_v54  ;;  %v1673_v62 = vmul.f32 %v5601_v24, %v1633_v25 }
 0xba9   :  { %4813 = vmatmul.mubr.msk.f32.gmra.mrb[54].mxu1 %vm173_vm2, %v1690_v27  ;;  %v1682_v2 = vmul.f32 %v1678_v52, %v1673_v62 }
 0xbaa   :  { %4815 = vmatprep.mubr.msk.f32.mxu1 %vm5672_vm0, %v5673_v4 }
 0xbab   :  { %v1691_v26 = vadd.f32 %v1687_v41, %v1682_v2 }
 0xbad   :  { %4816 = vmatmul.mubr.msk.f32.gmra.mrb[56].mxu1 %vm173_vm2, %v1691_v26 }
 0xbae   :  { %4818 = vmatprep.mubr.msk.f32.mxu1 %vm5672_vm0, %v5673_v4 }
 0xbbc   :  { %v1654_v15 = vpop.xlane.xlu0 %1653 }
 0xbbd   :  { %v1659_v32 = vmul.f32 0.03125, %v1654_v15 }
 0xbbf   :  { %v1664_v31 = vadd.f32 1e-05, %v1659_v32 }
 0xbc1   :  { %5602 = vrsqrt.f32 %v1664_v31 }
 0xbcb   :  { %v5603_v35 = vpop.eup %5602 }
 0xbcc   :  { %v1674_v23 = vmul.f32 %v5603_v35, %v1634_v43 }
 0xbce   :  { %v1683_v34 = vmul.f32 %v1678_v52, %v1674_v23 }
 0xbd0   :  { %v1692_v25 = vadd.f32 %v1687_v41, %v1683_v34  ;;  %v5665_v34 = vld [vmem:[%s7117_s2] sm:$0xff] }
 0xbd2   :  { %4819 = vmatmul.mubr.msk.f32.gmra.mrb[58].mxu1 %vm173_vm2, %v1692_v25 }
 0xbd3   :  { %4856 = vmatprep.mubr.msk.f32.mxu1 %vm5672_vm0, %v5673_v4 }
 0xc74   :  { %v1778_v6 = vpop.f32.mrb[50].mxu1 }
 0xc75   :  { %v4808_v20 = vpop.f32.mrb[51].mxu1  ;;  %v1779_v7 = vadd.f32 %v1778_v6, %v1696_v33 }
 0xc78   :  { %v1783_v14 = vpop.f32.mrb[52].mxu1 }
 0xc79   :  { %v1784_v5 = vadd.f32 %v1783_v14, %v1696_v33  ;;  %v4811_v9 = vpop.f32.mrb[53].mxu1 }
 0xc7b   :  { %v6393_v38 = vpack.i.bf16 %v1784_v5, %v1779_v7 }
 0xc7c   :  { %v1788_v43 = vpop.f32.mrb[54].mxu1 }
 0xc7d   :  { %5475 = vrot.lane.b32.xlu1 %v6393_v38, %s5674_s21  ;;  %v4814_v36 = vpop.f32.mrb[55].mxu1  ;;  %v1789_v3 = vadd.f32 %v1788_v43, %v1696_v33 }
 0xc80   :  { %v1793_v50 = vpop.f32.mrb[56].mxu1 }
 0xc81   :  { %v1794_v58 = vadd.f32 %v1793_v50, %v1696_v33  ;;  %v4817_v11 = vpop.f32.mrb[57].mxu1 }
 0xc83   :  { %v6397_v48 = vpack.i.bf16 %v1794_v58, %v1789_v3 }
 0xc85   :  { %5480 = vrot.lane.b32.xlu0 %v6397_v48, %s5674_s21 }
 0xca5   :  { %v1798_v57 = vpop.f32.mrb[58].mxu1 }
 0xca6   :  { %v6401_v37 = vadd.f32 %v1798_v57, %v1696_v33  ;;  %v4820_v47 = vpop.f32.mrb[59].mxu1 }
 0xca8   :  { %2130 = vrot.lane.b32.xlu0 %v6401_v37, %s5675_s22  ;;  %1815 = vrot.lane.b32.xlu1 %v6401_v37, %s5674_s21 }
 0xcac   :  { %2114 = vrot.lane.b32.xlu0 %v1784_v5, %s5676_s23  ;;  %5485 = vrot.lane.b32.xlu1 %v6393_v38, %s5675_s22 }
 0xcb0   :  { %2118 = vrot.lane.b32.xlu0 %v1794_v58, %s5676_s23  ;;  %5490 = vrot.lane.b32.xlu1 %v6397_v48, %s5675_s22 }
 0xcb4   :  { %2112 = vrot.lane.b32.xlu1 %v1779_v7, %s5676_s23 }
 0xcb8   :  { %2116 = vrot.lane.b32.xlu1 %v1789_v3, %s5676_s23 }
 0xcbc   :  { %2120 = vrot.lane.b32.xlu1 %v6401_v37, %s5676_s23 }
 0xcef   :  { %v5476_v39 = vpop.permute.xlu1 %5475 }
 0xcf0   :  { %v5478_v52 = vunpack.i.h.bf16 %v5476_v39  ;;  %v5477_v44 = vunpack.i.l.bf16 %v5476_v39 }
 0xcf2   :  { %v5310_v53 = vpack.c.bf16 %v5478_v52, %v5477_v44  ;;  %v5668_v52 = vld [vmem:[%s7117_s2 + $0x18] sm:$0xff] }
 0xcf4   :  { %5312 = vmatpush3.bf16.xpose.msk.msra.mxu0 %vm5935_vm4, %v5310_v53 }
 0xcf5   :  { %5313 = vmatprep.subr.bf16.mxu0 %v5671_v0 }
 0xcf7   :  { %v5481_v41 = vpop.permute.xlu0 %5480 }
 0xcf8   :  { %v5483_v59 = vunpack.i.h.bf16 %v5481_v41  ;;  %v5482_v61 = vunpack.i.l.bf16 %v5481_v41 }
 0xcfa   :  { %v5314_v63 = vpack.c.bf16 %v5483_v59, %v5482_v61 }
 0xcfc   :  { %5316 = vmatpush3.bf16.xpose.msk.msra.mxu0 %vm5935_vm4, %v5314_v63  ;;  %v5669_v63 = vld [vmem:[%s7117_s2 + $0x20] sm:$0xff] }
 0xcfd   :  { %4829 = vmatprep.subr.mxu0 %v5673_v4 }
 0xd1a   :  { %v1816_v49 = vpop.permute.xlu1 %1815  ;;  %v2131_v62 = vpop.permute.xlu0 %2130 }
 0xd1b   :  { %4830 = vmatpush3.xpose.msk.msra.mxu0 %vm382_vm3, %v1816_v49 }
 0xd1c   :  { %5323 = vmatprep.subr.bf16.mxu0 %v5671_v0 }
 0xd1e   :  { %v5486_v60 = vpop.permute.xlu1 %5485  ;;  %4832 = vmatmul.mubr.msk.f32.vlgmr.msra.gmra.mrb[50].mxu0 %vm382_vm3, %v1779_v7  ;;  %v2115_v30 = vpop.permute.xlu0 %2114  ;;  %v5666_v7 = vld [vmem:[%s7117_s2 + $0x8] sm:$0xff] }
 0xd1f   :  { %v5488_v12 = vunpack.i.h.bf16 %v5486_v60  ;;  %v5487_v13 = vunpack.i.l.bf16 %v5486_v60  ;;  %4834 = vmatprep.mubr.msk.f32.mxu0 %vm5672_vm0, %v5673_v4 }
 0xd21   :  { %v5324_v22 = vpack.c.bf16 %v5488_v12, %v5487_v13 }
 0xd22   :  { %v5491_v10 = vpop.permute.xlu1 %5490  ;;  %4835 = vmatmul.mubr.msk.f32.gmra.mrb[52].mxu0 %vm382_vm3, %v1784_v5  ;;  %v2119_v15 = vpop.permute.xlu0 %2118 }
 0xd23   :  { %5326 = vmatpush3.bf16.xpose.msk.msra.mxu0 %vm5935_vm4, %v5324_v22  ;;  %4837 = vmatprep.mubr.msk.f32.mxu0 %vm5672_vm0, %v5673_v4  ;;  %v5493_v54 = vunpack.i.h.bf16 %v5491_v10  ;;  %v5492_v24 = vunpack.i.l.bf16 %v5491_v10 }
 0xd24   :  { %5327 = vmatprep.subr.bf16.mxu0 %v5671_v0 }
 0xd25   :  { %v5328_v27 = vpack.c.bf16 %v5493_v54, %v5492_v24 }
 0xd26   :  { %4838 = vmatmul.mubr.msk.f32.gmra.mrb[54].mxu0 %vm382_vm3, %v1789_v3  ;;  %v2113_v2 = vpop.permute.xlu1 %2112  ;;  %v5667_v3 = vld [vmem:[%s7117_s2 + $0x10] sm:$0xff] }
 0xd27   :  { %4840 = vmatprep.mubr.msk.f32.mxu0 %vm5672_vm0, %v5673_v4 }
 0xd2a   :  { %4841 = vmatmul.mubr.msk.f32.gmra.mrb[56].mxu0 %vm382_vm3, %v1794_v58  ;;  %v2117_v26 = vpop.permute.xlu1 %2116 }
 0xd2b   :  { %5330 = vmatpush3.bf16.xpose.msk.msra.mxu0 %vm5935_vm4, %v5328_v27  ;;  %4843 = vmatprep.mubr.msk.f32.mxu0 %vm5672_vm0, %v5673_v4 }
 0xd2c   :  { %4879 = vmatprep.subr.mxu0 %v5673_v4 }
 0xd2e   :  { %4844 = vmatmul.mubr.msk.f32.gmra.mrb[58].mxu0 %vm382_vm3, %v6401_v37  ;;  %v2121_v32 = vpop.permute.xlu1 %2120 }
 0xd2f   :  { %4881 = vmatprep.mubr.msk.f32.mxu0 %vm5672_vm0, %v5673_v4 }
 0xd33   :  { %4880 = vmatpush3.xpose.msk.msra.mxu0 %vm382_vm3, %v2131_v62 }
 0xd34   :  { %5337 = vmatprep.subr.bf16.mxu0 %v5671_v0 }
 0xd36   :  { %4882 = vmatmul.mubr.msk.f32.vlgmr.msra.gmra.mrb[60].mxu0 %vm382_vm3, %v2113_v2 }
 0xd37   :  { %4884 = vmatprep.mubr.msk.f32.mxu0 %vm5672_vm0, %v5673_v4 }
 0xd3a   :  { %4885 = vmatmul.mubr.msk.f32.gmra.mrb[62].mxu0 %vm382_vm3, %v2115_v30 }
 0xd3b   :  { %4887 = vmatprep.mubr.msk.f32.mxu0 %vm5672_vm0, %v5673_v4 }
 0xd3e   :  { %4888 = vmatmul.mubr.msk.f32.gmra.mrb[64].mxu0 %vm382_vm3, %v2117_v26 }
 0xd3f   :  { %4890 = vmatprep.mubr.msk.f32.mxu0 %vm5672_vm0, %v5673_v4 }
 0xd42   :  { %4891 = vmatmul.mubr.msk.f32.gmra.mrb[66].mxu0 %vm382_vm3, %v2119_v15 }
 0xd43   :  { %4893 = vmatprep.mubr.msk.f32.mxu0 %vm5672_vm0, %v5673_v4 }
 0xd46   :  { %4894 = vmatmul.mubr.msk.f32.gmra.mrb[68].mxu0 %vm382_vm3, %v2121_v32 }
 0xd47   :  { %4925 = vmatprep.mubr.msk.f32.mxu0 %vm5672_vm0, %v5673_v4 }
 0xdf1   :  { %v1903_v31 = vpop.f32.mrb[50].mxu0 }
 0xdf2   :  { %v1927_v35 = vmul.f32 0.25, %v1903_v31  ;;  %v4833_v23 = vpop.f32.mrb[51].mxu0 }
 0xdf4   :  { %v6467_v25 = vadd.f32 %v5665_v34, %v1927_v35 }
 0xdf5   :  { %v1908_v6 = vpop.f32.mrb[52].mxu0 }
 0xdf6   :  { %v1928_v33 = vmul.f32 0.25, %v1908_v6  ;;  %v4836_v20 = vpop.f32.mrb[53].mxu0  ;;  %v1937_v14 = vsel %vm503_vm5, %v6467_v25, -inf }
 0xdf7   :  { %1938 = vmax.xlane.f32.xlu0 %v1937_v14 }
 0xdf8   :  { %v1933_v5 = vadd.f32 %v5666_v7, %v1928_v33 }
 0xdf9   :  { %v1913_v9 = vpop.f32.mrb[54].mxu0 }
 0xdfa   :  { %v1929_v43 = vmul.f32 0.25, %v1913_v9  ;;  %v4839_v36 = vpop.f32.mrb[55].mxu0  ;;  %v1940_v50 = vsel %vm503_vm5, %v1933_v5, -inf }
 0xdfb   :  { %1941 = vmax.xlane.f32.xlu1 %v1940_v50 }
 0xdfc   :  { %v1934_v58 = vadd.f32 %v5667_v3, %v1929_v43 }
 0xdfd   :  { %v1918_v11 = vpop.f32.mrb[56].mxu0 }
 0xdfe   :  { %v1930_v57 = vmul.f32 0.25, %v1918_v11  ;;  %v4842_v47 = vpop.f32.mrb[57].mxu0  ;;  %v1943_v39 = vsel %vm503_vm5, %v1934_v58, -inf }
 0xdff   :  { %1944 = vmax.xlane.f32.xlu0 %v1943_v39 }
 0xe00   :  { %v1935_v44 = vadd.f32 %v5668_v52, %v1930_v57 }
 0xe01   :  { %v1923_v53 = vpop.f32.mrb[58].mxu0 }
 0xe02   :  { %v1931_v41 = vmul.f32 0.25, %v1923_v53  ;;  %v4845_v59 = vpop.f32.mrb[59].mxu0  ;;  %v1946_v61 = vsel %vm503_vm5, %v1935_v44, -inf }
 0xe03   :  { %1947 = vmax.xlane.f32.xlu0 %v1946_v61 }
 0xe04   :  { %v1936_v49 = vadd.f32 %v5669_v63, %v1931_v41 }
 0xe06   :  { %v1949_v60 = vsel %vm503_vm5, %v1936_v49, -inf }
 0xe07   :  { %1950 = vmax.xlane.f32.xlu0 %v1949_v60 }
 0xe09   :  { %v2218_v12 = vpop.f32.mrb[60].mxu0 }
 0xe0a   :  { %v2242_v13 = vmul.f32 0.25, %v2218_v12  ;;  %v4883_v22 = vpop.f32.mrb[61].mxu0 }
 0xe0c   :  { %v2247_v10 = vadd.f32 %v5665_v34, %v2242_v13 }
 0xe0d   :  { %v2223_v54 = vpop.f32.mrb[62].mxu0 }
 0xe0e   :  { %v2243_v24 = vmul.f32 0.25, %v2223_v54  ;;  %v4886_v27 = vpop.f32.mrb[63].mxu0  ;;  %v2252_v62 = vsel %vm503_vm5, %v2247_v10, -inf }
 0xe0f   :  { %2253 = vmax.xlane.f32.xlu1 %v2252_v62 }
 0xe10   :  { %v6488_v2 = vadd.f32 %v5666_v7, %v2243_v24 }
 0xe11   :  { %v2228_v30 = vpop.f32.mrb[64].mxu0 }
 0xe12   :  { %v2244_v26 = vmul.f32 0.25, %v2228_v30  ;;  %v4889_v15 = vpop.f32.mrb[65].mxu0  ;;  %v2255_v32 = vsel %vm503_vm5, %v6488_v2, -inf }
 0xe13   :  { %2256 = vmax.xlane.f32.xlu0 %v2255_v32 }
 0xe14   :  { %v6492_v31 = vadd.f32 %v5667_v3, %v2244_v26 }
 0xe15   :  { %v2233_v35 = vpop.f32.mrb[66].mxu0 }
 0xe16   :  { %v2245_v23 = vmul.f32 0.25, %v2233_v35  ;;  %v4892_v34 = vpop.f32.mrb[67].mxu0  ;;  %v2258_v6 = vsel %vm503_vm5, %v6492_v31, -inf }
 0xe17   :  { %2259 = vmax.xlane.f32.xlu1 %v2258_v6 }
 0xe18   :  { %v6496_v33 = vadd.f32 %v5668_v52, %v2245_v23 }
 0xe19   :  { %v2238_v20 = vpop.f32.mrb[68].mxu0 }
 0xe1a   :  { %v2246_v14 = vmul.f32 0.25, %v2238_v20  ;;  %v4895_v7 = vpop.f32.mrb[69].mxu0  ;;  %v2261_v9 = vsel %vm503_vm5, %v6496_v33, -inf }
 0xe1b   :  { %2262 = vmax.xlane.f32.xlu0 %v2261_v9 }
 0xe1c   :  { %v6500_v43 = vadd.f32 %v5669_v63, %v2246_v14 }
 0xe1e   :  { %v2264_v36 = vsel %vm503_vm5, %v6500_v43, -inf }
 0xe1f   :  { %2265 = vmax.xlane.f32.xlu1 %v2264_v36 }
 0xe30   :  { %5495 = vrot.lane.b32.xlu1 %v6393_v38, %s5677_s11 }
 0xe31   :  { %5500 = vrot.lane.b32.xlu0 %v6397_v48, %s5677_s11 }
 0xe84   :  { %v1939_v50 = vpop.xlane.xlu0 %1938 }
 0xe85   :  { %v1952_v3 = vsub.f32 %v6467_v25, %v1939_v50 }
 0xe87   :  { %v1957_v11 = vmul.f32 1.442695, %v1952_v3 }
 0xe88   :  { %v1942_v57 = vpop.xlane.xlu1 %1941 }
 0xe89   :  { %5604 = vpow2.f32 %v1957_v11  ;;  %v1953_v47 = vsub.f32 %v1933_v5, %v1942_v57 }
 0xe8b   :  { %v1959_v39 = vmul.f32 1.442695, %v1953_v47 }
 0xe8c   :  { %v1945_v52 = vpop.xlane.xlu0 %1944 }
 0xe8d   :  { %5606 = vpow2.f32 %v1959_v39  ;;  %v1954_v53 = vsub.f32 %v1934_v58, %v1945_v52 }
 0xe8f   :  { %v1961_v41 = vmul.f32 1.442695, %v1954_v53 }
 0xe90   :  { %v1948_v59 = vpop.xlane.xlu0 %1947 }
 0xe91   :  { %5608 = vpow2.f32 %v1961_v41  ;;  %v1955_v61 = vsub.f32 %v1935_v44, %v1948_v59 }
 0xe93   :  { %v6509_v63 = vpop.eup %5604  ;;  %v1963_v60 = vmul.f32 1.442695, %v1955_v61 }
 0xe94   :  { %v1951_v12 = vpop.xlane.xlu0 %1950  ;;  %v1967_v13 = vsel %vm503_vm5, %v6509_v63, 0.0 }
 0xe95   :  { %5610 = vpow2.f32 %v1963_v60  ;;  %v1956_v25 = vsub.f32 %v1936_v49, %v1951_v12  ;;  %1968 = vadd.xlane.f32.xlu0 %v1967_v13 }
 0xe97   :  { %v6513_v22 = vpop.eup %5606  ;;  %v1965_v5 = vmul.f32 1.442695, %v1956_v25  ;;  %v5514_v25 = vpack.i.bf16 %v6357_v1, %v6352_v21 }
 0xe98   :  { %v1970_v58 = vsel %vm503_vm5, %v6513_v22, 0.0 }
 0xe99   :  { %5612 = vpow2.f32 %v1965_v5  ;;  %1971 = vadd.xlane.f32.xlu1 %v1970_v58  ;;  %v5519_v5 = vpack.i.bf16 %v6344_v16, %v6339_v28 }
 0xe9b   :  { %v6517_v54 = vpop.eup %5608 }
 0xe9c   :  { %v2254_v44 = vpop.xlane.xlu1 %2253  ;;  %v1973_v24 = vsel %vm503_vm5, %v6517_v54, 0.0 }
 0xe9d   :  { %v2267_v27 = vsub.f32 %v2247_v10, %v2254_v44  ;;  %1974 = vadd.xlane.f32.xlu0 %v1973_v24 }
 0xe9f   :  { %v6521_v62 = vpop.eup %5610  ;;  %v2272_v49 = vmul.f32 1.442695, %v2267_v27 }
 0xea0   :  { %v1976_v30 = vsel %vm503_vm5, %v6521_v62, 0.0  ;;  %v2257_v32 = vpop.xlane.xlu0 %2256 }
 0xea1   :  { %5614 = vpow2.f32 %v2272_v49  ;;  %1977 = vadd.xlane.f32.xlu1 %v1976_v30  ;;  %v2268_v57 = vsub.f32 %v6488_v2, %v2257_v32 }
 0xea3   :  { %v6525_v26 = vpop.eup %5612  ;;  %v2274_v47 = vmul.f32 1.442695, %v2268_v57 }
 0xea4   :  { %v1979_v15 = vsel %vm503_vm5, %v6525_v26, 0.0  ;;  %v2260_v35 = vpop.xlane.xlu1 %2259 }
 0xea5   :  { %1980 = vadd.xlane.f32.xlu0 %v1979_v15  ;;  %v2269_v39 = vsub.f32 %v6492_v31, %v2260_v35  ;;  %5616 = vpow2.f32 %v2274_v47 }
 0xea7   :  { %v2276_v53 = vmul.f32 1.442695, %v2269_v39 }
 0xea8   :  { %v2263_v23 = vpop.xlane.xlu0 %2262 }
 0xea9   :  { %v2270_v52 = vsub.f32 %v6496_v33, %v2263_v23  ;;  %5618 = vpow2.f32 %v2276_v53 }
 0xeab   :  { %v6529_v34 = vpop.eup %5614  ;;  %v2278_v59 = vmul.f32 1.442695, %v2270_v52 }
 0xeac   :  { %v2266_v10 = vpop.xlane.xlu1 %2265  ;;  %v2282_v6 = vsel %vm503_vm5, %v6529_v34, 0.0  ;;  %v5501_v20 = vpop.permute.xlu0 %5500 }
 0xead   :  { %2283 = vadd.xlane.f32.xlu1 %v2282_v6  ;;  %v5503_v36 = vunpack.i.h.bf16 %v5501_v20  ;;  %v5502_v50 = vunpack.i.l.bf16 %v5501_v20  ;;  %v2271_v41 = vsub.f32 %v6500_v43, %v2266_v10  ;;  %5620 = vpow2.f32 %v2278_v59 }
 0xeaf   :  { %v5321_v11 = vpack.c.bf16 %v5503_v36, %v5502_v50  ;;  %v2280_v61 = vmul.f32 1.442695, %v2271_v41 }
 0xeb0   :  { %v5496_v14 = vpop.permute.xlu1 %5495 }
 0xeb1   :  { %v5498_v7 = vunpack.i.h.bf16 %v5496_v14  ;;  %v5497_v9 = vunpack.i.l.bf16 %v5496_v14  ;;  %5622 = vpow2.f32 %v2280_v61 }
 0xeb3   :  { %v5318_v3 = vpack.c.bf16 %v5498_v7, %v5497_v9 }
 0xeb5   :  { %5319 = vmatpush3.bf16.msra.mxu1 %v5318_v3 }
 0xeb6   :  { %5320 = vmatprep.subr.bf16.mxu1 %v5671_v0 }
 0xeb9   :  { %5322 = vmatpush3.bf16.msra.mxu1 %v5321_v11 }
 0xeba   :  { %4854 = vmatprep.subr.mxu1 %v5673_v4 }
 0xebb   :  { %5505 = vrot.lane.b32.xlu0 %v6393_v38, %s5678_s12  ;;  %v6543_v38 = vpop.eup %5616 }
 0xebc   :  { %v2285_v60 = vsel %vm503_vm5, %v6543_v38, 0.0  ;;  %v6547_v2 = vpop.eup %5618 }
 0xebd   :  { %v6549_v31 = vpop.eup %5620  ;;  %v2288_v33 = vsel %vm503_vm5, %v6547_v2, 0.0 }
 0xebe   :  { %2000 = vrot.lane.b32.xlu1 %v6401_v37, %s5677_s11  ;;  %v6553_v12 = vpop.eup %5622  ;;  %v2291_v43 = vsel %vm503_vm5, %v6549_v31, 0.0 }
 0xebf   :  { %v2294_v13 = vsel %vm503_vm5, %v6553_v12, 0.0 }
 0xeda   :  { %2286 = vadd.xlane.f32.xlu0 %v2285_v60 }
 0xede   :  { %2289 = vadd.xlane.f32.xlu0 %v2288_v33 }
 0xee2   :  { %2292 = vadd.xlane.f32.xlu0 %v2291_v43  ;;  %2295 = vadd.xlane.f32.xlu1 %v2294_v13 }
 0xef8   :  { %5510 = vrot.lane.b32.xlu0 %v6397_v48, %s5678_s12 }
 0xefc   :  { %2315 = vrot.lane.b32.xlu0 %v6401_v37, %s5678_s12 }
 0xf00   :  { %5515 = vrot.lane.b32.xlu0 %v5514_v25, %s5679_s1 }
 0xf04   :  { %5520 = vrot.lane.b32.xlu0 %v5519_v5, %s5679_s1 }
 0xf22   :  { %v1969_v58 = vpop.xlane.xlu0 %1968 }
 0xf23   :  { %5624 = vrcp.f32 %v1969_v58 }
 0xf26   :  { %v1972_v24 = vpop.xlane.xlu1 %1971 }
 0xf27   :  { %5626 = vrcp.f32 %v1972_v24 }
 0xf2a   :  { %v1975_v44 = vpop.xlane.xlu0 %1974 }
 0xf2b   :  { %5628 = vrcp.f32 %v1975_v44 }
 0xf2d   :  { %v5625_v30 = vpop.eup %5624 }
 0xf2e   :  { %v1978_v48 = vpop.xlane.xlu1 %1977  ;;  %v1987_v1 = vmul.f32 %v5625_v30, %v6509_v63 }
 0xf2f   :  { %5630 = vrcp.f32 %v1978_v48 }
 0xf31   :  { %v5627_v28 = vpop.eup %5626 }
 0xf32   :  { %v1981_v27 = vpop.xlane.xlu0 %1980  ;;  %v1988_v35 = vmul.f32 %v5627_v28, %v6513_v22 }
 0xf33   :  { %5632 = vrcp.f32 %v1981_v27 }
 0xf35   :  { %v5629_v23 = vpop.eup %5628 }
 0xf36   :  { %v5506_v49 = vpop.permute.xlu0 %5505  ;;  %v1989_v63 = vmul.f32 %v5629_v23, %v6517_v54 }
 0xf37   :  { %v5508_v15 = vunpack.i.h.bf16 %v5506_v49  ;;  %v5507_v21 = vunpack.i.l.bf16 %v5506_v49 }
 0xf39   :  { %v5332_v16 = vpack.c.bf16 %v5508_v15, %v5507_v21  ;;  %v5631_v10 = vpop.eup %5630 }
 0xf3a   :  { %v2284_v37 = vpop.xlane.xlu1 %2283  ;;  %v1990_v6 = vmul.f32 %v5631_v10, %v6521_v62 }
 0xf3b   :  { %5634 = vrcp.f32 %v2284_v37 }
 0xf3d   :  { %v5633_v20 = vpop.eup %5632 }
 0xf3e   :  { %v2001_v32 = vpop.permute.xlu1 %2000  ;;  %v1991_v22 = vmul.f32 %v5633_v20, %v6525_v26 }
 0xf3f   :  { %4855 = vmatpush3.msra.mxu1 %v2001_v32 }
 0xf40   :  { %4857 = vmatmul.mubr.msk.f32.vlgmr.msra.gmra.mrb[60].mxu1 %vm503_vm5, %v1987_v1  ;;  %5331 = vmatprep.subr.bf16.mxu1 %v5671_v0 }
 0xf41   :  { %5333 = vmatpush3.bf16.msra.mxu1 %v5332_v16  ;;  %4859 = vmatprep.mubr.msk.f32.mxu1 %vm5672_vm0, %v5673_v4 }
 0xf42   :  { %5334 = vmatprep.subr.bf16.mxu1 %v5671_v0 }
 0xf44   :  { %4860 = vmatmul.mubr.msk.f32.gmra.mrb[62].mxu1 %vm503_vm5, %v1988_v35 }
 0xf45   :  { %4862 = vmatprep.mubr.msk.f32.mxu1 %vm5672_vm0, %v5673_v4  ;;  %v5635_v3 = vpop.eup %5634 }
 0xf46   :  { %v2302_v26 = vmul.f32 %v5635_v3, %v6529_v34 }
 0xf48   :  { %4863 = vmatmul.mubr.msk.f32.gmra.mrb[64].mxu1 %vm503_vm5, %v1989_v63 }
 0xf49   :  { %4865 = vmatprep.mubr.msk.f32.mxu1 %vm5672_vm0, %v5673_v4 }
 0xf4c   :  { %4866 = vmatmul.mubr.msk.f32.gmra.mrb[66].mxu1 %vm503_vm5, %v1990_v6 }
 0xf4d   :  { %4868 = vmatprep.mubr.msk.f32.mxu1 %vm5672_vm0, %v5673_v4 }
 0xf50   :  { %4869 = vmatmul.mubr.msk.f32.gmra.mrb[68].mxu1 %vm503_vm5, %v1991_v22 }
 0xf51   :  { %4906 = vmatprep.mubr.msk.f32.mxu1 %vm5672_vm0, %v5673_v4 }
 0xf67   :  { %v2287_v54 = vpop.xlane.xlu0 %2286 }
 0xf68   :  { %5636 = vrcp.f32 %v2287_v54 }
 0xf6b   :  { %v2290_v14 = vpop.xlane.xlu0 %2289 }
 0xf6c   :  { %5638 = vrcp.f32 %v2290_v14 }
 0xf6f   :  { %v2293_v7 = vpop.xlane.xlu0 %2292  ;;  %v2296_v11 = vpop.xlane.xlu1 %2295 }
 0xf70   :  { %5640 = vrcp.f32 %v2293_v7 }
 0xf71   :  { %5642 = vrcp.f32 %v2296_v11  ;;  %v2661_v11 = vrot.slane %v6367_v55, %v1227_v56 }
 0xf72   :  { %v5637_v47 = vpop.eup %5636 }
 0xf73   :  { %v5511_v9 = vpop.permute.xlu0 %5510  ;;  %v2303_v39 = vmul.f32 %v5637_v47, %v6543_v38 }
 0xf74   :  { %v5513_v62 = vunpack.i.h.bf16 %v5511_v9  ;;  %v5512_v36 = vunpack.i.l.bf16 %v5511_v9 }
 0xf76   :  { %v5335_v50 = vpack.c.bf16 %v5513_v62, %v5512_v36  ;;  %v5639_v52 = vpop.eup %5638 }
 0xf77   :  { %v2316_v57 = vpop.permute.xlu0 %2315  ;;  %v2304_v59 = vmul.f32 %v5639_v52, %v6547_v2 }
 0xf78   :  { %5336 = vmatpush3.bf16.msra.mxu1 %v5335_v50 }
 0xf79   :  { %4904 = vmatprep.subr.mxu1 %v5673_v4 }
 0xf7a   :  { %v5641_v61 = vpop.eup %5640 }
 0xf7b   :  { %v5516_v53 = vpop.permute.xlu0 %5515  ;;  %v2305_v13 = vmul.f32 %v5641_v61, %v6549_v31  ;;  %v5643_v25 = vpop.eup %5642 }
 0xf7c   :  { %4905 = vmatpush3.msra.mxu1 %v2316_v57  ;;  %v5518_v34 = vunpack.i.h.bf16 %v5516_v53  ;;  %v5517_v41 = vunpack.i.l.bf16 %v5516_v53  ;;  %v2306_v2 = vmul.f32 %v5643_v25, %v6553_v12 }
 0xf7d   :  { %4907 = vmatmul.mubr.msk.f32.vlgmr.msra.gmra.mrb[70].mxu1 %vm503_vm5, %v2302_v26  ;;  %5340 = vmatprep.subr.bf16.mxu1 %v5671_v0 }
 0xf7e   :  { %4909 = vmatprep.mubr.msk.f32.mxu1 %vm5672_vm0, %v5673_v4  ;;  %v5338_v60 = vpack.c.bf16 %v5518_v34, %v5517_v41 }
 0xf7f   :  { %v5521_v33 = vpop.permute.xlu0 %5520 }
 0xf80   :  { %v5523_v38 = vunpack.i.h.bf16 %v5521_v33  ;;  %v5522_v43 = vunpack.i.l.bf16 %v5521_v33  ;;  %5339 = vmatpush3.bf16.msra.mxu0 %v5338_v60 }
 0xf81   :  { %4910 = vmatmul.mubr.msk.f32.gmra.mrb[72].mxu1 %vm503_vm5, %v2303_v39  ;;  %5343 = vmatprep.subr.bf16.mxu0 %v5671_v0 }
 0xf82   :  { %4912 = vmatprep.mubr.msk.f32.mxu1 %vm5672_vm0, %v5673_v4  ;;  %v5341_v5 = vpack.c.bf16 %v5523_v38, %v5522_v43 }
 0xf84   :  { %5342 = vmatpush3.bf16.msra.mxu1 %v5341_v5 }
 0xf85   :  { %4913 = vmatmul.mubr.msk.f32.gmra.mrb[74].mxu1 %vm503_vm5, %v2304_v59  ;;  %5349 = vmatprep.subr.bf16.mxu1 %v5671_v0 }
 0xf86   :  { %4915 = vmatprep.mubr.msk.f32.mxu1 %vm5672_vm0, %v5673_v4 }
 0xf89   :  { %4916 = vmatmul.mubr.msk.f32.gmra.mrb[76].mxu1 %vm503_vm5, %v2305_v13 }
 0xf8a   :  { %4918 = vmatprep.mubr.msk.f32.mxu1 %vm5672_vm0, %v5673_v4 }
 0xf8d   :  { %4919 = vmatmul.mubr.msk.f32.gmra.mrb[78].mxu1 %vm503_vm5, %v2306_v2 }
 0xf8e   :  { %4944 = vmatprep.mubr.msk.f32.mxu1 %vm5672_vm0, %v5673_v4 }
0x1013   :  { %v2088_v31 = vpop.f32.mrb[60].mxu1 }
0x1014   :  { %v4858_v58 = vpop.f32.mrb[61].mxu1  ;;  %4945 = vmatmul.mubr.msk.f32.vlgmr.msra.gmra.mrb[80].mxu1 %vm382_vm3, %v2088_v31 }
0x1015   :  { %4947 = vmatprep.mubr.msk.f32.mxu1 %vm5672_vm0, %v5673_v4 }
0x1017   :  { %v2093_v44 = vpop.f32.mrb[62].mxu1 }
0x1018   :  { %v4861_v24 = vpop.f32.mrb[63].mxu1  ;;  %4948 = vmatmul.mubr.msk.f32.gmra.mrb[82].mxu1 %vm382_vm3, %v2093_v44 }
0x1019   :  { %4950 = vmatprep.mubr.msk.f32.mxu1 %vm5672_vm0, %v5673_v4 }
0x101b   :  { %v2098_v12 = vpop.f32.mrb[64].mxu1 }
0x101c   :  { %v4864_v27 = vpop.f32.mrb[65].mxu1  ;;  %4951 = vmatmul.mubr.msk.f32.gmra.mrb[84].mxu1 %vm382_vm3, %v2098_v12 }
0x101d   :  { %4953 = vmatprep.mubr.msk.f32.mxu1 %vm5672_vm0, %v5673_v4 }
0x101f   :  { %v2103_v48 = vpop.f32.mrb[66].mxu1 }
0x1020   :  { %v4867_v49 = vpop.f32.mrb[67].mxu1  ;;  %4954 = vmatmul.mubr.msk.f32.gmra.mrb[86].mxu1 %vm382_vm3, %v2103_v48 }
0x1021   :  { %4956 = vmatprep.mubr.msk.f32.mxu1 %vm5672_vm0, %v5673_v4 }
0x1023   :  { %v2108_v37 = vpop.f32.mrb[68].mxu1 }
0x1024   :  { %v4870_v30 = vpop.f32.mrb[69].mxu1  ;;  %4957 = vmatmul.mubr.msk.f32.gmra.mrb[88].mxu1 %vm382_vm3, %v2108_v37 }
0x1025   :  { %4998 = vmatprep.mubr.msk.f32.mxu1 %vm5672_vm0, %v5673_v4 }
0x1050   :  { %v2403_v15 = vpop.f32.mrb[70].mxu1 }
0x1051   :  { %v4908_v21 = vpop.f32.mrb[71].mxu1  ;;  %4926 = vmatmul.mubr.msk.f32.vlgmr.msra.gmra.mrb[70].mxu0 %vm382_vm3, %v2403_v15 }
0x1052   :  { %4928 = vmatprep.mubr.msk.f32.mxu0 %vm5672_vm0, %v5673_v4 }
0x1054   :  { %v2408_v1 = vpop.f32.mrb[72].mxu1 }
0x1055   :  { %v4911_v32 = vpop.f32.mrb[73].mxu1  ;;  %4929 = vmatmul.mubr.msk.f32.gmra.mrb[72].mxu0 %vm382_vm3, %v2408_v1 }
0x1056   :  { %4931 = vmatprep.mubr.msk.f32.mxu0 %vm5672_vm0, %v5673_v4 }
0x1058   :  { %v2413_v28 = vpop.f32.mrb[74].mxu1 }
0x1059   :  { %v4914_v16 = vpop.f32.mrb[75].mxu1  ;;  %4932 = vmatmul.mubr.msk.f32.gmra.mrb[74].mxu0 %vm382_vm3, %v2413_v28 }
0x105a   :  { %4934 = vmatprep.mubr.msk.f32.mxu0 %vm5672_vm0, %v5673_v4 }
0x105c   :  { %v2418_v35 = vpop.f32.mrb[76].mxu1 }
0x105d   :  { %v4917_v23 = vpop.f32.mrb[77].mxu1  ;;  %4935 = vmatmul.mubr.msk.f32.gmra.mrb[76].mxu0 %vm382_vm3, %v2418_v35 }
0x105e   :  { %4937 = vmatprep.mubr.msk.f32.mxu0 %vm5672_vm0, %v5673_v4 }
0x1060   :  { %v2423_v63 = vpop.f32.mrb[78].mxu1 }
0x1061   :  { %v4920_v10 = vpop.f32.mrb[79].mxu1  ;;  %4938 = vmatmul.mubr.msk.f32.gmra.mrb[78].mxu0 %vm382_vm3, %v2423_v63 }
0x1062   :  { %4967 = vmatprep.mubr.msk.f32.mxu0 %vm5672_vm0, %v5673_v4 }
0x10e7   :  { %v2629_v6 = vpop.f32.mrb[80].mxu1 }
0x10e8   :  { %v4946_v20 = vpop.f32.mrb[81].mxu1 }
0x10eb   :  { %v2634_v22 = vpop.f32.mrb[82].mxu1 }
0x10ec   :  { %v4949_v54 = vpop.f32.mrb[83].mxu1 }
0x10ef   :  { %v2639_v14 = vpop.f32.mrb[84].mxu1 }
0x10f0   :  { %v4952_v7 = vpop.f32.mrb[85].mxu1 }
0x10f3   :  { %v2644_v9 = vpop.f32.mrb[86].mxu1 }
0x10f4   :  { %v4955_v62 = vpop.f32.mrb[87].mxu1 }
0x10f7   :  { %v2649_v36 = vpop.f32.mrb[88].mxu1 }
0x10f8   :  { %v4958_v50 = vpop.f32.mrb[89].mxu1 }
0x10f9   :  { %v4134_v50 = vld [vmem:[%s7115_s4 + $0xc8] sm:$0xff] }
0x1124   :  { %v2516_v3 = vpop.f32.mrb[70].mxu0 }
0x1125   :  { %v2630_v26 = vadd.f32 %v2629_v6, %v2516_v3  ;;  %v4927_v57 = vpop.f32.mrb[71].mxu0  ;;  %v4136_v3 = vld [vmem:[%s7115_s4 + $0xd8] sm:$0xff] }
0x1126   :  { %v4140_v57 = vld [vmem:[%s7115_s4 + $0xf8] sm:$0xff] }
0x1127   :  { %v2653_v47 = vadd.f32 %v2630_v26, %v6304_v8  ;;  %v5344_v26 = vpack.c.bf16 %v4136_v3, %v4134_v50  ;;  %v4148_v50 = vld [vmem:[%s7115_s4 + $0x170] sm:$0xff] }
0x1128   :  { %v2521_v39 = vpop.f32.mrb[72].mxu0 }
0x1129   :  { %v6649_v52 = vadd.f32 %v2661_v11, %v2653_v47  ;;  %v2635_v53 = vadd.f32 %v2634_v22, %v2521_v39  ;;  %v4930_v34 = vpop.f32.mrb[73].mxu0  ;;  %5345 = vmatpush3.bf16.msra.mxu0 %v5344_v26 }
0x112a   :  { %5346 = vmatprep.subr.bf16.mxu0 %v5671_v0 }
0x112b   :  { %v2654_v41 = vadd.f32 %v2635_v53, %v6309_v46  ;;  %v2667_v59 = vsel %vm173_vm2, %v6649_v52, 0.0 }
0x112c   :  { %2668 = vadd.xlane.f32.xlu0 %v2667_v59  ;;  %v2526_v61 = vpop.f32.mrb[74].mxu0 }
0x112d   :  { %v6654_v60 = vadd.f32 %v2661_v11, %v2654_v41  ;;  %v2640_v33 = vadd.f32 %v2639_v14, %v2526_v61  ;;  %v4933_v38 = vpop.f32.mrb[75].mxu0 }
0x112f   :  { %v2655_v56 = vadd.f32 %v2640_v33, %v6314_v42  ;;  %v2670_v8 = vsel %vm173_vm2, %v6654_v60, 0.0 }
0x1130   :  { %2671 = vadd.xlane.f32.xlu1 %v2670_v8  ;;  %v2531_v55 = vpop.f32.mrb[76].mxu0 }
0x1131   :  { %v6659_v43 = vadd.f32 %v2661_v11, %v2655_v56  ;;  %v2645_v13 = vadd.f32 %v2644_v9, %v2531_v55  ;;  %v4936_v46 = vpop.f32.mrb[77].mxu0 }
0x1133   :  { %v2656_v25 = vadd.f32 %v2645_v13, %v6319_v29  ;;  %v2673_v5 = vsel %vm173_vm2, %v6659_v43, 0.0  ;;  %v6700_v13 = vld [vmem:[%s7116_s5 + $0x8] sm:$0xff] }
0x1134   :  { %2674 = vadd.xlane.f32.xlu1 %v2673_v5  ;;  %v2536_v2 = vpop.f32.mrb[78].mxu0  ;;  %v2735_v46 = vrot.slane %v6700_v13, %v1301_v18  ;;  %v2753_v26 = vrot.slane %v6700_v13, %v1319_v19 }
0x1135   :  { %v6664_v31 = vadd.f32 %v2661_v11, %v2656_v25  ;;  %v2650_v58 = vadd.f32 %v2649_v36, %v2536_v2  ;;  %v4939_v42 = vpop.f32.mrb[79].mxu0  ;;  %v2744_v2 = vrot.slane %v6700_v13, %v1310_v40 }
0x1137   :  { %v2657_v44 = vadd.f32 %v2650_v58, %v6324_v51  ;;  %v2676_v24 = vsel %vm173_vm2, %v6664_v31, 0.0 }
0x1138   :  { %2677 = vadd.xlane.f32.xlu1 %v2676_v24 }
0x1139   :  { %v6669_v12 = vadd.f32 %v2661_v11, %v2657_v44  ;;  %v4138_v11 = vld [vmem:[%s7115_s4 + $0xe8] sm:$0xff] }
0x113a   :  { %v5347_v47 = vpack.c.bf16 %v4140_v57, %v4138_v11 }
0x113b   :  { %v2679_v29 = vsel %vm173_vm2, %v6669_v12, 0.0 }
0x113c   :  { %2680 = vadd.xlane.f32.xlu1 %v2679_v29  ;;  %5348 = vmatpush3.bf16.msra.mxu0 %v5347_v47 }
0x113d   :  { %5361 = vmatprep.subr.bf16.mxu0 %v5671_v0 }
0x11b9   :  { %v2669_v27 = vpop.xlane.xlu0 %2668 }
0x11ba   :  { %v2682_v48 = vmul.f32 0.03125, %v2669_v27 }
0x11bc   :  { %v2687_v49 = vsub.f32 %v6649_v52, %v2682_v48 }
0x11bd   :  { %v2672_v37 = vpop.xlane.xlu1 %2671 }
0x11be   :  { %v2683_v30 = vmul.f32 0.03125, %v2672_v37  ;;  %v2692_v15 = vmul.f32 %v2687_v49, %v2687_v49 }
0x11c0   :  { %v2688_v21 = vsub.f32 %v6654_v60, %v2683_v30  ;;  %v2697_v51 = vsel %vm173_vm2, %v2692_v15, 0.0 }
0x11c1   :  { %v2675_v1 = vpop.xlane.xlu1 %2674  ;;  %2698 = vadd.xlane.f32.xlu1 %v2697_v51 }
0x11c2   :  { %v2684_v32 = vmul.f32 0.03125, %v2675_v1  ;;  %v2693_v28 = vmul.f32 %v2688_v21, %v2688_v21 }
0x11c4   :  { %v2689_v16 = vsub.f32 %v6659_v43, %v2684_v32  ;;  %v2700_v35 = vsel %vm173_vm2, %v2693_v28, 0.0 }
0x11c5   :  { %v2678_v23 = vpop.xlane.xlu1 %2677  ;;  %2701 = vadd.xlane.f32.xlu1 %v2700_v35 }
0x11c6   :  { %v2685_v63 = vmul.f32 0.03125, %v2678_v23  ;;  %v2694_v10 = vmul.f32 %v2689_v16, %v2689_v16 }
0x11c8   :  { %v2690_v6 = vsub.f32 %v6664_v31, %v2685_v63  ;;  %v2703_v20 = vsel %vm173_vm2, %v2694_v10, 0.0  ;;  %v4141_v10 = vld [vmem:[%s7115_s4 + $0x100] sm:$0xff] }
0x11c9   :  { %2704 = vadd.xlane.f32.xlu1 %v2703_v20  ;;  %v2681_v22 = vpop.xlane.xlu1 %2680 }
0x11ca   :  { %v2686_v54 = vmul.f32 0.03125, %v2681_v22  ;;  %v2695_v14 = vmul.f32 %v2690_v6, %v2690_v6  ;;  %v4143_v22 = vld [vmem:[%s7115_s4 + $0x120] sm:$0xff] }
0x11cc   :  { %v2691_v7 = vsub.f32 %v6669_v12, %v2686_v54  ;;  %v2706_v9 = vsel %vm173_vm2, %v2695_v14, 0.0  ;;  %v4144_v54 = vld [vmem:[%s7115_s4 + $0x130] sm:$0xff] }
0x11cd   :  { %2707 = vadd.xlane.f32.xlu0 %v2706_v9  ;;  %v5353_v14 = vpack.c.bf16 %v4144_v54, %v4143_v22  ;;  %v4146_v9 = vld [vmem:[%s7115_s4 + $0x150] sm:$0xff] }
0x11ce   :  { %v2696_v62 = vmul.f32 %v2691_v7, %v2691_v7 }
0x11d0   :  { %v2709_v36 = vsel %vm173_vm2, %v2696_v62, 0.0 }
0x11d1   :  { %2710 = vadd.xlane.f32.xlu1 %v2709_v36  ;;  %v4147_v36 = vld [vmem:[%s7115_s4 + $0x160] sm:$0xff] }
0x11d2   :  { %v5359_v3 = vpack.c.bf16 %v4148_v50, %v4147_v36 }
0x124e   :  { %v2699_v39 = vpop.xlane.xlu1 %2698 }
0x124f   :  { %v2712_v53 = vmul.f32 0.03125, %v2699_v39 }
0x1251   :  { %v2717_v34 = vadd.f32 1e-05, %v2712_v53 }
0x1252   :  { %v2702_v41 = vpop.xlane.xlu1 %2701 }
0x1253   :  { %5644 = vrsqrt.f32 %v2717_v34  ;;  %v2713_v59 = vmul.f32 0.03125, %v2702_v41 }
0x1255   :  { %v2718_v61 = vadd.f32 1e-05, %v2713_v59 }
0x1256   :  { %v2705_v33 = vpop.xlane.xlu1 %2704 }
0x1257   :  { %5646 = vrsqrt.f32 %v2718_v61  ;;  %v2714_v38 = vmul.f32 0.03125, %v2705_v33 }
0x1259   :  { %v2719_v56 = vadd.f32 1e-05, %v2714_v38 }
0x125a   :  { %v2708_v8 = vpop.xlane.xlu0 %2707 }
0x125b   :  { %5648 = vrsqrt.f32 %v2719_v56  ;;  %v2715_v55 = vmul.f32 0.03125, %v2708_v8 }
0x125d   :  { %v5645_v25 = vpop.eup %5644  ;;  %v2720_v5 = vadd.f32 1e-05, %v2715_v55 }
0x125e   :  { %v2727_v58 = vmul.f32 %v5645_v25, %v2687_v49  ;;  %v2711_v42 = vpop.xlane.xlu1 %2710 }
0x125f   :  { %5650 = vrsqrt.f32 %v2720_v5  ;;  %v2716_v44 = vmul.f32 0.03125, %v2711_v42 }
0x1260   :  { %v2736_v24 = vmul.f32 %v2735_v46, %v2727_v58 }
0x1261   :  { %v5647_v29 = vpop.eup %5646  ;;  %v2721_v27 = vadd.f32 1e-05, %v2716_v44 }
0x1262   :  { %v2745_v48 = vadd.f32 %v2744_v2, %v2736_v24  ;;  %v2728_v37 = vmul.f32 %v5647_v29, %v2688_v21 }
0x1263   :  { %5652 = vrsqrt.f32 %v2721_v27 }
0x1264   :  { %4968 = vmatmul.mubr.msk.f32.vlgmr.msra.gmra.mrb[80].mxu0 %vm173_vm2, %v2745_v48  ;;  %v2737_v30 = vmul.f32 %v2735_v46, %v2728_v37 }
0x1265   :  { %v5649_v18 = vpop.eup %5648  ;;  %4970 = vmatprep.mubr.msk.f32.mxu0 %vm5672_vm0, %v5673_v4 }
0x1266   :  { %v2746_v15 = vadd.f32 %v2744_v2, %v2737_v30  ;;  %v2729_v51 = vmul.f32 %v5649_v18, %v2689_v16 }
0x1268   :  { %4971 = vmatmul.mubr.msk.f32.gmra.mrb[82].mxu0 %vm173_vm2, %v2746_v15  ;;  %v2738_v40 = vmul.f32 %v2735_v46, %v2729_v51 }
0x1269   :  { %v5651_v49 = vpop.eup %5650  ;;  %4973 = vmatprep.mubr.msk.f32.mxu0 %vm5672_vm0, %v5673_v4 }
0x126a   :  { %v2747_v1 = vadd.f32 %v2744_v2, %v2738_v40  ;;  %v2730_v32 = vmul.f32 %v5651_v49, %v2690_v6  ;;  %v4142_v6 = vld [vmem:[%s7115_s4 + $0x110] sm:$0xff] }
0x126b   :  { %v5350_v20 = vpack.c.bf16 %v4142_v6, %v4141_v10 }
0x126c   :  { %4974 = vmatmul.mubr.msk.f32.gmra.mrb[84].mxu0 %vm173_vm2, %v2747_v1  ;;  %v2739_v21 = vmul.f32 %v2735_v46, %v2730_v32 }
0x126d   :  { %v5653_v28 = vpop.eup %5652  ;;  %4976 = vmatprep.mubr.msk.f32.mxu0 %vm5672_vm0, %v5673_v4  ;;  %5351 = vmatpush3.bf16.msra.mxu1 %v5350_v20 }
0x126e   :  { %v2748_v35 = vadd.f32 %v2744_v2, %v2739_v21  ;;  %v2731_v23 = vmul.f32 %v5653_v28, %v2691_v7  ;;  %5352 = vmatprep.subr.bf16.mxu1 %v5671_v0  ;;  %v4145_v7 = vld [vmem:[%s7115_s4 + $0x140] sm:$0xff] }
0x126f   :  { %v5356_v62 = vpack.c.bf16 %v4146_v9, %v4145_v7 }
0x1270   :  { %4977 = vmatmul.mubr.msk.f32.gmra.mrb[86].mxu0 %vm173_vm2, %v2748_v35  ;;  %v2740_v16 = vmul.f32 %v2735_v46, %v2731_v23 }
0x1271   :  { %4979 = vmatprep.mubr.msk.f32.mxu0 %vm5672_vm0, %v5673_v4  ;;  %5354 = vmatpush3.bf16.msra.mxu1 %v5353_v14 }
0x1272   :  { %v2749_v63 = vadd.f32 %v2744_v2, %v2740_v16  ;;  %5355 = vmatprep.subr.bf16.mxu1 %v5671_v0 }
0x1274   :  { %4980 = vmatmul.mubr.msk.f32.gmra.mrb[88].mxu0 %vm173_vm2, %v2749_v63 }
0x1275   :  { %5023 = vmatprep.mubr.msk.f32.mxu0 %vm5672_vm0, %v5673_v4  ;;  %5357 = vmatpush3.bf16.msra.mxu1 %v5356_v62 }
0x1276   :  { %5358 = vmatprep.subr.bf16.mxu1 %v5671_v0 }
0x1279   :  { %5360 = vmatpush3.bf16.msra.mxu1 %v5359_v3 }
0x127a   :  { %5367 = vmatprep.subr.bf16.mxu1 %v5671_v0 }
0x1337   :  { %v2835_v11 = vpop.f32.mrb[80].mxu0 }
0x1338   :  { %v2836_v57 = vadd.f32 %v2835_v11, %v2753_v26  ;;  %v4969_v47 = vpop.f32.mrb[81].mxu0 }
0x133a   :  { %v2864_v39 = vmul.f32 0.044715, %v2836_v57  ;;  %v2859_v16 = vmul.f32 0.5, %v2836_v57 }
0x133b   :  { %v2840_v53 = vpop.f32.mrb[82].mxu0 }
0x133c   :  { %v2869_v34 = vmul.f32 %v2864_v39, %v2836_v57  ;;  %v2841_v41 = vadd.f32 %v2840_v53, %v2753_v26  ;;  %v4972_v59 = vpop.f32.mrb[83].mxu0 }
0x133e   :  { %v2874_v61 = vmul.f32 %v2869_v34, %v2836_v57  ;;  %v2865_v33 = vmul.f32 0.044715, %v2841_v41  ;;  %v2860_v54 = vmul.f32 0.5, %v2841_v41 }
0x133f   :  { %v2845_v38 = vpop.f32.mrb[84].mxu0 }
0x1340   :  { %v2879_v56 = vadd.f32 %v2874_v61, %v2836_v57  ;;  %v2870_v8 = vmul.f32 %v2865_v33, %v2841_v41  ;;  %v2846_v55 = vadd.f32 %v2845_v38, %v2753_v26  ;;  %v4975_v46 = vpop.f32.mrb[85].mxu0  ;;  %v3017_v33 = vrot.slane %v6700_v13, %v1584_v45 }
0x1342   :  { %v2884_v25 = vmul.f32 0.7978846, %v2879_v56  ;;  %v2875_v5 = vmul.f32 %v2870_v8, %v2841_v41  ;;  %v2866_v2 = vmul.f32 0.044715, %v2846_v55  ;;  %v2861_v62 = vmul.f32 0.5, %v2846_v55 }
0x1343   :  { %v2850_v58 = vpop.f32.mrb[86].mxu0 }
0x1344   :  { %5654 = vtanh.f32 %v2884_v25  ;;  %v2880_v19 = vadd.f32 %v2875_v5, %v2841_v41  ;;  %v2871_v42 = vmul.f32 %v2866_v2, %v2846_v55  ;;  %v2851_v44 = vadd.f32 %v2850_v58, %v2753_v26  ;;  %v4978_v24 = vpop.f32.mrb[87].mxu0 }
0x1346   :  { %v2876_v29 = vmul.f32 %v2871_v42, %v2846_v55  ;;  %v2867_v27 = vmul.f32 0.044715, %v2851_v44  ;;  %v2885_v48 = vmul.f32 0.7978846, %v2880_v19 }
0x1347   :  { %v2855_v37 = vpop.f32.mrb[88].mxu0 }
0x1348   :  { %v2881_v30 = vadd.f32 %v2876_v29, %v2846_v55  ;;  %v2872_v18 = vmul.f32 %v2867_v27, %v2851_v44  ;;  %v2856_v15 = vadd.f32 %v2855_v37, %v2753_v26  ;;  %v4981_v51 = vpop.f32.mrb[89].mxu0  ;;  %5656 = vtanh.f32 %v2885_v48  ;;  %v4210_v29 = vld [vmem:[%s7118_s6 + $0x28] sm:$0xff]  ;;  %v4211_v27 = vld [vmem:[%s7118_s6 + $0x30] sm:$0xff]  ;;  %v4212_v37 = vld [vmem:[%s7118_s6 + $0x38] sm:$0xff] }
0x1349   :  { %v2862_v26 = vmul.f32 0.5, %v2851_v44  ;;  %v3025_v48 = vld [vmem:[%s7118_s6 + $0x10] sm:$0xff]  ;;  %v4214_v51 = vld [vmem:[%s7118_s6 + $0x48] sm:$0xff] }
0x134a   :  { %v2877_v40 = vmul.f32 %v2872_v18, %v2851_v44  ;;  %v2868_v49 = vmul.f32 0.044715, %v2856_v15  ;;  %v2886_v1 = vmul.f32 0.7978846, %v2881_v30  ;;  %v2863_v39 = vmul.f32 0.5, %v2856_v15  ;;  %v3026_v30 = vld [vmem:[%s7118_s6 + $0x18] sm:$0xff] }
0x134b   :  { %v4213_v18 = vld [vmem:[%s7118_s6 + $0x40] sm:$0xff] }
0x134c   :  { %v2882_v32 = vadd.f32 %v2877_v40, %v2851_v44  ;;  %v2873_v21 = vmul.f32 %v2868_v49, %v2856_v15  ;;  %5658 = vtanh.f32 %v2886_v1  ;;  %v4220_v40 = vld [vmem:[%s7118_s6 + $0x50] sm:$0xff]  ;;  %v4230_v49 = vld [vmem:[%s7118_s6 + $0x78] sm:$0xff] }
0x134d   :  { %v4221_v1 = vld [vmem:[%s7118_s6 + $0x58] sm:$0xff] }
0x134e   :  { %v5655_v28 = vpop.eup %5654  ;;  %v2878_v35 = vmul.f32 %v2873_v21, %v2856_v15  ;;  %v2887_v23 = vmul.f32 0.7978846, %v2882_v32  ;;  %v4231_v32 = vld [vmem:[%s7118_s6 + $0x80] sm:$0xff] }
0x134f   :  { %v2894_v63 = vadd.f32 1.0, %v5655_v28  ;;  %v4222_v21 = vld [vmem:[%s7118_s6 + $0x60] sm:$0xff]  ;;  %v4232_v28 = vld [vmem:[%s7118_s6 + $0x88] sm:$0xff] }
0x1350   :  { %v2883_v10 = vadd.f32 %v2878_v35, %v2856_v15  ;;  %5660 = vtanh.f32 %v2887_v23  ;;  %v3027_v15 = vld [vmem:[%s7118_s6 + $0x20] sm:$0xff]  ;;  %v4223_v35 = vld [vmem:[%s7118_s6 + $0x68] sm:$0xff]  ;;  %v4233_v23 = vld [vmem:[%s7118_s6 + $0x90] sm:$0xff] }
0x1351   :  { %v2899_v6 = vmul.f32 %v2894_v63, %v2859_v16  ;;  %v4224_v16 = vld [vmem:[%s7118_s6 + $0x70] sm:$0xff]  ;;  %v4234_v63 = vld [vmem:[%s7118_s6 + $0x98] sm:$0xff] }
0x1352   :  { %v5657_v20 = vpop.eup %5656  ;;  %v2888_v22 = vmul.f32 0.7978846, %v2883_v10  ;;  %v4240_v10 = vld [vmem:[%s7118_s6 + $0xa0] sm:$0xff] }
0x1353   :  { %4999 = vmatmul.mubr.msk.f32.vlgmr.msra.gmra.mrb[90].mxu1 %vm1471_vm6, %v2899_v6  ;;  %v2895_v14 = vadd.f32 1.0, %v5657_v20  ;;  %v4250_v6 = vld [vmem:[%s7118_s6 + $0xc8] sm:$0xff] }
0x1354   :  { %5001 = vmatprep.mubr.msk.f32.mxu1 %vm5672_vm0, %v5673_v4  ;;  %5662 = vtanh.f32 %v2888_v22  ;;  %v4241_v20 = vld [vmem:[%s7118_s6 + $0xa8] sm:$0xff]  ;;  %v4251_v22 = vld [vmem:[%s7118_s6 + $0xd0] sm:$0xff] }
0x1355   :  { %v2900_v7 = vmul.f32 %v2895_v14, %v2860_v54  ;;  %v4242_v54 = vld [vmem:[%s7118_s6 + $0xb0] sm:$0xff]  ;;  %v4252_v14 = vld [vmem:[%s7118_s6 + $0xd8] sm:$0xff] }
0x1356   :  { %v5659_v9 = vpop.eup %5658 }
0x1357   :  { %5002 = vmatmul.mubr.msk.f32.gmra.mrb[92].mxu1 %vm1471_vm6, %v2900_v7  ;;  %v2896_v36 = vadd.f32 1.0, %v5659_v9  ;;  %v4243_v7 = vld [vmem:[%s7118_s6 + $0xb8] sm:$0xff]  ;;  %v4253_v9 = vld [vmem:[%s7118_s6 + $0xe0] sm:$0xff] }
0x1358   :  { %5004 = vmatprep.mubr.msk.f32.mxu1 %vm5672_vm0, %v5673_v4 }
0x1359   :  { %v2901_v50 = vmul.f32 %v2896_v36, %v2861_v62  ;;  %v4244_v62 = vld [vmem:[%s7118_s6 + $0xc0] sm:$0xff]  ;;  %v4254_v36 = vld [vmem:[%s7118_s6 + $0xe8] sm:$0xff] }
0x135a   :  { %v5661_v3 = vpop.eup %5660 }
0x135b   :  { %5005 = vmatmul.mubr.msk.f32.gmra.mrb[94].mxu1 %vm1471_vm6, %v2901_v50  ;;  %v2897_v11 = vadd.f32 1.0, %v5661_v3  ;;  %v4260_v50 = vld [vmem:[%s7118_s6 + $0xf0] sm:$0xff]  ;;  %v4270_v3 = vld [vmem:[%s7118_s6 + $0x118] sm:$0xff] }
0x135c   :  { %5007 = vmatprep.mubr.msk.f32.mxu1 %vm5672_vm0, %v5673_v4 }
0x135d   :  { %v2902_v57 = vmul.f32 %v2897_v11, %v2862_v26  ;;  %v4261_v26 = vld [vmem:[%s7118_s6 + $0xf8] sm:$0xff]  ;;  %v4271_v11 = vld [vmem:[%s7118_s6 + $0x120] sm:$0xff] }
0x135e   :  { %v5663_v47 = vpop.eup %5662 }
0x135f   :  { %5008 = vmatmul.mubr.msk.f32.gmra.mrb[96].mxu1 %vm1471_vm6, %v2902_v57  ;;  %v2898_v53 = vadd.f32 1.0, %v5663_v47  ;;  %v4262_v57 = vld [vmem:[%s7118_s6 + $0x100] sm:$0xff]  ;;  %v4272_v47 = vld [vmem:[%s7118_s6 + $0x128] sm:$0xff] }
0x1360   :  { %5010 = vmatprep.mubr.msk.f32.mxu1 %vm5672_vm0, %v5673_v4 }
0x1361   :  { %v2903_v34 = vmul.f32 %v2898_v53, %v2863_v39  ;;  %v4263_v39 = vld [vmem:[%s7118_s6 + $0x108] sm:$0xff]  ;;  %v4273_v53 = vld [vmem:[%s7118_s6 + $0x130] sm:$0xff] }
0x1363   :  { %5011 = vmatmul.mubr.msk.f32.gmra.mrb[98].mxu1 %vm1471_vm6, %v2903_v34  ;;  %v4264_v34 = vld [vmem:[%s7118_s6 + $0x110] sm:$0xff] }
0x1364   :  { %5048 = vmatprep.mubr.msk.f32.mxu1 %vm5672_vm0, %v5673_v4 }
0x1426   :  { %v2985_v41 = vpop.f32.mrb[90].mxu1 }
0x1427   :  { %v5000_v59 = vpop.f32.mrb[91].mxu1  ;;  %v3009_v61 = vadd.f32 %v2985_v41, %v6649_v52  ;;  %v4274_v41 = vld [vmem:[%s7118_s6 + $0x138] sm:$0xff] }
0x1428   :  { %v3950_v59 = vld [vmem:[%s7119_s7] sm:$0xff] }
0x1429   :  { %v3018_v55 = vadd.f32 %v3017_v33, %v3009_v61  ;;  %v3951_v61 = vld [vmem:[%s7119_s7 + $0x8] sm:$0xff] }
0x142a   :  { %v2990_v38 = vpop.f32.mrb[92].mxu1 }
0x142b   :  { %v3010_v56 = vadd.f32 %v2990_v38, %v6654_v60  ;;  %v5003_v8 = vpop.f32.mrb[93].mxu1  ;;  %v3952_v38 = vld [vmem:[%s7119_s7 + $0x10] sm:$0xff] }
0x142d   :  { %v3019_v46 = vadd.f32 %v3017_v33, %v3010_v56  ;;  %v3953_v56 = vld [vmem:[%s7119_s7 + $0x18] sm:$0xff] }
0x142e   :  { %v2995_v25 = vpop.f32.mrb[94].mxu1  ;;  %v5413_v8 = vpack.c.bf16 %v3953_v56, %v3952_v38 }
0x142f   :  { %v6774_v5 = vpack.c.bf16 %v3019_v46, %v3018_v55  ;;  %v5006_v2 = vpop.f32.mrb[95].mxu1  ;;  %v3011_v58 = vadd.f32 %v2995_v25, %v6659_v43 }
0x1431   :  { %5363 = vmatpush3.bf16.msra.mxu0 %v6774_v5  ;;  %5369 = vmatpush3.bf16.msra.mxu1 %v6774_v5  ;;  %v3020_v60 = vadd.f32 %v3017_v33, %v3011_v58 }
0x1432   :  { %v3000_v52 = vpop.f32.mrb[96].mxu1  ;;  %5364 = vmatprep.subr.bf16.mxu0 %v5671_v0  ;;  %5370 = vmatprep.subr.bf16.mxu1 %v5671_v0 }
0x1433   :  { %v3012_v17 = vadd.f32 %v3000_v52, %v6664_v31  ;;  %v5009_v45 = vpop.f32.mrb[97].mxu1  ;;  %v3023_v31 = vld [vmem:[%s7118_s6] sm:$0xff] }
0x1435   :  { %v3021_v13 = vadd.f32 %v3017_v33, %v3012_v17 }
0x1436   :  { %v3005_v19 = vpop.f32.mrb[98].mxu1 }
0x1437   :  { %v6782_v42 = vpack.c.bf16 %v3021_v13, %v3020_v60  ;;  %v3013_v44 = vadd.f32 %v3005_v19, %v6669_v12  ;;  %v5012_v43 = vpop.f32.mrb[99].mxu1  ;;  %v3024_v12 = vld [vmem:[%s7118_s6 + $0x8] sm:$0xff] }
0x1439   :  { %5366 = vmatpush3.bf16.msra.mxu0 %v6782_v42  ;;  %5372 = vmatpush3.bf16.msra.mxu1 %v6782_v42  ;;  %v6789_v24 = vadd.f32 %v3017_v33, %v3013_v44  ;;  %v5410_v33 = vpack.c.bf16 %v3951_v61, %v3950_v59 }
0x143a   :  { %5021 = vmatprep.subr.mxu0 %v5673_v4  ;;  %5046 = vmatprep.subr.mxu1 %v5673_v4 }
0x143d   :  { %5022 = vmatpush3.msra.mxu0 %v6789_v24  ;;  %5047 = vmatpush3.msra.mxu1 %v6789_v24 }
0x143e   :  { %5024 = vmatmul.mubr.msk.f32.vlgmr.msra.gmra.mrb[90].mxu0 %vm503_vm5, %v3023_v31  ;;  %5049 = vmatmul.mubr.msk.f32.vlgmr.msra.gmra.mrb[100].mxu1 %vm503_vm5, %v4210_v29 }
0x143f   :  { %5373 = vmatprep.subr.bf16.mxu0 %v5671_v0  ;;  %5379 = vmatprep.subr.bf16.mxu1 %v5671_v0 }
0x1440   :  { %5375 = vmatpush3.bf16.msra.mxu0 %v6774_v5  ;;  %5381 = vmatpush3.bf16.msra.mxu1 %v6774_v5 }
0x1441   :  { %5026 = vmatprep.mubr.msk.f32.mxu0 %vm5672_vm0, %v5673_v4  ;;  %5051 = vmatprep.mubr.msk.f32.mxu1 %vm5672_vm0, %v5673_v4 }
0x1442   :  { %5027 = vmatmul.mubr.msk.f32.gmra.mrb[92].mxu0 %vm503_vm5, %v3024_v12  ;;  %5052 = vmatmul.mubr.msk.f32.gmra.mrb[102].mxu1 %vm503_vm5, %v4211_v27 }
0x1443   :  { %5376 = vmatprep.subr.bf16.mxu0 %v5671_v0  ;;  %5382 = vmatprep.subr.bf16.mxu1 %v5671_v0 }
0x1444   :  { %5378 = vmatpush3.bf16.msra.mxu0 %v6782_v42  ;;  %5384 = vmatpush3.bf16.msra.mxu1 %v6782_v42 }
0x1445   :  { %5029 = vmatprep.mubr.msk.f32.mxu0 %vm5672_vm0, %v5673_v4  ;;  %5054 = vmatprep.mubr.msk.f32.mxu1 %vm5672_vm0, %v5673_v4 }
0x1446   :  { %5030 = vmatmul.mubr.msk.f32.gmra.mrb[94].mxu0 %vm503_vm5, %v3025_v48  ;;  %5055 = vmatmul.mubr.msk.f32.gmra.mrb[104].mxu1 %vm503_vm5, %v4212_v37 }
0x1447   :  { %5071 = vmatprep.subr.mxu0 %v5673_v4  ;;  %5096 = vmatprep.subr.mxu1 %v5673_v4 }
0x1448   :  { %5072 = vmatpush3.msra.mxu0 %v6789_v24  ;;  %5097 = vmatpush3.msra.mxu1 %v6789_v24 }
0x1449   :  { %5032 = vmatprep.mubr.msk.f32.mxu0 %vm5672_vm0, %v5673_v4  ;;  %5057 = vmatprep.mubr.msk.f32.mxu1 %vm5672_vm0, %v5673_v4 }
0x144a   :  { %5033 = vmatmul.mubr.msk.f32.gmra.mrb[96].mxu0 %vm503_vm5, %v3026_v30  ;;  %5058 = vmatmul.mubr.msk.f32.gmra.mrb[106].mxu1 %vm503_vm5, %v4213_v18 }
0x144b   :  { %5035 = vmatprep.mubr.msk.f32.mxu0 %vm5672_vm0, %v5673_v4  ;;  %5060 = vmatprep.mubr.msk.f32.mxu1 %vm5672_vm0, %v5673_v4 }
0x144c   :  { %5385 = vmatprep.subr.bf16.mxu0 %v5671_v0  ;;  %5391 = vmatprep.subr.bf16.mxu1 %v5671_v0 }
0x144e   :  { %5036 = vmatmul.mubr.msk.f32.gmra.mrb[98].mxu0 %vm503_vm5, %v3027_v15  ;;  %5061 = vmatmul.mubr.msk.f32.gmra.mrb[108].mxu1 %vm503_vm5, %v4214_v51 }
0x144f   :  { %5073 = vmatprep.mubr.msk.f32.mxu0 %vm5672_vm0, %v5673_v4  ;;  %5098 = vmatprep.mubr.msk.f32.mxu1 %vm5672_vm0, %v5673_v4 }
0x1452   :  { %5074 = vmatmul.mubr.msk.f32.vlgmr.msra.gmra.mrb[100].mxu0 %vm503_vm5, %v4220_v40  ;;  %5099 = vmatmul.mubr.msk.f32.vlgmr.msra.gmra.mrb[110].mxu1 %vm503_vm5, %v4230_v49 }
0x1453   :  { %5387 = vmatpush3.bf16.msra.mxu0 %v6774_v5  ;;  %5393 = vmatpush3.bf16.msra.mxu1 %v6774_v5 }
0x1454   :  { %5076 = vmatprep.mubr.msk.f32.mxu0 %vm5672_vm0, %v5673_v4  ;;  %5101 = vmatprep.mubr.msk.f32.mxu1 %vm5672_vm0, %v5673_v4 }
0x1455   :  { %5388 = vmatprep.subr.bf16.mxu0 %v5671_v0  ;;  %5394 = vmatprep.subr.bf16.mxu1 %v5671_v0 }
0x1456   :  { %5077 = vmatmul.mubr.msk.f32.gmra.mrb[102].mxu0 %vm503_vm5, %v4221_v1  ;;  %5102 = vmatmul.mubr.msk.f32.gmra.mrb[112].mxu1 %vm503_vm5, %v4231_v32 }
0x1457   :  { %5390 = vmatpush3.bf16.msra.mxu0 %v6782_v42  ;;  %5396 = vmatpush3.bf16.msra.mxu1 %v6782_v42 }
0x1458   :  { %5079 = vmatprep.mubr.msk.f32.mxu0 %vm5672_vm0, %v5673_v4  ;;  %5104 = vmatprep.mubr.msk.f32.mxu1 %vm5672_vm0, %v5673_v4 }
0x1459   :  { %5121 = vmatprep.subr.mxu0 %v5673_v4  ;;  %5146 = vmatprep.subr.mxu1 %v5673_v4 }
0x145a   :  { %5080 = vmatmul.mubr.msk.f32.gmra.mrb[104].mxu0 %vm503_vm5, %v4222_v21  ;;  %5105 = vmatmul.mubr.msk.f32.gmra.mrb[114].mxu1 %vm503_vm5, %v4232_v28 }
0x145b   :  { %5122 = vmatpush3.msra.mxu0 %v6789_v24  ;;  %5147 = vmatpush3.msra.mxu1 %v6789_v24 }
0x145c   :  { %5082 = vmatprep.mubr.msk.f32.mxu0 %vm5672_vm0, %v5673_v4  ;;  %5107 = vmatprep.mubr.msk.f32.mxu1 %vm5672_vm0, %v5673_v4 }
0x145d   :  { %5397 = vmatprep.subr.bf16.mxu0 %v5671_v0  ;;  %5403 = vmatprep.subr.bf16.mxu1 %v5671_v0 }
0x145e   :  { %5083 = vmatmul.mubr.msk.f32.gmra.mrb[106].mxu0 %vm503_vm5, %v4223_v35  ;;  %5108 = vmatmul.mubr.msk.f32.gmra.mrb[116].mxu1 %vm503_vm5, %v4233_v23 }
0x145f   :  { %5085 = vmatprep.mubr.msk.f32.mxu0 %vm5672_vm0, %v5673_v4  ;;  %5110 = vmatprep.mubr.msk.f32.mxu1 %vm5672_vm0, %v5673_v4 }
0x1462   :  { %5086 = vmatmul.mubr.msk.f32.gmra.mrb[108].mxu0 %vm503_vm5, %v4224_v16  ;;  %5111 = vmatmul.mubr.msk.f32.gmra.mrb[118].mxu1 %vm503_vm5, %v4234_v63 }
0x1463   :  { %5123 = vmatprep.mubr.msk.f32.mxu0 %vm5672_vm0, %v5673_v4  ;;  %5148 = vmatprep.mubr.msk.f32.mxu1 %vm5672_vm0, %v5673_v4 }
0x1466   :  { %5124 = vmatmul.mubr.msk.f32.vlgmr.msra.gmra.mrb[110].mxu0 %vm503_vm5, %v4240_v10  ;;  %5149 = vmatmul.mubr.msk.f32.vlgmr.msra.gmra.mrb[120].mxu1 %vm503_vm5, %v4250_v6 }
0x1467   :  { %5399 = vmatpush3.bf16.msra.mxu0 %v6774_v5  ;;  %5405 = vmatpush3.bf16.msra.mxu1 %v6774_v5 }
0x1468   :  { %5126 = vmatprep.mubr.msk.f32.mxu0 %vm5672_vm0, %v5673_v4  ;;  %5151 = vmatprep.mubr.msk.f32.mxu1 %vm5672_vm0, %v5673_v4 }
0x1469   :  { %5400 = vmatprep.subr.bf16.mxu0 %v5671_v0  ;;  %5406 = vmatprep.subr.bf16.mxu1 %v5671_v0 }
0x146a   :  { %5127 = vmatmul.mubr.msk.f32.gmra.mrb[112].mxu0 %vm503_vm5, %v4241_v20  ;;  %5152 = vmatmul.mubr.msk.f32.gmra.mrb[122].mxu1 %vm503_vm5, %v4251_v22 }
0x146b   :  { %5402 = vmatpush3.bf16.msra.mxu0 %v6782_v42  ;;  %5408 = vmatpush3.bf16.msra.mxu1 %v6782_v42 }
0x146c   :  { %5129 = vmatprep.mubr.msk.f32.mxu0 %vm5672_vm0, %v5673_v4  ;;  %5154 = vmatprep.mubr.msk.f32.mxu1 %vm5672_vm0, %v5673_v4 }
0x146d   :  { %5171 = vmatprep.subr.mxu0 %v5673_v4  ;;  %5196 = vmatprep.subr.mxu1 %v5673_v4 }
0x146e   :  { %5130 = vmatmul.mubr.msk.f32.gmra.mrb[114].mxu0 %vm503_vm5, %v4242_v54  ;;  %5155 = vmatmul.mubr.msk.f32.gmra.mrb[124].mxu1 %vm503_vm5, %v4252_v14 }
0x146f   :  { %5172 = vmatpush3.msra.mxu0 %v6789_v24  ;;  %5197 = vmatpush3.msra.mxu1 %v6789_v24 }
0x1470   :  { %5132 = vmatprep.mubr.msk.f32.mxu0 %vm5672_vm0, %v5673_v4  ;;  %5157 = vmatprep.mubr.msk.f32.mxu1 %vm5672_vm0, %v5673_v4 }
0x1471   :  { %5409 = vmatprep.subr.bf16.mxu0 %v5671_v0 }
0x1472   :  { %5133 = vmatmul.mubr.msk.f32.gmra.mrb[116].mxu0 %vm503_vm5, %v4243_v7  ;;  %5158 = vmatmul.mubr.msk.f32.gmra.mrb[126].mxu1 %vm503_vm5, %v4253_v9 }
0x1473   :  { %5135 = vmatprep.mubr.msk.f32.mxu0 %vm5672_vm0, %v5673_v4  ;;  %5160 = vmatprep.mubr.msk.f32.mxu1 %vm5672_vm0, %v5673_v4 }
0x1476   :  { %5136 = vmatmul.mubr.msk.f32.gmra.mrb[118].mxu0 %vm503_vm5, %v4244_v62  ;;  %5161 = vmatmul.mubr.msk.f32.gmra.mrb[128].mxu1 %vm503_vm5, %v4254_v36 }
0x1477   :  { %5173 = vmatprep.mubr.msk.f32.mxu0 %vm5672_vm0, %v5673_v4  ;;  %5198 = vmatprep.mubr.msk.f32.mxu1 %vm5672_vm0, %v5673_v4 }
0x147a   :  { %5174 = vmatmul.mubr.msk.f32.vlgmr.msra.gmra.mrb[120].mxu0 %vm503_vm5, %v4260_v50  ;;  %5199 = vmatmul.mubr.msk.f32.vlgmr.msra.gmra.mrb[130].mxu1 %vm503_vm5, %v4270_v3 }
0x147b   :  { %5176 = vmatprep.mubr.msk.f32.mxu0 %vm5672_vm0, %v5673_v4  ;;  %5201 = vmatprep.mubr.msk.f32.mxu1 %vm5672_vm0, %v5673_v4 }
0x147c   :  { %5411 = vmatpush3.bf16.msra.mxu0 %v5410_v33 }
0x147d   :  { %5412 = vmatprep.subr.bf16.mxu0 %v5671_v0 }
0x147e   :  { %5177 = vmatmul.mubr.msk.f32.gmra.mrb[122].mxu0 %vm503_vm5, %v4261_v26  ;;  %5202 = vmatmul.mubr.msk.f32.gmra.mrb[132].mxu1 %vm503_vm5, %v4271_v11 }
0x147f   :  { %5179 = vmatprep.mubr.msk.f32.mxu0 %vm5672_vm0, %v5673_v4  ;;  %5204 = vmatprep.mubr.msk.f32.mxu1 %vm5672_vm0, %v5673_v4 }
0x1480   :  { %5414 = vmatpush3.bf16.msra.mxu0 %v5413_v8 }
0x1482   :  { %5180 = vmatmul.mubr.msk.f32.gmra.mrb[124].mxu0 %vm503_vm5, %v4262_v57  ;;  %5205 = vmatmul.mubr.msk.f32.gmra.mrb[134].mxu1 %vm503_vm5, %v4272_v47 }
0x1483   :  { %5182 = vmatprep.mubr.msk.f32.mxu0 %vm5672_vm0, %v5673_v4  ;;  %5207 = vmatprep.mubr.msk.f32.mxu1 %vm5672_vm0, %v5673_v4 }
0x1486   :  { %5183 = vmatmul.mubr.msk.f32.gmra.mrb[126].mxu0 %vm503_vm5, %v4263_v39  ;;  %5208 = vmatmul.mubr.msk.f32.gmra.mrb[136].mxu1 %vm503_vm5, %v4273_v53 }
0x1487   :  { %5185 = vmatprep.mubr.msk.f32.mxu0 %vm5672_vm0, %v5673_v4  ;;  %5210 = vmatprep.mubr.msk.f32.mxu1 %vm5672_vm0, %v5673_v4 }
0x148a   :  { %5186 = vmatmul.mubr.msk.f32.gmra.mrb[128].mxu0 %vm503_vm5, %v4264_v34  ;;  %5211 = vmatmul.mubr.msk.f32.gmra.mrb[138].mxu1 %vm503_vm5, %v4274_v41 }
0x148b   :  { %5221 = vmatprep.mubr.msk.f32.mxu0 %vm5672_vm0, %v5673_v4 }
0x1511   :  { %v3109_v55 = vpop.f32.mrb[90].mxu0  ;;  %v3220_v46 = vpop.f32.mrb[100].mxu1 }
0x1512   :  { %v3244_v25 = vmul.f32 %v3220_v46, %v3109_v55  ;;  %v5025_v5 = vpop.f32.mrb[91].mxu0  ;;  %v5050_v2 = vpop.f32.mrb[101].mxu1 }
0x1515   :  { %v3114_v58 = vpop.f32.mrb[92].mxu0  ;;  %v3225_v52 = vpop.f32.mrb[102].mxu1 }
0x1516   :  { %v3245_v17 = vmul.f32 %v3225_v52, %v3114_v58  ;;  %v5028_v45 = vpop.f32.mrb[93].mxu0  ;;  %v5053_v0 = vpop.f32.mrb[103].mxu1 }
0x1519   :  { %v3119_v60 = vpop.f32.mrb[94].mxu0  ;;  %v3230_v13 = vpop.f32.mrb[104].mxu1 }
0x151a   :  { %v3246_v19 = vmul.f32 %v3230_v13, %v3119_v60  ;;  %v5031_v42 = vpop.f32.mrb[95].mxu0  ;;  %v5056_v44 = vpop.f32.mrb[105].mxu1 }
0x151d   :  { %v3124_v43 = vpop.f32.mrb[96].mxu0  ;;  %v3235_v24 = vpop.f32.mrb[106].mxu1 }
0x151e   :  { %v3247_v31 = vmul.f32 %v3235_v24, %v3124_v43  ;;  %v5034_v29 = vpop.f32.mrb[97].mxu0  ;;  %v5059_v12 = vpop.f32.mrb[107].mxu1 }
0x1521   :  { %v3129_v27 = vpop.f32.mrb[98].mxu0  ;;  %v3240_v48 = vpop.f32.mrb[108].mxu1 }
0x1522   :  { %v3248_v37 = vmul.f32 %v3240_v48, %v3129_v27  ;;  %v5037_v30 = vpop.f32.mrb[99].mxu0  ;;  %v5062_v18 = vpop.f32.mrb[109].mxu1 }
0x1525   :  { %v3336_v15 = vpop.f32.mrb[100].mxu0  ;;  %v3447_v51 = vpop.f32.mrb[110].mxu1 }
0x1526   :  { %v3471_v40 = vmul.f32 %v3447_v51, %v3336_v15  ;;  %v5075_v49 = vpop.f32.mrb[101].mxu0  ;;  %v5100_v1 = vpop.f32.mrb[111].mxu1 }
0x1528   :  { %v3476_v32 = vadd.f32 %v3471_v40, %v3244_v25 }
0x1529   :  { %v3341_v21 = vpop.f32.mrb[102].mxu0  ;;  %v3452_v28 = vpop.f32.mrb[112].mxu1 }
0x152a   :  { %v3472_v35 = vmul.f32 %v3452_v28, %v3341_v21  ;;  %v5078_v23 = vpop.f32.mrb[103].mxu0  ;;  %v5103_v16 = vpop.f32.mrb[113].mxu1 }
0x152c   :  { %v3477_v63 = vadd.f32 %v3472_v35, %v3245_v17 }
0x152d   :  { %v3346_v10 = vpop.f32.mrb[104].mxu0  ;;  %v3457_v6 = vpop.f32.mrb[114].mxu1 }
0x152e   :  { %v3473_v20 = vmul.f32 %v3457_v6, %v3346_v10  ;;  %v5081_v22 = vpop.f32.mrb[105].mxu0  ;;  %v5106_v54 = vpop.f32.mrb[115].mxu1 }
0x1530   :  { %v3478_v14 = vadd.f32 %v3473_v20, %v3246_v19 }
0x1531   :  { %v3351_v7 = vpop.f32.mrb[106].mxu0  ;;  %v3462_v9 = vpop.f32.mrb[116].mxu1 }
0x1532   :  { %v3474_v62 = vmul.f32 %v3462_v9, %v3351_v7  ;;  %v5084_v36 = vpop.f32.mrb[107].mxu0  ;;  %v5109_v50 = vpop.f32.mrb[117].mxu1 }
0x1534   :  { %v3479_v3 = vadd.f32 %v3474_v62, %v3247_v31 }
0x1535   :  { %v3356_v26 = vpop.f32.mrb[108].mxu0  ;;  %v3467_v11 = vpop.f32.mrb[118].mxu1 }
0x1536   :  { %v3475_v57 = vmul.f32 %v3467_v11, %v3356_v26  ;;  %v5087_v47 = vpop.f32.mrb[109].mxu0  ;;  %v5112_v39 = vpop.f32.mrb[119].mxu1 }
0x1538   :  { %v3480_v53 = vadd.f32 %v3475_v57, %v3248_v37 }
0x1539   :  { %v3568_v34 = vpop.f32.mrb[110].mxu0  ;;  %v3679_v41 = vpop.f32.mrb[120].mxu1 }
0x153a   :  { %v3703_v59 = vmul.f32 %v3679_v41, %v3568_v34  ;;  %v5125_v61 = vpop.f32.mrb[111].mxu0  ;;  %v5150_v33 = vpop.f32.mrb[121].mxu1 }
0x153c   :  { %v3708_v38 = vadd.f32 %v3703_v59, %v3476_v32  ;;  %v4280_v59 = vld [vmem:[%s7119_s7 + $0x20] ss:$0 sm:$0xff] }
0x153d   :  { %v3573_v56 = vpop.f32.mrb[112].mxu0  ;;  %v3684_v8 = vpop.f32.mrb[122].mxu1 }
0x153e   :  { %v3704_v55 = vmul.f32 %v3684_v8, %v3573_v56  ;;  %v5128_v46 = vpop.f32.mrb[113].mxu0  ;;  %v5153_v25 = vpop.f32.mrb[123].mxu1 }
0x1540   :  { %v3709_v5 = vadd.f32 %v3704_v55, %v3477_v63 }
0x1541   :  { %v3578_v2 = vpop.f32.mrb[114].mxu0  ;;  %v3689_v58 = vpop.f32.mrb[124].mxu1 }
0x1542   :  { %v3705_v52 = vmul.f32 %v3689_v58, %v3578_v2  ;;  %v5131_v17 = vpop.f32.mrb[115].mxu0  ;;  %v5156_v45 = vpop.f32.mrb[125].mxu1 }
0x1544   :  { %v3710_v0 = vadd.f32 %v3705_v52, %v3478_v14 }
0x1545   :  { %v3583_v60 = vpop.f32.mrb[116].mxu0  ;;  %v3694_v13 = vpop.f32.mrb[126].mxu1 }
0x1546   :  { %v3706_v19 = vmul.f32 %v3694_v13, %v3583_v60  ;;  %v5134_v42 = vpop.f32.mrb[117].mxu0  ;;  %v5159_v44 = vpop.f32.mrb[127].mxu1 }
0x1548   :  { %v3711_v43 = vadd.f32 %v3706_v19, %v3479_v3 }
0x1549   :  { %v3588_v24 = vpop.f32.mrb[118].mxu0  ;;  %v3699_v31 = vpop.f32.mrb[128].mxu1 }
0x154a   :  { %v3707_v29 = vmul.f32 %v3699_v31, %v3588_v24  ;;  %v5137_v12 = vpop.f32.mrb[119].mxu0  ;;  %v5162_v27 = vpop.f32.mrb[129].mxu1 }
0x154c   :  { %v3712_v48 = vadd.f32 %v3707_v29, %v3480_v53 }
0x154d   :  { %v3800_v37 = vpop.f32.mrb[120].mxu0  ;;  %v3911_v30 = vpop.f32.mrb[130].mxu1 }
0x154e   :  { %v3935_v18 = vmul.f32 %v3911_v30, %v3800_v37  ;;  %v5175_v15 = vpop.f32.mrb[121].mxu0  ;;  %v5200_v51 = vpop.f32.mrb[131].mxu1 }
0x1550   :  { %v3940_v40 = vadd.f32 %v3935_v18, %v3708_v38 }
0x1551   :  { %v3805_v49 = vpop.f32.mrb[122].mxu0  ;;  %v3916_v1 = vpop.f32.mrb[132].mxu1 }
0x1552   :  { %v3945_v32 = vmax.f32 %v3940_v40, 0.0  ;;  %v3936_v21 = vmul.f32 %v3916_v1, %v3805_v49  ;;  %v5178_v28 = vpop.f32.mrb[123].mxu0  ;;  %v5203_v35 = vpop.f32.mrb[133].mxu1 }
0x1554   :  { %v3941_v23 = vadd.f32 %v3936_v21, %v3709_v5  ;;  %5222 = vmatmul.mubr.msk.f32.vlgmr.msra.gmra.mrb[130].mxu0 %vm173_vm2, %v3945_v32 }
0x1555   :  { %v3810_v16 = vpop.f32.mrb[124].mxu0  ;;  %v3921_v63 = vpop.f32.mrb[134].mxu1  ;;  %5224 = vmatprep.mubr.msk.f32.mxu0 %vm5672_vm0, %v5673_v4 }
0x1556   :  { %v3946_v10 = vmax.f32 %v3941_v23, 0.0  ;;  %v3937_v6 = vmul.f32 %v3921_v63, %v3810_v16  ;;  %v5181_v20 = vpop.f32.mrb[125].mxu0  ;;  %v5206_v22 = vpop.f32.mrb[135].mxu1 }
0x1558   :  { %v3942_v54 = vadd.f32 %v3937_v6, %v3710_v0  ;;  %5225 = vmatmul.mubr.msk.f32.gmra.mrb[132].mxu0 %vm173_vm2, %v3946_v10 }
0x1559   :  { %v3815_v14 = vpop.f32.mrb[126].mxu0  ;;  %v3926_v7 = vpop.f32.mrb[136].mxu1  ;;  %5227 = vmatprep.mubr.msk.f32.mxu0 %vm5672_vm0, %v5673_v4 }
0x155a   :  { %v3947_v9 = vmax.f32 %v3942_v54, 0.0  ;;  %v3938_v62 = vmul.f32 %v3926_v7, %v3815_v14  ;;  %v5184_v36 = vpop.f32.mrb[127].mxu0  ;;  %v5209_v50 = vpop.f32.mrb[137].mxu1 }
0x155c   :  { %v3943_v3 = vadd.f32 %v3938_v62, %v3711_v43  ;;  %5228 = vmatmul.mubr.msk.f32.gmra.mrb[134].mxu0 %vm173_vm2, %v3947_v9 }
0x155d   :  { %v3820_v26 = vpop.f32.mrb[128].mxu0  ;;  %v3931_v11 = vpop.f32.mrb[138].mxu1  ;;  %5230 = vmatprep.mubr.msk.f32.mxu0 %vm5672_vm0, %v5673_v4 }
0x155e   :  { %v3948_v57 = vmax.f32 %v3943_v3, 0.0  ;;  %v3939_v47 = vmul.f32 %v3931_v11, %v3820_v26  ;;  %v5187_v39 = vpop.f32.mrb[129].mxu0  ;;  %v5212_v53 = vpop.f32.mrb[139].mxu1 }
0x1560   :  { %v3944_v34 = vadd.f32 %v3939_v47, %v3712_v48  ;;  %5231 = vmatmul.mubr.msk.f32.gmra.mrb[136].mxu0 %vm173_vm2, %v3948_v57 }
0x1561   :  { %5233 = vmatprep.mubr.msk.f32.mxu0 %vm5672_vm0, %v5673_v4 }
0x1562   :  { %v3949_v41 = vmax.f32 %v3944_v34, 0.0 }
0x1564   :  { %5234 = vmatmul.mubr.msk.f32.gmra.mrb[138].mxu0 %vm173_vm2, %v3949_v41 }
0x1627   :  { %v4040_v61 = vpop.f32.mrb[130].mxu0 }
0x1628   :  { %v4041_v33 = vadd.f32 %v4280_v59, %v4040_v61  ;;  %v5223_v38 = vpop.f32.mrb[131].mxu0 }
0x162a   :  { %4064 = vst [vmem:[%s7120_s8] sm:$0xff] %v4041_v33 }
0x162b   :  { %v4045_v56 = vpop.f32.mrb[132].mxu0 }
0x162c   :  { %v4046_v8 = vadd.f32 %v4280_v59, %v4045_v56  ;;  %v5226_v55 = vpop.f32.mrb[133].mxu0 }
0x162e   :  { %4065 = vst [vmem:[%s7120_s8 + $0x8] sm:$0xff] %v4046_v8 }
0x162f   :  { %v4050_v4 = vpop.f32.mrb[134].mxu0 }
0x1630   :  { %v4051_v46 = vadd.f32 %v4280_v59, %v4050_v4  ;;  %v5229_v25 = vpop.f32.mrb[135].mxu0 }
0x1632   :  { %4066 = vst [vmem:[%s7120_s8 + $0x10] sm:$0xff] %v4051_v46 }
0x1633   :  { %v4055_v5 = vpop.f32.mrb[136].mxu0 }
0x1634   :  { %v4056_v2 = vadd.f32 %v4280_v59, %v4055_v5  ;;  %v5232_v58 = vpop.f32.mrb[137].mxu0 }
0x1636   :  { %4067 = vst [vmem:[%s7120_s8 + $0x18] sm:$0xff] %v4056_v2 }
0x1637   :  { %v4060_v52 = vpop.f32.mrb[138].mxu0 }
0x1638   :  { %v4061_v17 = vadd.f32 %v4280_v59, %v4060_v52  ;;  %v5235_v45 = vpop.f32.mrb[139].mxu0 }
0x163a   :  { %4068 = vst [vmem:[%s7120_s8 + $0x20] sm:$0xff] %v4061_v17 }

</bundles_post_ra>
